<compile_context>
chip_gen: v5e
topology: v5e:2x2
jax: 0.10.0
libtpu: 0.0.40
codegen_flags: <defaults>
</compile_context>

<pallas_src>
import numpy as np
import jax
import jax.numpy as jnp
from jax import lax
from jax.experimental import pallas as pl
from jax.experimental.pallas import tpu as pltpu


# ----------------------------------------------------------------------------
# Fused bi-LSTM + masked-mean-pool kernel (single invocation).
# ----------------------------------------------------------------------------
def _make_bilstm_pool_kernel(s_title, s_body, batch_pad, hidden):
    B = batch_pad
    H = hidden
    H3, H4, H8 = 3 * hidden, 4 * hidden, 8 * hidden

    def kernel(xt_ref, xb_ref, lt_ref, lb_ref, wx_ref, wh_ref, b_ref,
               out_ref, xw_ref):
        wx = wx_ref[...]        # (IN, 8H)  fwd gates [:4H] | bwd gates [4H:]
        bias = b_ref[...]       # (1, 8H)   float32  (b_ih + b_hh, both dirs)
        wh_f = wh_ref[0]        # (H, 4H)   gate order (i, f, o, g)
        wh_b = wh_ref[1]        # (H, 4H)
        cdtype = wh_f.dtype     # matmul operand dtype (f32 or bf16)

        def run_sequence(x_ref, len_ref, seq_len):
            S = seq_len

            # Hoisted input projection: ONE big MXU matmul for the whole
            # sequence and both directions; f32 result lives in VMEM scratch.
            proj = jnp.dot(x_ref[...], wx,
                           preferred_element_type=jnp.float32) + bias
            xw_ref[0:S] = proj.reshape(S, B, H8)

            len_i = len_ref[...]                              # (B, 1) int32
            # msum == per-column length (hoisted out of the time loop);
            # clamp to 1 to avoid NaN for an empty column (documented
            # divergence: the reference would return NaN there).
            inv_len = 1.0 / jnp.maximum(len_i.astype(jnp.float32), 1.0)

            zero = jnp.zeros((B, H), jnp.float32)

            def step(t, carry):
                h_f, c_f, h_b, c_b, acc_f, acc_b = carry
                tr = S - 1 - t          # backward direction walks mirrored time

                # Scalar-index time selection: one slice per direction.
                xw_f = xw_ref[t, :, 0:H4]        # (B, 4H)
                xw_b = xw_ref[tr, :, H4:H8]      # (B, 4H)

                # Two independent fused-gate recurrence matmuls (fwd / bwd)
                # pipeline back-to-back in the MXU within one serial step.
                g_f = xw_f + jnp.dot(h_f.astype(cdtype), wh_f,
                                     preferred_element_type=jnp.float32)
                g_b = xw_b + jnp.dot(h_b.astype(cdtype), wh_b,
                                     preferred_element_type=jnp.float32)

                # Gate order (i, f, o, g): one sigmoid over [:3H], one tanh.
                s_f = jax.nn.sigmoid(g_f[:, 0:H3])
                s_b = jax.nn.sigmoid(g_b[:, 0:H3])
                gg_f = jnp.tanh(g_f[:, H3:H4])
                gg_b = jnp.tanh(g_b[:, H3:H4])

                c_f = s_f[:, H:2 * H] * c_f + s_f[:, 0:H] * gg_f
                c_b = s_b[:, H:2 * H] * c_b + s_b[:, 0:H] * gg_b
                h_f = s_f[:, 2 * H:H3] * jnp.tanh(c_f)
                h_b = s_b[:, 2 * H:H3] * jnp.tanh(c_b)

                # Fused masked mean-pool accumulation: mask_t[j] = (real_t < len[j]).
                m_f = (len_i > t).astype(jnp.float32)         # (B, 1)
                m_b = (len_i > tr).astype(jnp.float32)
                return (h_f, c_f, h_b, c_b,
                        acc_f + h_f * m_f, acc_b + h_b * m_b)

            carry0 = (zero, zero, zero, zero, zero, zero)
            unroll = True if S <= 32 else 8
            _, _, _, _, acc_f, acc_b = lax.fori_loop(0, S, step, carry0,
                                                     unroll=unroll)
            return acc_f * inv_len, acc_b * inv_len

        t_f, t_b = run_sequence(xt_ref, lt_ref, s_title)
        d_f, d_b = run_sequence(xb_ref, lb_ref, s_body)

        # Lane-contiguous (B, 2H) output in PyTorch bi-LSTM [fwd | bwd] layout.
        out_ref[:, 0:H] = 0.5 * (t_f + d_f)
        out_ref[:, H:2 * H] = 0.5 * (t_b + d_b)

    return kernel


# ----------------------------------------------------------------------------
# Wrapper: EmbeddingLayer.forward (layer_type == 'lstm')
# ----------------------------------------------------------------------------
def embedding_layer_forward(title, body, title_len, body_len, params,
                            matmul_dtype=jnp.float32):
    """title: (S_t, B, IN), body: (S_b, B, IN)  time-major like nn.LSTM.
    title_len / body_len: per-batch-element valid lengths (B,).
    params (fused, gate order i,f,o,g, see fuse_lstm_params):
      wx (IN, 8H), wh (2, H, 4H), b (1, 8H).
    Returns (B, 2H) pooled embeddings (0.5 * (title + body))."""
    s_t, B, IN = title.shape
    s_b = body.shape[0]
    H = params["wh"].shape[1]
    assert params["wx"].shape[1] == 8 * H

    B_pad = ((B + 7) // 8) * 8          # sublane-align the batch
    s_max = max(s_t, s_b)

    def prep_x(x, s):
        x = x.astype(matmul_dtype)
        if B_pad != B:
            x = jnp.pad(x, ((0, 0), (0, B_pad - B), (0, 0)))
        return x.reshape(s * B_pad, IN)

    def prep_len(l):
        l = jnp.asarray(l, jnp.int32).reshape(-1)
        if B_pad != B:
            l = jnp.pad(l, (0, B_pad - B))
        return l.reshape(B_pad, 1)

    xt, xb = prep_x(title, s_t), prep_x(body, s_b)
    lt, lb = prep_len(title_len), prep_len(body_len)

    wx = params["wx"].astype(matmul_dtype)     # (IN, 8H)
    wh = params["wh"].astype(matmul_dtype)     # (2, H, 4H)
    b = params["b"].astype(jnp.float32)        # (1, 8H)  bias stays f32

    kernel = _make_bilstm_pool_kernel(s_t, s_b, B_pad, H)

    out = pl.pallas_call(
        kernel,
        out_shape=jax.ShapeDtypeStruct((B_pad, 2 * H), jnp.float32),
        grid=(1,),
        in_specs=[
            pl.BlockSpec((s_t * B_pad, IN), lambda i: (0, 0)),
            pl.BlockSpec((s_b * B_pad, IN), lambda i: (0, 0)),
            pl.BlockSpec((B_pad, 1), lambda i: (0, 0)),
            pl.BlockSpec((B_pad, 1), lambda i: (0, 0)),
            pl.BlockSpec((IN, 8 * H), lambda i: (0, 0)),
            pl.BlockSpec((2, H, 4 * H), lambda i: (0, 0, 0)),
            pl.BlockSpec((1, 8 * H), lambda i: (0, 0)),
        ],
        out_specs=pl.BlockSpec((B_pad, 2 * H), lambda i: (0, 0)),
        scratch_shapes=[pltpu.VMEM((s_max, B_pad, 8 * H), jnp.float32)],
        compiler_params=pltpu.CompilerParams(
            dimension_semantics=("arbitrary",)),
    )(xt, xb, lt, lb, wx, wh, b)

    return out[:B]


# ----------------------------------------------------------------------------
# PyTorch-layout -> fused-kernel-layout weight conversion
# ----------------------------------------------------------------------------
def _reorder_ifgo_to_ifog(w):
    # leading axis = 4H, PyTorch gate order (i, f, g, o) -> kernel order (i, f, o, g)
    i, f, g, o = jnp.split(w, 4, axis=0)
    return jnp.concatenate([i, f, o, g], axis=0)


def fuse_lstm_params(tp):
    """tp holds PyTorch nn.LSTM(bidirectional=True) tensors:
       w_ih (4H, IN), w_hh (4H, H), b_ih (4H,), b_hh (4H,) and *_r for reverse."""
    wx_f = _reorder_ifgo_to_ifog(tp["w_ih"]).T
    wx_b = _reorder_ifgo_to_ifog(tp["w_ih_r"]).T
    wh_f = _reorder_ifgo_to_ifog(tp["w_hh"]).T
    wh_b = _reorder_ifgo_to_ifog(tp["w_hh_r"]).T
    b_f = _reorder_ifgo_to_ifog(tp["b_ih"] + tp["b_hh"])
    b_b = _reorder_ifgo_to_ifog(tp["b_ih_r"] + tp["b_hh_r"])
    return {
        "wx": jnp.concatenate([wx_f, wx_b], axis=1),          # (IN, 8H)
        "wh": jnp.stack([wh_f, wh_b], axis=0),                 # (2, H, 4H)
        "b": jnp.concatenate([b_f, b_b])[None, :],             # (1, 8H)
    }


# ----------------------------------------------------------------------------
# Host-side helpers / pure-JAX reference (PyTorch semantics, for correctness)
# ----------------------------------------------------------------------------
def build_mask3d(seq_len):
    max_len = int(np.max(seq_len))
    mask = np.zeros((max_len, len(seq_len), 1), dtype=np.float32)
    for i, s in enumerate(seq_len):
        mask[: int(s), i] = 1.0
    return mask


def _lstm_dir_ref(x, w_ih, w_hh, b_ih, b_hh):
    B = x.shape[1]
    H = w_hh.shape[1]

    def step(carry, xt):
        h, c = carry
        g = xt @ w_ih.T + h @ w_hh.T + b_ih + b_hh    # PyTorch gate order i,f,g,o
        i = jax.nn.sigmoid(g[:, 0 * H:1 * H])
        f = jax.nn.sigmoid(g[:, 1 * H:2 * H])
        gg = jnp.tanh(g[:, 2 * H:3 * H])
        o = jax.nn.sigmoid(g[:, 3 * H:4 * H])
        c = f * c + i * gg
        h = o * jnp.tanh(c)
        return (h, c), h

    init = (jnp.zeros((B, H), jnp.float32), jnp.zeros((B, H), jnp.float32))
    (_, _), ys = lax.scan(step, init, x)
    return ys


def _forward_ref(title, body, title_len, body_len, tp):
    def bi(x):
        y_f = _lstm_dir_ref(x, tp["w_ih"], tp["w_hh"], tp["b_ih"], tp["b_hh"])
        y_b = _lstm_dir_ref(x[::-1], tp["w_ih_r"], tp["w_hh_r"],
                            tp["b_ih_r"], tp["b_hh_r"])[::-1]
        return jnp.concatenate([y_f, y_b], axis=-1)

    t_mask = jnp.asarray(build_mask3d(title_len))
    b_mask = jnp.asarray(build_mask3d(body_len))
    t_out, b_out = bi(title), bi(body)
    t_emb = jnp.sum(t_out * t_mask, axis=0) / jnp.sum(t_mask, axis=0)
    b_emb = jnp.sum(b_out * b_mask, axis=0) / jnp.sum(b_mask, axis=0)
    return 0.5 * (t_emb + b_emb)


# ----------------------------------------------------------------------------
if __name__ == "__main__":
    key = jax.random.PRNGKey(0)

    B, IN, H = 4, 32, 32          # batch, input_size, hidden_size
    S_TITLE, S_BODY = 8, 12       # sequence lengths (time-major)

    k_w = 1.0 / np.sqrt(H)        # PyTorch LSTM uniform init bound
    keys = jax.random.split(key, 10)

    def u(kk, shape):
        return jax.random.uniform(kk, shape, jnp.float32, -k_w, k_w)

    # PyTorch-layout parameters (gate order i, f, g, o).
    torch_params = {
        "w_ih": u(keys[0], (4 * H, IN)),   "w_hh": u(keys[1], (4 * H, H)),
        "b_ih": u(keys[2], (4 * H,)),      "b_hh": u(keys[3], (4 * H,)),
        "w_ih_r": u(keys[4], (4 * H, IN)), "w_hh_r": u(keys[5], (4 * H, H)),
        "b_ih_r": u(keys[6], (4 * H,)),    "b_hh_r": u(keys[7], (4 * H,)),
    }
    params = fuse_lstm_params(torch_params)

    title = jax.random.normal(keys[8], (S_TITLE, B, IN), jnp.float32)
    body = jax.random.normal(keys[9], (S_BODY, B, IN), jnp.float32)

    title_len = np.array([8, 5, 3, 8], dtype=np.int32)    # max == S_TITLE
    body_len = np.array([12, 7, 12, 4], dtype=np.int32)   # max == S_BODY

    # f32 path: exact comparison against the PyTorch-semantics reference.
    emb = jax.block_until_ready(
        embedding_layer_forward(title, body, title_len, body_len, params))
    ref = jax.block_until_ready(
        _forward_ref(title, body, title_len, body_len, torch_params))

    assert emb.shape == (B, 2 * H)
    np.testing.assert_allclose(np.asarray(emb), np.asarray(ref),
                               rtol=1e-4, atol=1e-4)

    # bf16 matmul-operand path (f32 gate math / state / accumulation): looser check.
    emb_bf16 = jax.block_until_ready(
        embedding_layer_forward(title, body, title_len, body_len, params,
                                matmul_dtype=jnp.bfloat16))
    np.testing.assert_allclose(np.asarray(emb_bf16), np.asarray(ref),
                               rtol=3e-2, atol=3e-2)

    print("KERNEL_OK")
</pallas_src>

<mosaic_0001>
module attributes {stable_mosaic.version = 11 : i64} {
  func.func @kernel(%arg0: i32, %arg1: memref<64x32xf32, #tpu.memory_space<vmem>>, %arg2: memref<96x32xf32, #tpu.memory_space<vmem>>, %arg3: memref<8x1xi32, #tpu.memory_space<vmem>>, %arg4: memref<8x1xi32, #tpu.memory_space<vmem>>, %arg5: memref<32x256xf32, #tpu.memory_space<vmem>>, %arg6: memref<2x32x128xf32, #tpu.memory_space<vmem>>, %arg7: memref<1x256xf32, #tpu.memory_space<vmem>>, %arg8: memref<8x64xf32, #tpu.memory_space<vmem>>, %arg9: memref<12x8x256xf32, #tpu.memory_space<vmem>>) attributes {dimension_semantics = [#tpu.dimension_semantics<arbitrary>], iteration_bounds = array<i64: 1>, scalar_prefetch = 0 : i64, scratch_operands = 1 : i64, tpu.core_type = #tpu.core_type<tc>, window_params = [{pipeline_mode = #tpu.pipeline_mode<synchronous>, transform_indices = @transform_0, window_bounds = array<i64: 64, 32>}, {pipeline_mode = #tpu.pipeline_mode<synchronous>, transform_indices = @transform_1, window_bounds = array<i64: 96, 32>}, {pipeline_mode = #tpu.pipeline_mode<synchronous>, transform_indices = @transform_2, window_bounds = array<i64: 8, 1>}, {pipeline_mode = #tpu.pipeline_mode<synchronous>, transform_indices = @transform_3, window_bounds = array<i64: 8, 1>}, {pipeline_mode = #tpu.pipeline_mode<synchronous>, transform_indices = @transform_4, window_bounds = array<i64: 32, 256>}, {pipeline_mode = #tpu.pipeline_mode<synchronous>, transform_indices = @transform_5, window_bounds = array<i64: 2, 32, 128>}, {pipeline_mode = #tpu.pipeline_mode<synchronous>, transform_indices = @transform_6, window_bounds = array<i64: 1, 256>}, {pipeline_mode = #tpu.pipeline_mode<synchronous>, transform_indices = @transform_7, window_bounds = array<i64: 8, 64>}]} {
    %c0 = arith.constant 0 : index
    %c0_0 = arith.constant 0 : index
    %0 = vector.load %arg5[%c0, %c0_0] : memref<32x256xf32, #tpu.memory_space<vmem>>, vector<32x256xf32>
    %c0_1 = arith.constant 0 : index
    %c0_2 = arith.constant 0 : index
    %1 = vector.load %arg7[%c0_1, %c0_2] : memref<1x256xf32, #tpu.memory_space<vmem>>, vector<1x256xf32>
    %c0_3 = arith.constant 0 : index
    %c0_4 = arith.constant 0 : index
    %c0_5 = arith.constant 0 : index
    %2 = vector.load %arg6[%c0_3, %c0_4, %c0_5] : memref<2x32x128xf32, #tpu.memory_space<vmem>>, vector<1x32x128xf32>
    %3 = vector.shape_cast %2 : vector<1x32x128xf32> to vector<32x128xf32>
    %c1 = arith.constant 1 : index
    %c0_6 = arith.constant 0 : index
    %c0_7 = arith.constant 0 : index
    %4 = vector.load %arg6[%c1, %c0_6, %c0_7] : memref<2x32x128xf32, #tpu.memory_space<vmem>>, vector<1x32x128xf32>
    %5 = vector.shape_cast %4 : vector<1x32x128xf32> to vector<32x128xf32>
    %c0_8 = arith.constant 0 : index
    %c0_9 = arith.constant 0 : index
    %6 = vector.load %arg1[%c0_8, %c0_9] : memref<64x32xf32, #tpu.memory_space<vmem>>, vector<64x32xf32>
    %cst = arith.constant dense<0.000000e+00> : vector<64x256xf32>
    %7 = tpu.matmul %6, %0, %cst {dimension_numbers = #tpu.dot_dimension_numbers<[1], [0], [0], [1], [0, 0, 1, 1], [], []>} : vector<64x32xf32>, vector<32x256xf32>, vector<64x256xf32> -> vector<64x256xf32>
    %8 = vector.broadcast %1 : vector<1x256xf32> to vector<64x256xf32>
    %9 = arith.addf %7, %8 : vector<64x256xf32>
    %10 = vector.shape_cast %9 : vector<64x256xf32> to vector<8x8x256xf32>
    %c0_10 = arith.constant 0 : index
    %c0_11 = arith.constant 0 : index
    %c0_12 = arith.constant 0 : index
    %11 = vector.load %arg9[%c0_10, %c0_11, %c0_12] : memref<12x8x256xf32, #tpu.memory_space<vmem>>, vector<8x8x256xf32>
    tpu.vector_store %arg9[%c0_10, %c0_11, %c0_12], %10 {strides = array<i32>} : memref<12x8x256xf32, #tpu.memory_space<vmem>>, vector<8x8x256xf32>,
    %c0_13 = arith.constant 0 : index
    %c0_14 = arith.constant 0 : index
    %12 = vector.load %arg3[%c0_13, %c0_14] : memref<8x1xi32, #tpu.memory_space<vmem>>, vector<8x1xi32>
    %13 = arith.sitofp %12 : vector<8x1xi32> to vector<8x1xf32>
    %cst_15 = arith.constant 1.000000e+00 : f32
    %14 = vector.broadcast %cst_15 : f32 to vector<8x1xf32>
    %15 = arith.maximumf %13, %14 : vector<8x1xf32>
    %cst_16 = arith.constant 1.000000e+00 : f32
    %16 = vector.broadcast %cst_16 : f32 to vector<8x1xf32>
    %17 = arith.divf %16, %15 : vector<8x1xf32>
    %cst_17 = arith.constant 0.000000e+00 : f32
    %18 = vector.broadcast %cst_17 : f32 to vector<8x32xf32>
    %c0_i32 = arith.constant 0 : i32
    %c7_i32 = arith.constant 7 : i32
    %19 = arith.subi %c7_i32, %c0_i32 : i32
    %20 = arith.index_cast %c0_i32 : i32 to index
    %c0_18 = arith.constant 0 : index
    %c0_19 = arith.constant 0 : index
    %21 = vector.load %arg9[%20, %c0_18, %c0_19] : memref<12x8x256xf32, #tpu.memory_space<vmem>>, vector<1x8x128xf32>
    %22 = vector.shape_cast %21 : vector<1x8x128xf32> to vector<8x128xf32>
    %23 = arith.index_cast %19 : i32 to index
    %c0_20 = arith.constant 0 : index
    %c128 = arith.constant 128 : index
    %24 = vector.load %arg9[%23, %c0_20, %c128] : memref<12x8x256xf32, #tpu.memory_space<vmem>>, vector<1x8x128xf32>
    %25 = vector.shape_cast %24 : vector<1x8x128xf32> to vector<8x128xf32>
    %cst_21 = arith.constant dense<0.000000e+00> : vector<8x128xf32>
    %26 = tpu.matmul %18, %3, %cst_21 {dimension_numbers = #tpu.dot_dimension_numbers<[1], [0], [0], [1], [0, 0, 1, 1], [], []>} : vector<8x32xf32>, vector<32x128xf32>, vector<8x128xf32> -> vector<8x128xf32>
    %27 = arith.addf %22, %26 : vector<8x128xf32>
    %cst_22 = arith.constant dense<0.000000e+00> : vector<8x128xf32>
    %28 = tpu.matmul %18, %5, %cst_22 {dimension_numbers = #tpu.dot_dimension_numbers<[1], [0], [0], [1], [0, 0, 1, 1], [], []>} : vector<8x32xf32>, vector<32x128xf32>, vector<8x128xf32> -> vector<8x128xf32>
    %29 = arith.addf %25, %28 : vector<8x128xf32>
    %30 = vector.extract_strided_slice %27 {offsets = [0, 0], sizes = [8, 96], strides = [1, 1]} : vector<8x128xf32> to vector<8x96xf32>
    %31 = arith.negf %30 : vector<8x96xf32>
    %32 = math.exp %31 : vector<8x96xf32>
    %cst_23 = arith.constant 1.000000e+00 : f32
    %33 = vector.broadcast %cst_23 : f32 to vector<8x96xf32>
    %34 = arith.addf %33, %32 : vector<8x96xf32>
    %35 = arith.divf %33, %34 : vector<8x96xf32>
    %36 = vector.extract_strided_slice %29 {offsets = [0, 0], sizes = [8, 96], strides = [1, 1]} : vector<8x128xf32> to vector<8x96xf32>
    %37 = arith.negf %36 : vector<8x96xf32>
    %38 = math.exp %37 : vector<8x96xf32>
    %cst_24 = arith.constant 1.000000e+00 : f32
    %39 = vector.broadcast %cst_24 : f32 to vector<8x96xf32>
    %40 = arith.addf %39, %38 : vector<8x96xf32>
    %41 = arith.divf %39, %40 : vector<8x96xf32>
    %42 = vector.extract_strided_slice %27 {offsets = [0, 96], sizes = [8, 32], strides = [1, 1]} : vector<8x128xf32> to vector<8x32xf32>
    %43 = math.tanh %42 : vector<8x32xf32>
    %44 = vector.extract_strided_slice %29 {offsets = [0, 96], sizes = [8, 32], strides = [1, 1]} : vector<8x128xf32> to vector<8x32xf32>
    %45 = math.tanh %44 : vector<8x32xf32>
    %46 = vector.extract_strided_slice %35 {offsets = [0, 32], sizes = [8, 32], strides = [1, 1]} : vector<8x96xf32> to vector<8x32xf32>
    %47 = arith.mulf %46, %18 : vector<8x32xf32>
    %48 = vector.extract_strided_slice %35 {offsets = [0, 0], sizes = [8, 32], strides = [1, 1]} : vector<8x96xf32> to vector<8x32xf32>
    %49 = arith.mulf %48, %43 : vector<8x32xf32>
    %50 = arith.addf %47, %49 : vector<8x32xf32>
    %51 = vector.extract_strided_slice %41 {offsets = [0, 32], sizes = [8, 32], strides = [1, 1]} : vector<8x96xf32> to vector<8x32xf32>
    %52 = arith.mulf %51, %18 : vector<8x32xf32>
    %53 = vector.extract_strided_slice %41 {offsets = [0, 0], sizes = [8, 32], strides = [1, 1]} : vector<8x96xf32> to vector<8x32xf32>
    %54 = arith.mulf %53, %45 : vector<8x32xf32>
    %55 = arith.addf %52, %54 : vector<8x32xf32>
    %56 = vector.extract_strided_slice %35 {offsets = [0, 64], sizes = [8, 32], strides = [1, 1]} : vector<8x96xf32> to vector<8x32xf32>
    %57 = math.tanh %50 : vector<8x32xf32>
    %58 = arith.mulf %56, %57 : vector<8x32xf32>
    %59 = vector.extract_strided_slice %41 {offsets = [0, 64], sizes = [8, 32], strides = [1, 1]} : vector<8x96xf32> to vector<8x32xf32>
    %60 = math.tanh %55 : vector<8x32xf32>
    %61 = arith.mulf %59, %60 : vector<8x32xf32>
    %62 = vector.broadcast %c0_i32 : i32 to vector<8x1xi32>
    %63 = arith.cmpi sgt, %12, %62 : vector<8x1xi32>
    %64 = arith.extui %63 : vector<8x1xi1> to vector<8x1xi32>
    %65 = arith.sitofp %64 : vector<8x1xi32> to vector<8x1xf32>
    %66 = vector.broadcast %19 : i32 to vector<8x1xi32>
    %67 = arith.cmpi sgt, %12, %66 : vector<8x1xi32>
    %68 = arith.extui %67 : vector<8x1xi1> to vector<8x1xi32>
    %69 = arith.sitofp %68 : vector<8x1xi32> to vector<8x1xf32>
    %70 = vector.broadcast %65 : vector<8x1xf32> to vector<8x32xf32>
    %71 = arith.mulf %58, %70 : vector<8x32xf32>
    %72 = arith.addf %18, %71 : vector<8x32xf32>
    %73 = vector.broadcast %69 : vector<8x1xf32> to vector<8x32xf32>
    %74 = arith.mulf %61, %73 : vector<8x32xf32>
    %75 = arith.addf %18, %74 : vector<8x32xf32>
    %c1_i32 = arith.constant 1 : i32
    %c7_i32_25 = arith.constant 7 : i32
    %76 = arith.subi %c7_i32_25, %c1_i32 : i32
    %77 = arith.index_cast %c1_i32 : i32 to index
    %c0_26 = arith.constant 0 : index
    %c0_27 = arith.constant 0 : index
    %78 = vector.load %arg9[%77, %c0_26, %c0_27] : memref<12x8x256xf32, #tpu.memory_space<vmem>>, vector<1x8x128xf32>
    %79 = vector.shape_cast %78 : vector<1x8x128xf32> to vector<8x128xf32>
    %80 = arith.index_cast %76 : i32 to index
    %c0_28 = arith.constant 0 : index
    %c128_29 = arith.constant 128 : index
    %81 = vector.load %arg9[%80, %c0_28, %c128_29] : memref<12x8x256xf32, #tpu.memory_space<vmem>>, vector<1x8x128xf32>
    %82 = vector.shape_cast %81 : vector<1x8x128xf32> to vector<8x128xf32>
    %cst_30 = arith.constant dense<0.000000e+00> : vector<8x128xf32>
    %83 = tpu.matmul %58, %3, %cst_30 {dimension_numbers = #tpu.dot_dimension_numbers<[1], [0], [0], [1], [0, 0, 1, 1], [], []>} : vector<8x32xf32>, vector<32x128xf32>, vector<8x128xf32> -> vector<8x128xf32>
    %84 = arith.addf %79, %83 : vector<8x128xf32>
    %cst_31 = arith.constant dense<0.000000e+00> : vector<8x128xf32>
    %85 = tpu.matmul %61, %5, %cst_31 {dimension_numbers = #tpu.dot_dimension_numbers<[1], [0], [0], [1], [0, 0, 1, 1], [], []>} : vector<8x32xf32>, vector<32x128xf32>, vector<8x128xf32> -> vector<8x128xf32>
    %86 = arith.addf %82, %85 : vector<8x128xf32>
    %87 = vector.extract_strided_slice %84 {offsets = [0, 0], sizes = [8, 96], strides = [1, 1]} : vector<8x128xf32> to vector<8x96xf32>
    %88 = arith.negf %87 : vector<8x96xf32>
    %89 = math.exp %88 : vector<8x96xf32>
    %cst_32 = arith.constant 1.000000e+00 : f32
    %90 = vector.broadcast %cst_32 : f32 to vector<8x96xf32>
    %91 = arith.addf %90, %89 : vector<8x96xf32>
    %92 = arith.divf %90, %91 : vector<8x96xf32>
    %93 = vector.extract_strided_slice %86 {offsets = [0, 0], sizes = [8, 96], strides = [1, 1]} : vector<8x128xf32> to vector<8x96xf32>
    %94 = arith.negf %93 : vector<8x96xf32>
    %95 = math.exp %94 : vector<8x96xf32>
    %cst_33 = arith.constant 1.000000e+00 : f32
    %96 = vector.broadcast %cst_33 : f32 to vector<8x96xf32>
    %97 = arith.addf %96, %95 : vector<8x96xf32>
    %98 = arith.divf %96, %97 : vector<8x96xf32>
    %99 = vector.extract_strided_slice %84 {offsets = [0, 96], sizes = [8, 32], strides = [1, 1]} : vector<8x128xf32> to vector<8x32xf32>
    %100 = math.tanh %99 : vector<8x32xf32>
    %101 = vector.extract_strided_slice %86 {offsets = [0, 96], sizes = [8, 32], strides = [1, 1]} : vector<8x128xf32> to vector<8x32xf32>
    %102 = math.tanh %101 : vector<8x32xf32>
    %103 = vector.extract_strided_slice %92 {offsets = [0, 32], sizes = [8, 32], strides = [1, 1]} : vector<8x96xf32> to vector<8x32xf32>
    %104 = arith.mulf %103, %50 : vector<8x32xf32>
    %105 = vector.extract_strided_slice %92 {offsets = [0, 0], sizes = [8, 32], strides = [1, 1]} : vector<8x96xf32> to vector<8x32xf32>
    %106 = arith.mulf %105, %100 : vector<8x32xf32>
    %107 = arith.addf %104, %106 : vector<8x32xf32>
    %108 = vector.extract_strided_slice %98 {offsets = [0, 32], sizes = [8, 32], strides = [1, 1]} : vector<8x96xf32> to vector<8x32xf32>
    %109 = arith.mulf %108, %55 : vector<8x32xf32>
    %110 = vector.extract_strided_slice %98 {offsets = [0, 0], sizes = [8, 32], strides = [1, 1]} : vector<8x96xf32> to vector<8x32xf32>
    %111 = arith.mulf %110, %102 : vector<8x32xf32>
    %112 = arith.addf %109, %111 : vector<8x32xf32>
    %113 = vector.extract_strided_slice %92 {offsets = [0, 64], sizes = [8, 32], strides = [1, 1]} : vector<8x96xf32> to vector<8x32xf32>
    %114 = math.tanh %107 : vector<8x32xf32>
    %115 = arith.mulf %113, %114 : vector<8x32xf32>
    %116 = vector.extract_strided_slice %98 {offsets = [0, 64], sizes = [8, 32], strides = [1, 1]} : vector<8x96xf32> to vector<8x32xf32>
    %117 = math.tanh %112 : vector<8x32xf32>
    %118 = arith.mulf %116, %117 : vector<8x32xf32>
    %119 = vector.broadcast %c1_i32 : i32 to vector<8x1xi32>
    %120 = arith.cmpi sgt, %12, %119 : vector<8x1xi32>
    %121 = arith.extui %120 : vector<8x1xi1> to vector<8x1xi32>
    %122 = arith.sitofp %121 : vector<8x1xi32> to vector<8x1xf32>
    %123 = vector.broadcast %76 : i32 to vector<8x1xi32>
    %124 = arith.cmpi sgt, %12, %123 : vector<8x1xi32>
    %125 = arith.extui %124 : vector<8x1xi1> to vector<8x1xi32>
    %126 = arith.sitofp %125 : vector<8x1xi32> to vector<8x1xf32>
    %127 = vector.broadcast %122 : vector<8x1xf32> to vector<8x32xf32>
    %128 = arith.mulf %115, %127 : vector<8x32xf32>
    %129 = arith.addf %72, %128 : vector<8x32xf32>
    %130 = vector.broadcast %126 : vector<8x1xf32> to vector<8x32xf32>
    %131 = arith.mulf %118, %130 : vector<8x32xf32>
    %132 = arith.addf %75, %131 : vector<8x32xf32>
    %c2_i32 = arith.constant 2 : i32
    %c7_i32_34 = arith.constant 7 : i32
    %133 = arith.subi %c7_i32_34, %c2_i32 : i32
    %134 = arith.index_cast %c2_i32 : i32 to index
    %c0_35 = arith.constant 0 : index
    %c0_36 = arith.constant 0 : index
    %135 = vector.load %arg9[%134, %c0_35, %c0_36] : memref<12x8x256xf32, #tpu.memory_space<vmem>>, vector<1x8x128xf32>
    %136 = vector.shape_cast %135 : vector<1x8x128xf32> to vector<8x128xf32>
    %137 = arith.index_cast %133 : i32 to index
    %c0_37 = arith.constant 0 : index
    %c128_38 = arith.constant 128 : index
    %138 = vector.load %arg9[%137, %c0_37, %c128_38] : memref<12x8x256xf32, #tpu.memory_space<vmem>>, vector<1x8x128xf32>
    %139 = vector.shape_cast %138 : vector<1x8x128xf32> to vector<8x128xf32>
    %cst_39 = arith.constant dense<0.000000e+00> : vector<8x128xf32>
    %140 = tpu.matmul %115, %3, %cst_39 {dimension_numbers = #tpu.dot_dimension_numbers<[1], [0], [0], [1], [0, 0, 1, 1], [], []>} : vector<8x32xf32>, vector<32x128xf32>, vector<8x128xf32> -> vector<8x128xf32>
    %141 = arith.addf %136, %140 : vector<8x128xf32>
    %cst_40 = arith.constant dense<0.000000e+00> : vector<8x128xf32>
    %142 = tpu.matmul %118, %5, %cst_40 {dimension_numbers = #tpu.dot_dimension_numbers<[1], [0], [0], [1], [0, 0, 1, 1], [], []>} : vector<8x32xf32>, vector<32x128xf32>, vector<8x128xf32> -> vector<8x128xf32>
    %143 = arith.addf %139, %142 : vector<8x128xf32>
    %144 = vector.extract_strided_slice %141 {offsets = [0, 0], sizes = [8, 96], strides = [1, 1]} : vector<8x128xf32> to vector<8x96xf32>
    %145 = arith.negf %144 : vector<8x96xf32>
    %146 = math.exp %145 : vector<8x96xf32>
    %cst_41 = arith.constant 1.000000e+00 : f32
    %147 = vector.broadcast %cst_41 : f32 to vector<8x96xf32>
    %148 = arith.addf %147, %146 : vector<8x96xf32>
    %149 = arith.divf %147, %148 : vector<8x96xf32>
    %150 = vector.extract_strided_slice %143 {offsets = [0, 0], sizes = [8, 96], strides = [1, 1]} : vector<8x128xf32> to vector<8x96xf32>
    %151 = arith.negf %150 : vector<8x96xf32>
    %152 = math.exp %151 : vector<8x96xf32>
    %cst_42 = arith.constant 1.000000e+00 : f32
    %153 = vector.broadcast %cst_42 : f32 to vector<8x96xf32>
    %154 = arith.addf %153, %152 : vector<8x96xf32>
    %155 = arith.divf %153, %154 : vector<8x96xf32>
    %156 = vector.extract_strided_slice %141 {offsets = [0, 96], sizes = [8, 32], strides = [1, 1]} : vector<8x128xf32> to vector<8x32xf32>
    %157 = math.tanh %156 : vector<8x32xf32>
    %158 = vector.extract_strided_slice %143 {offsets = [0, 96], sizes = [8, 32], strides = [1, 1]} : vector<8x128xf32> to vector<8x32xf32>
    %159 = math.tanh %158 : vector<8x32xf32>
    %160 = vector.extract_strided_slice %149 {offsets = [0, 32], sizes = [8, 32], strides = [1, 1]} : vector<8x96xf32> to vector<8x32xf32>
    %161 = arith.mulf %160, %107 : vector<8x32xf32>
    %162 = vector.extract_strided_slice %149 {offsets = [0, 0], sizes = [8, 32], strides = [1, 1]} : vector<8x96xf32> to vector<8x32xf32>
    %163 = arith.mulf %162, %157 : vector<8x32xf32>
    %164 = arith.addf %161, %163 : vector<8x32xf32>
    %165 = vector.extract_strided_slice %155 {offsets = [0, 32], sizes = [8, 32], strides = [1, 1]} : vector<8x96xf32> to vector<8x32xf32>
    %166 = arith.mulf %165, %112 : vector<8x32xf32>
    %167 = vector.extract_strided_slice %155 {offsets = [0, 0], sizes = [8, 32], strides = [1, 1]} : vector<8x96xf32> to vector<8x32xf32>
    %168 = arith.mulf %167, %159 : vector<8x32xf32>
    %169 = arith.addf %166, %168 : vector<8x32xf32>
    %170 = vector.extract_strided_slice %149 {offsets = [0, 64], sizes = [8, 32], strides = [1, 1]} : vector<8x96xf32> to vector<8x32xf32>
    %171 = math.tanh %164 : vector<8x32xf32>
    %172 = arith.mulf %170, %171 : vector<8x32xf32>
    %173 = vector.extract_strided_slice %155 {offsets = [0, 64], sizes = [8, 32], strides = [1, 1]} : vector<8x96xf32> to vector<8x32xf32>
    %174 = math.tanh %169 : vector<8x32xf32>
    %175 = arith.mulf %173, %174 : vector<8x32xf32>
    %176 = vector.broadcast %c2_i32 : i32 to vector<8x1xi32>
    %177 = arith.cmpi sgt, %12, %176 : vector<8x1xi32>
    %178 = arith.extui %177 : vector<8x1xi1> to vector<8x1xi32>
    %179 = arith.sitofp %178 : vector<8x1xi32> to vector<8x1xf32>
    %180 = vector.broadcast %133 : i32 to vector<8x1xi32>
    %181 = arith.cmpi sgt, %12, %180 : vector<8x1xi32>
    %182 = arith.extui %181 : vector<8x1xi1> to vector<8x1xi32>
    %183 = arith.sitofp %182 : vector<8x1xi32> to vector<8x1xf32>
    %184 = vector.broadcast %179 : vector<8x1xf32> to vector<8x32xf32>
    %185 = arith.mulf %172, %184 : vector<8x32xf32>
    %186 = arith.addf %129, %185 : vector<8x32xf32>
    %187 = vector.broadcast %183 : vector<8x1xf32> to vector<8x32xf32>
    %188 = arith.mulf %175, %187 : vector<8x32xf32>
    %189 = arith.addf %132, %188 : vector<8x32xf32>
    %c3_i32 = arith.constant 3 : i32
    %c7_i32_43 = arith.constant 7 : i32
    %190 = arith.subi %c7_i32_43, %c3_i32 : i32
    %191 = arith.index_cast %c3_i32 : i32 to index
    %c0_44 = arith.constant 0 : index
    %c0_45 = arith.constant 0 : index
    %192 = vector.load %arg9[%191, %c0_44, %c0_45] : memref<12x8x256xf32, #tpu.memory_space<vmem>>, vector<1x8x128xf32>
    %193 = vector.shape_cast %192 : vector<1x8x128xf32> to vector<8x128xf32>
    %194 = arith.index_cast %190 : i32 to index
    %c0_46 = arith.constant 0 : index
    %c128_47 = arith.constant 128 : index
    %195 = vector.load %arg9[%194, %c0_46, %c128_47] : memref<12x8x256xf32, #tpu.memory_space<vmem>>, vector<1x8x128xf32>
    %196 = vector.shape_cast %195 : vector<1x8x128xf32> to vector<8x128xf32>
    %cst_48 = arith.constant dense<0.000000e+00> : vector<8x128xf32>
    %197 = tpu.matmul %172, %3, %cst_48 {dimension_numbers = #tpu.dot_dimension_numbers<[1], [0], [0], [1], [0, 0, 1, 1], [], []>} : vector<8x32xf32>, vector<32x128xf32>, vector<8x128xf32> -> vector<8x128xf32>
    %198 = arith.addf %193, %197 : vector<8x128xf32>
    %cst_49 = arith.constant dense<0.000000e+00> : vector<8x128xf32>
    %199 = tpu.matmul %175, %5, %cst_49 {dimension_numbers = #tpu.dot_dimension_numbers<[1], [0], [0], [1], [0, 0, 1, 1], [], []>} : vector<8x32xf32>, vector<32x128xf32>, vector<8x128xf32> -> vector<8x128xf32>
    %200 = arith.addf %196, %199 : vector<8x128xf32>
    %201 = vector.extract_strided_slice %198 {offsets = [0, 0], sizes = [8, 96], strides = [1, 1]} : vector<8x128xf32> to vector<8x96xf32>
    %202 = arith.negf %201 : vector<8x96xf32>
    %203 = math.exp %202 : vector<8x96xf32>
    %cst_50 = arith.constant 1.000000e+00 : f32
    %204 = vector.broadcast %cst_50 : f32 to vector<8x96xf32>
    %205 = arith.addf %204, %203 : vector<8x96xf32>
    %206 = arith.divf %204, %205 : vector<8x96xf32>
    %207 = vector.extract_strided_slice %200 {offsets = [0, 0], sizes = [8, 96], strides = [1, 1]} : vector<8x128xf32> to vector<8x96xf32>
    %208 = arith.negf %207 : vector<8x96xf32>
    %209 = math.exp %208 : vector<8x96xf32>
    %cst_51 = arith.constant 1.000000e+00 : f32
    %210 = vector.broadcast %cst_51 : f32 to vector<8x96xf32>
    %211 = arith.addf %210, %209 : vector<8x96xf32>
    %212 = arith.divf %210, %211 : vector<8x96xf32>
    %213 = vector.extract_strided_slice %198 {offsets = [0, 96], sizes = [8, 32], strides = [1, 1]} : vector<8x128xf32> to vector<8x32xf32>
    %214 = math.tanh %213 : vector<8x32xf32>
    %215 = vector.extract_strided_slice %200 {offsets = [0, 96], sizes = [8, 32], strides = [1, 1]} : vector<8x128xf32> to vector<8x32xf32>
    %216 = math.tanh %215 : vector<8x32xf32>
    %217 = vector.extract_strided_slice %206 {offsets = [0, 32], sizes = [8, 32], strides = [1, 1]} : vector<8x96xf32> to vector<8x32xf32>
    %218 = arith.mulf %217, %164 : vector<8x32xf32>
    %219 = vector.extract_strided_slice %206 {offsets = [0, 0], sizes = [8, 32], strides = [1, 1]} : vector<8x96xf32> to vector<8x32xf32>
    %220 = arith.mulf %219, %214 : vector<8x32xf32>
    %221 = arith.addf %218, %220 : vector<8x32xf32>
    %222 = vector.extract_strided_slice %212 {offsets = [0, 32], sizes = [8, 32], strides = [1, 1]} : vector<8x96xf32> to vector<8x32xf32>
    %223 = arith.mulf %222, %169 : vector<8x32xf32>
    %224 = vector.extract_strided_slice %212 {offsets = [0, 0], sizes = [8, 32], strides = [1, 1]} : vector<8x96xf32> to vector<8x32xf32>
    %225 = arith.mulf %224, %216 : vector<8x32xf32>
    %226 = arith.addf %223, %225 : vector<8x32xf32>
    %227 = vector.extract_strided_slice %206 {offsets = [0, 64], sizes = [8, 32], strides = [1, 1]} : vector<8x96xf32> to vector<8x32xf32>
    %228 = math.tanh %221 : vector<8x32xf32>
    %229 = arith.mulf %227, %228 : vector<8x32xf32>
    %230 = vector.extract_strided_slice %212 {offsets = [0, 64], sizes = [8, 32], strides = [1, 1]} : vector<8x96xf32> to vector<8x32xf32>
    %231 = math.tanh %226 : vector<8x32xf32>
    %232 = arith.mulf %230, %231 : vector<8x32xf32>
    %233 = vector.broadcast %c3_i32 : i32 to vector<8x1xi32>
    %234 = arith.cmpi sgt, %12, %233 : vector<8x1xi32>
    %235 = arith.extui %234 : vector<8x1xi1> to vector<8x1xi32>
    %236 = arith.sitofp %235 : vector<8x1xi32> to vector<8x1xf32>
    %237 = vector.broadcast %190 : i32 to vector<8x1xi32>
    %238 = arith.cmpi sgt, %12, %237 : vector<8x1xi32>
    %239 = arith.extui %238 : vector<8x1xi1> to vector<8x1xi32>
    %240 = arith.sitofp %239 : vector<8x1xi32> to vector<8x1xf32>
    %241 = vector.broadcast %236 : vector<8x1xf32> to vector<8x32xf32>
    %242 = arith.mulf %229, %241 : vector<8x32xf32>
    %243 = arith.addf %186, %242 : vector<8x32xf32>
    %244 = vector.broadcast %240 : vector<8x1xf32> to vector<8x32xf32>
    %245 = arith.mulf %232, %244 : vector<8x32xf32>
    %246 = arith.addf %189, %245 : vector<8x32xf32>
    %c4_i32 = arith.constant 4 : i32
    %c7_i32_52 = arith.constant 7 : i32
    %247 = arith.subi %c7_i32_52, %c4_i32 : i32
    %248 = arith.index_cast %c4_i32 : i32 to index
    %c0_53 = arith.constant 0 : index
    %c0_54 = arith.constant 0 : index
    %249 = vector.load %arg9[%248, %c0_53, %c0_54] : memref<12x8x256xf32, #tpu.memory_space<vmem>>, vector<1x8x128xf32>
    %250 = vector.shape_cast %249 : vector<1x8x128xf32> to vector<8x128xf32>
    %251 = arith.index_cast %247 : i32 to index
    %c0_55 = arith.constant 0 : index
    %c128_56 = arith.constant 128 : index
    %252 = vector.load %arg9[%251, %c0_55, %c128_56] : memref<12x8x256xf32, #tpu.memory_space<vmem>>, vector<1x8x128xf32>
    %253 = vector.shape_cast %252 : vector<1x8x128xf32> to vector<8x128xf32>
    %cst_57 = arith.constant dense<0.000000e+00> : vector<8x128xf32>
    %254 = tpu.matmul %229, %3, %cst_57 {dimension_numbers = #tpu.dot_dimension_numbers<[1], [0], [0], [1], [0, 0, 1, 1], [], []>} : vector<8x32xf32>, vector<32x128xf32>, vector<8x128xf32> -> vector<8x128xf32>
    %255 = arith.addf %250, %254 : vector<8x128xf32>
    %cst_58 = arith.constant dense<0.000000e+00> : vector<8x128xf32>
    %256 = tpu.matmul %232, %5, %cst_58 {dimension_numbers = #tpu.dot_dimension_numbers<[1], [0], [0], [1], [0, 0, 1, 1], [], []>} : vector<8x32xf32>, vector<32x128xf32>, vector<8x128xf32> -> vector<8x128xf32>
    %257 = arith.addf %253, %256 : vector<8x128xf32>
    %258 = vector.extract_strided_slice %255 {offsets = [0, 0], sizes = [8, 96], strides = [1, 1]} : vector<8x128xf32> to vector<8x96xf32>
    %259 = arith.negf %258 : vector<8x96xf32>
    %260 = math.exp %259 : vector<8x96xf32>
    %cst_59 = arith.constant 1.000000e+00 : f32
    %261 = vector.broadcast %cst_59 : f32 to vector<8x96xf32>
    %262 = arith.addf %261, %260 : vector<8x96xf32>
    %263 = arith.divf %261, %262 : vector<8x96xf32>
    %264 = vector.extract_strided_slice %257 {offsets = [0, 0], sizes = [8, 96], strides = [1, 1]} : vector<8x128xf32> to vector<8x96xf32>
    %265 = arith.negf %264 : vector<8x96xf32>
    %266 = math.exp %265 : vector<8x96xf32>
    %cst_60 = arith.constant 1.000000e+00 : f32
    %267 = vector.broadcast %cst_60 : f32 to vector<8x96xf32>
    %268 = arith.addf %267, %266 : vector<8x96xf32>
    %269 = arith.divf %267, %268 : vector<8x96xf32>
    %270 = vector.extract_strided_slice %255 {offsets = [0, 96], sizes = [8, 32], strides = [1, 1]} : vector<8x128xf32> to vector<8x32xf32>
    %271 = math.tanh %270 : vector<8x32xf32>
    %272 = vector.extract_strided_slice %257 {offsets = [0, 96], sizes = [8, 32], strides = [1, 1]} : vector<8x128xf32> to vector<8x32xf32>
    %273 = math.tanh %272 : vector<8x32xf32>
    %274 = vector.extract_strided_slice %263 {offsets = [0, 32], sizes = [8, 32], strides = [1, 1]} : vector<8x96xf32> to vector<8x32xf32>
    %275 = arith.mulf %274, %221 : vector<8x32xf32>
    %276 = vector.extract_strided_slice %263 {offsets = [0, 0], sizes = [8, 32], strides = [1, 1]} : vector<8x96xf32> to vector<8x32xf32>
    %277 = arith.mulf %276, %271 : vector<8x32xf32>
    %278 = arith.addf %275, %277 : vector<8x32xf32>
    %279 = vector.extract_strided_slice %269 {offsets = [0, 32], sizes = [8, 32], strides = [1, 1]} : vector<8x96xf32> to vector<8x32xf32>
    %280 = arith.mulf %279, %226 : vector<8x32xf32>
    %281 = vector.extract_strided_slice %269 {offsets = [0, 0], sizes = [8, 32], strides = [1, 1]} : vector<8x96xf32> to vector<8x32xf32>
    %282 = arith.mulf %281, %273 : vector<8x32xf32>
    %283 = arith.addf %280, %282 : vector<8x32xf32>
    %284 = vector.extract_strided_slice %263 {offsets = [0, 64], sizes = [8, 32], strides = [1, 1]} : vector<8x96xf32> to vector<8x32xf32>
    %285 = math.tanh %278 : vector<8x32xf32>
    %286 = arith.mulf %284, %285 : vector<8x32xf32>
    %287 = vector.extract_strided_slice %269 {offsets = [0, 64], sizes = [8, 32], strides = [1, 1]} : vector<8x96xf32> to vector<8x32xf32>
    %288 = math.tanh %283 : vector<8x32xf32>
    %289 = arith.mulf %287, %288 : vector<8x32xf32>
    %290 = vector.broadcast %c4_i32 : i32 to vector<8x1xi32>
    %291 = arith.cmpi sgt, %12, %290 : vector<8x1xi32>
    %292 = arith.extui %291 : vector<8x1xi1> to vector<8x1xi32>
    %293 = arith.sitofp %292 : vector<8x1xi32> to vector<8x1xf32>
    %294 = vector.broadcast %247 : i32 to vector<8x1xi32>
    %295 = arith.cmpi sgt, %12, %294 : vector<8x1xi32>
    %296 = arith.extui %295 : vector<8x1xi1> to vector<8x1xi32>
    %297 = arith.sitofp %296 : vector<8x1xi32> to vector<8x1xf32>
    %298 = vector.broadcast %293 : vector<8x1xf32> to vector<8x32xf32>
    %299 = arith.mulf %286, %298 : vector<8x32xf32>
    %300 = arith.addf %243, %299 : vector<8x32xf32>
    %301 = vector.broadcast %297 : vector<8x1xf32> to vector<8x32xf32>
    %302 = arith.mulf %289, %301 : vector<8x32xf32>
    %303 = arith.addf %246, %302 : vector<8x32xf32>
    %c5_i32 = arith.constant 5 : i32
    %c7_i32_61 = arith.constant 7 : i32
    %304 = arith.subi %c7_i32_61, %c5_i32 : i32
    %305 = arith.index_cast %c5_i32 : i32 to index
    %c0_62 = arith.constant 0 : index
    %c0_63 = arith.constant 0 : index
    %306 = vector.load %arg9[%305, %c0_62, %c0_63] : memref<12x8x256xf32, #tpu.memory_space<vmem>>, vector<1x8x128xf32>
    %307 = vector.shape_cast %306 : vector<1x8x128xf32> to vector<8x128xf32>
    %308 = arith.index_cast %304 : i32 to index
    %c0_64 = arith.constant 0 : index
    %c128_65 = arith.constant 128 : index
    %309 = vector.load %arg9[%308, %c0_64, %c128_65] : memref<12x8x256xf32, #tpu.memory_space<vmem>>, vector<1x8x128xf32>
    %310 = vector.shape_cast %309 : vector<1x8x128xf32> to vector<8x128xf32>
    %cst_66 = arith.constant dense<0.000000e+00> : vector<8x128xf32>
    %311 = tpu.matmul %286, %3, %cst_66 {dimension_numbers = #tpu.dot_dimension_numbers<[1], [0], [0], [1], [0, 0, 1, 1], [], []>} : vector<8x32xf32>, vector<32x128xf32>, vector<8x128xf32> -> vector<8x128xf32>
    %312 = arith.addf %307, %311 : vector<8x128xf32>
    %cst_67 = arith.constant dense<0.000000e+00> : vector<8x128xf32>
    %313 = tpu.matmul %289, %5, %cst_67 {dimension_numbers = #tpu.dot_dimension_numbers<[1], [0], [0], [1], [0, 0, 1, 1], [], []>} : vector<8x32xf32>, vector<32x128xf32>, vector<8x128xf32> -> vector<8x128xf32>
    %314 = arith.addf %310, %313 : vector<8x128xf32>
    %315 = vector.extract_strided_slice %312 {offsets = [0, 0], sizes = [8, 96], strides = [1, 1]} : vector<8x128xf32> to vector<8x96xf32>
    %316 = arith.negf %315 : vector<8x96xf32>
    %317 = math.exp %316 : vector<8x96xf32>
    %cst_68 = arith.constant 1.000000e+00 : f32
    %318 = vector.broadcast %cst_68 : f32 to vector<8x96xf32>
    %319 = arith.addf %318, %317 : vector<8x96xf32>
    %320 = arith.divf %318, %319 : vector<8x96xf32>
    %321 = vector.extract_strided_slice %314 {offsets = [0, 0], sizes = [8, 96], strides = [1, 1]} : vector<8x128xf32> to vector<8x96xf32>
    %322 = arith.negf %321 : vector<8x96xf32>
    %323 = math.exp %322 : vector<8x96xf32>
    %cst_69 = arith.constant 1.000000e+00 : f32
    %324 = vector.broadcast %cst_69 : f32 to vector<8x96xf32>
    %325 = arith.addf %324, %323 : vector<8x96xf32>
    %326 = arith.divf %324, %325 : vector<8x96xf32>
    %327 = vector.extract_strided_slice %312 {offsets = [0, 96], sizes = [8, 32], strides = [1, 1]} : vector<8x128xf32> to vector<8x32xf32>
    %328 = math.tanh %327 : vector<8x32xf32>
    %329 = vector.extract_strided_slice %314 {offsets = [0, 96], sizes = [8, 32], strides = [1, 1]} : vector<8x128xf32> to vector<8x32xf32>
    %330 = math.tanh %329 : vector<8x32xf32>
    %331 = vector.extract_strided_slice %320 {offsets = [0, 32], sizes = [8, 32], strides = [1, 1]} : vector<8x96xf32> to vector<8x32xf32>
    %332 = arith.mulf %331, %278 : vector<8x32xf32>
    %333 = vector.extract_strided_slice %320 {offsets = [0, 0], sizes = [8, 32], strides = [1, 1]} : vector<8x96xf32> to vector<8x32xf32>
    %334 = arith.mulf %333, %328 : vector<8x32xf32>
    %335 = arith.addf %332, %334 : vector<8x32xf32>
    %336 = vector.extract_strided_slice %326 {offsets = [0, 32], sizes = [8, 32], strides = [1, 1]} : vector<8x96xf32> to vector<8x32xf32>
    %337 = arith.mulf %336, %283 : vector<8x32xf32>
    %338 = vector.extract_strided_slice %326 {offsets = [0, 0], sizes = [8, 32], strides = [1, 1]} : vector<8x96xf32> to vector<8x32xf32>
    %339 = arith.mulf %338, %330 : vector<8x32xf32>
    %340 = arith.addf %337, %339 : vector<8x32xf32>
    %341 = vector.extract_strided_slice %320 {offsets = [0, 64], sizes = [8, 32], strides = [1, 1]} : vector<8x96xf32> to vector<8x32xf32>
    %342 = math.tanh %335 : vector<8x32xf32>
    %343 = arith.mulf %341, %342 : vector<8x32xf32>
    %344 = vector.extract_strided_slice %326 {offsets = [0, 64], sizes = [8, 32], strides = [1, 1]} : vector<8x96xf32> to vector<8x32xf32>
    %345 = math.tanh %340 : vector<8x32xf32>
    %346 = arith.mulf %344, %345 : vector<8x32xf32>
    %347 = vector.broadcast %c5_i32 : i32 to vector<8x1xi32>
    %348 = arith.cmpi sgt, %12, %347 : vector<8x1xi32>
    %349 = arith.extui %348 : vector<8x1xi1> to vector<8x1xi32>
    %350 = arith.sitofp %349 : vector<8x1xi32> to vector<8x1xf32>
    %351 = vector.broadcast %304 : i32 to vector<8x1xi32>
    %352 = arith.cmpi sgt, %12, %351 : vector<8x1xi32>
    %353 = arith.extui %352 : vector<8x1xi1> to vector<8x1xi32>
    %354 = arith.sitofp %353 : vector<8x1xi32> to vector<8x1xf32>
    %355 = vector.broadcast %350 : vector<8x1xf32> to vector<8x32xf32>
    %356 = arith.mulf %343, %355 : vector<8x32xf32>
    %357 = arith.addf %300, %356 : vector<8x32xf32>
    %358 = vector.broadcast %354 : vector<8x1xf32> to vector<8x32xf32>
    %359 = arith.mulf %346, %358 : vector<8x32xf32>
    %360 = arith.addf %303, %359 : vector<8x32xf32>
    %c6_i32 = arith.constant 6 : i32
    %c7_i32_70 = arith.constant 7 : i32
    %361 = arith.subi %c7_i32_70, %c6_i32 : i32
    %362 = arith.index_cast %c6_i32 : i32 to index
    %c0_71 = arith.constant 0 : index
    %c0_72 = arith.constant 0 : index
    %363 = vector.load %arg9[%362, %c0_71, %c0_72] : memref<12x8x256xf32, #tpu.memory_space<vmem>>, vector<1x8x128xf32>
    %364 = vector.shape_cast %363 : vector<1x8x128xf32> to vector<8x128xf32>
    %365 = arith.index_cast %361 : i32 to index
    %c0_73 = arith.constant 0 : index
    %c128_74 = arith.constant 128 : index
    %366 = vector.load %arg9[%365, %c0_73, %c128_74] : memref<12x8x256xf32, #tpu.memory_space<vmem>>, vector<1x8x128xf32>
    %367 = vector.shape_cast %366 : vector<1x8x128xf32> to vector<8x128xf32>
    %cst_75 = arith.constant dense<0.000000e+00> : vector<8x128xf32>
    %368 = tpu.matmul %343, %3, %cst_75 {dimension_numbers = #tpu.dot_dimension_numbers<[1], [0], [0], [1], [0, 0, 1, 1], [], []>} : vector<8x32xf32>, vector<32x128xf32>, vector<8x128xf32> -> vector<8x128xf32>
    %369 = arith.addf %364, %368 : vector<8x128xf32>
    %cst_76 = arith.constant dense<0.000000e+00> : vector<8x128xf32>
    %370 = tpu.matmul %346, %5, %cst_76 {dimension_numbers = #tpu.dot_dimension_numbers<[1], [0], [0], [1], [0, 0, 1, 1], [], []>} : vector<8x32xf32>, vector<32x128xf32>, vector<8x128xf32> -> vector<8x128xf32>
    %371 = arith.addf %367, %370 : vector<8x128xf32>
    %372 = vector.extract_strided_slice %369 {offsets = [0, 0], sizes = [8, 96], strides = [1, 1]} : vector<8x128xf32> to vector<8x96xf32>
    %373 = arith.negf %372 : vector<8x96xf32>
    %374 = math.exp %373 : vector<8x96xf32>
    %cst_77 = arith.constant 1.000000e+00 : f32
    %375 = vector.broadcast %cst_77 : f32 to vector<8x96xf32>
    %376 = arith.addf %375, %374 : vector<8x96xf32>
    %377 = arith.divf %375, %376 : vector<8x96xf32>
    %378 = vector.extract_strided_slice %371 {offsets = [0, 0], sizes = [8, 96], strides = [1, 1]} : vector<8x128xf32> to vector<8x96xf32>
    %379 = arith.negf %378 : vector<8x96xf32>
    %380 = math.exp %379 : vector<8x96xf32>
    %cst_78 = arith.constant 1.000000e+00 : f32
    %381 = vector.broadcast %cst_78 : f32 to vector<8x96xf32>
    %382 = arith.addf %381, %380 : vector<8x96xf32>
    %383 = arith.divf %381, %382 : vector<8x96xf32>
    %384 = vector.extract_strided_slice %369 {offsets = [0, 96], sizes = [8, 32], strides = [1, 1]} : vector<8x128xf32> to vector<8x32xf32>
    %385 = math.tanh %384 : vector<8x32xf32>
    %386 = vector.extract_strided_slice %371 {offsets = [0, 96], sizes = [8, 32], strides = [1, 1]} : vector<8x128xf32> to vector<8x32xf32>
    %387 = math.tanh %386 : vector<8x32xf32>
    %388 = vector.extract_strided_slice %377 {offsets = [0, 32], sizes = [8, 32], strides = [1, 1]} : vector<8x96xf32> to vector<8x32xf32>
    %389 = arith.mulf %388, %335 : vector<8x32xf32>
    %390 = vector.extract_strided_slice %377 {offsets = [0, 0], sizes = [8, 32], strides = [1, 1]} : vector<8x96xf32> to vector<8x32xf32>
    %391 = arith.mulf %390, %385 : vector<8x32xf32>
    %392 = arith.addf %389, %391 : vector<8x32xf32>
    %393 = vector.extract_strided_slice %383 {offsets = [0, 32], sizes = [8, 32], strides = [1, 1]} : vector<8x96xf32> to vector<8x32xf32>
    %394 = arith.mulf %393, %340 : vector<8x32xf32>
    %395 = vector.extract_strided_slice %383 {offsets = [0, 0], sizes = [8, 32], strides = [1, 1]} : vector<8x96xf32> to vector<8x32xf32>
    %396 = arith.mulf %395, %387 : vector<8x32xf32>
    %397 = arith.addf %394, %396 : vector<8x32xf32>
    %398 = vector.extract_strided_slice %377 {offsets = [0, 64], sizes = [8, 32], strides = [1, 1]} : vector<8x96xf32> to vector<8x32xf32>
    %399 = math.tanh %392 : vector<8x32xf32>
    %400 = arith.mulf %398, %399 : vector<8x32xf32>
    %401 = vector.extract_strided_slice %383 {offsets = [0, 64], sizes = [8, 32], strides = [1, 1]} : vector<8x96xf32> to vector<8x32xf32>
    %402 = math.tanh %397 : vector<8x32xf32>
    %403 = arith.mulf %401, %402 : vector<8x32xf32>
    %404 = vector.broadcast %c6_i32 : i32 to vector<8x1xi32>
    %405 = arith.cmpi sgt, %12, %404 : vector<8x1xi32>
    %406 = arith.extui %405 : vector<8x1xi1> to vector<8x1xi32>
    %407 = arith.sitofp %406 : vector<8x1xi32> to vector<8x1xf32>
    %408 = vector.broadcast %361 : i32 to vector<8x1xi32>
    %409 = arith.cmpi sgt, %12, %408 : vector<8x1xi32>
    %410 = arith.extui %409 : vector<8x1xi1> to vector<8x1xi32>
    %411 = arith.sitofp %410 : vector<8x1xi32> to vector<8x1xf32>
    %412 = vector.broadcast %407 : vector<8x1xf32> to vector<8x32xf32>
    %413 = arith.mulf %400, %412 : vector<8x32xf32>
    %414 = arith.addf %357, %413 : vector<8x32xf32>
    %415 = vector.broadcast %411 : vector<8x1xf32> to vector<8x32xf32>
    %416 = arith.mulf %403, %415 : vector<8x32xf32>
    %417 = arith.addf %360, %416 : vector<8x32xf32>
    %c7_i32_79 = arith.constant 7 : i32
    %c7_i32_80 = arith.constant 7 : i32
    %418 = arith.subi %c7_i32_80, %c7_i32_79 : i32
    %419 = arith.index_cast %c7_i32_79 : i32 to index
    %c0_81 = arith.constant 0 : index
    %c0_82 = arith.constant 0 : index
    %420 = vector.load %arg9[%419, %c0_81, %c0_82] : memref<12x8x256xf32, #tpu.memory_space<vmem>>, vector<1x8x128xf32>
    %421 = vector.shape_cast %420 : vector<1x8x128xf32> to vector<8x128xf32>
    %422 = arith.index_cast %418 : i32 to index
    %c0_83 = arith.constant 0 : index
    %c128_84 = arith.constant 128 : index
    %423 = vector.load %arg9[%422, %c0_83, %c128_84] : memref<12x8x256xf32, #tpu.memory_space<vmem>>, vector<1x8x128xf32>
    %424 = vector.shape_cast %423 : vector<1x8x128xf32> to vector<8x128xf32>
    %cst_85 = arith.constant dense<0.000000e+00> : vector<8x128xf32>
    %425 = tpu.matmul %400, %3, %cst_85 {dimension_numbers = #tpu.dot_dimension_numbers<[1], [0], [0], [1], [0, 0, 1, 1], [], []>} : vector<8x32xf32>, vector<32x128xf32>, vector<8x128xf32> -> vector<8x128xf32>
    %426 = arith.addf %421, %425 : vector<8x128xf32>
    %cst_86 = arith.constant dense<0.000000e+00> : vector<8x128xf32>
    %427 = tpu.matmul %403, %5, %cst_86 {dimension_numbers = #tpu.dot_dimension_numbers<[1], [0], [0], [1], [0, 0, 1, 1], [], []>} : vector<8x32xf32>, vector<32x128xf32>, vector<8x128xf32> -> vector<8x128xf32>
    %428 = arith.addf %424, %427 : vector<8x128xf32>
    %429 = vector.extract_strided_slice %426 {offsets = [0, 0], sizes = [8, 96], strides = [1, 1]} : vector<8x128xf32> to vector<8x96xf32>
    %430 = arith.negf %429 : vector<8x96xf32>
    %431 = math.exp %430 : vector<8x96xf32>
    %cst_87 = arith.constant 1.000000e+00 : f32
    %432 = vector.broadcast %cst_87 : f32 to vector<8x96xf32>
    %433 = arith.addf %432, %431 : vector<8x96xf32>
    %434 = arith.divf %432, %433 : vector<8x96xf32>
    %435 = vector.extract_strided_slice %428 {offsets = [0, 0], sizes = [8, 96], strides = [1, 1]} : vector<8x128xf32> to vector<8x96xf32>
    %436 = arith.negf %435 : vector<8x96xf32>
    %437 = math.exp %436 : vector<8x96xf32>
    %cst_88 = arith.constant 1.000000e+00 : f32
    %438 = vector.broadcast %cst_88 : f32 to vector<8x96xf32>
    %439 = arith.addf %438, %437 : vector<8x96xf32>
    %440 = arith.divf %438, %439 : vector<8x96xf32>
    %441 = vector.extract_strided_slice %426 {offsets = [0, 96], sizes = [8, 32], strides = [1, 1]} : vector<8x128xf32> to vector<8x32xf32>
    %442 = math.tanh %441 : vector<8x32xf32>
    %443 = vector.extract_strided_slice %428 {offsets = [0, 96], sizes = [8, 32], strides = [1, 1]} : vector<8x128xf32> to vector<8x32xf32>
    %444 = math.tanh %443 : vector<8x32xf32>
    %445 = vector.extract_strided_slice %434 {offsets = [0, 32], sizes = [8, 32], strides = [1, 1]} : vector<8x96xf32> to vector<8x32xf32>
    %446 = arith.mulf %445, %392 : vector<8x32xf32>
    %447 = vector.extract_strided_slice %434 {offsets = [0, 0], sizes = [8, 32], strides = [1, 1]} : vector<8x96xf32> to vector<8x32xf32>
    %448 = arith.mulf %447, %442 : vector<8x32xf32>
    %449 = arith.addf %446, %448 : vector<8x32xf32>
    %450 = vector.extract_strided_slice %440 {offsets = [0, 32], sizes = [8, 32], strides = [1, 1]} : vector<8x96xf32> to vector<8x32xf32>
    %451 = arith.mulf %450, %397 : vector<8x32xf32>
    %452 = vector.extract_strided_slice %440 {offsets = [0, 0], sizes = [8, 32], strides = [1, 1]} : vector<8x96xf32> to vector<8x32xf32>
    %453 = arith.mulf %452, %444 : vector<8x32xf32>
    %454 = arith.addf %451, %453 : vector<8x32xf32>
    %455 = vector.extract_strided_slice %434 {offsets = [0, 64], sizes = [8, 32], strides = [1, 1]} : vector<8x96xf32> to vector<8x32xf32>
    %456 = math.tanh %449 : vector<8x32xf32>
    %457 = arith.mulf %455, %456 : vector<8x32xf32>
    %458 = vector.extract_strided_slice %440 {offsets = [0, 64], sizes = [8, 32], strides = [1, 1]} : vector<8x96xf32> to vector<8x32xf32>
    %459 = math.tanh %454 : vector<8x32xf32>
    %460 = arith.mulf %458, %459 : vector<8x32xf32>
    %461 = vector.broadcast %c7_i32_79 : i32 to vector<8x1xi32>
    %462 = arith.cmpi sgt, %12, %461 : vector<8x1xi32>
    %463 = arith.extui %462 : vector<8x1xi1> to vector<8x1xi32>
    %464 = arith.sitofp %463 : vector<8x1xi32> to vector<8x1xf32>
    %465 = vector.broadcast %418 : i32 to vector<8x1xi32>
    %466 = arith.cmpi sgt, %12, %465 : vector<8x1xi32>
    %467 = arith.extui %466 : vector<8x1xi1> to vector<8x1xi32>
    %468 = arith.sitofp %467 : vector<8x1xi32> to vector<8x1xf32>
    %469 = vector.broadcast %464 : vector<8x1xf32> to vector<8x32xf32>
    %470 = arith.mulf %457, %469 : vector<8x32xf32>
    %471 = arith.addf %414, %470 : vector<8x32xf32>
    %472 = vector.broadcast %468 : vector<8x1xf32> to vector<8x32xf32>
    %473 = arith.mulf %460, %472 : vector<8x32xf32>
    %474 = arith.addf %417, %473 : vector<8x32xf32>
    %c8_i32 = arith.constant 8 : i32
    %475 = vector.broadcast %17 : vector<8x1xf32> to vector<8x32xf32>
    %476 = arith.mulf %471, %475 : vector<8x32xf32>
    %477 = vector.broadcast %17 : vector<8x1xf32> to vector<8x32xf32>
    %478 = arith.mulf %474, %477 : vector<8x32xf32>
    %c0_89 = arith.constant 0 : index
    %c0_90 = arith.constant 0 : index
    %479 = vector.load %arg2[%c0_89, %c0_90] : memref<96x32xf32, #tpu.memory_space<vmem>>, vector<96x32xf32>
    %cst_91 = arith.constant dense<0.000000e+00> : vector<96x256xf32>
    %480 = tpu.matmul %479, %0, %cst_91 {dimension_numbers = #tpu.dot_dimension_numbers<[1], [0], [0], [1], [0, 0, 1, 1], [], []>} : vector<96x32xf32>, vector<32x256xf32>, vector<96x256xf32> -> vector<96x256xf32>
    %481 = vector.broadcast %1 : vector<1x256xf32> to vector<96x256xf32>
    %482 = arith.addf %480, %481 : vector<96x256xf32>
    %483 = vector.shape_cast %482 : vector<96x256xf32> to vector<12x8x256xf32>
    %c0_92 = arith.constant 0 : index
    %c0_93 = arith.constant 0 : index
    %c0_94 = arith.constant 0 : index
    %484 = vector.load %arg9[%c0_92, %c0_93, %c0_94] : memref<12x8x256xf32, #tpu.memory_space<vmem>>, vector<12x8x256xf32>
    tpu.vector_store %arg9[%c0_92, %c0_93, %c0_94], %483 {strides = array<i32>} : memref<12x8x256xf32, #tpu.memory_space<vmem>>, vector<12x8x256xf32>,
    %c0_95 = arith.constant 0 : index
    %c0_96 = arith.constant 0 : index
    %485 = vector.load %arg4[%c0_95, %c0_96] : memref<8x1xi32, #tpu.memory_space<vmem>>, vector<8x1xi32>
    %486 = arith.sitofp %485 : vector<8x1xi32> to vector<8x1xf32>
    %cst_97 = arith.constant 1.000000e+00 : f32
    %487 = vector.broadcast %cst_97 : f32 to vector<8x1xf32>
    %488 = arith.maximumf %486, %487 : vector<8x1xf32>
    %cst_98 = arith.constant 1.000000e+00 : f32
    %489 = vector.broadcast %cst_98 : f32 to vector<8x1xf32>
    %490 = arith.divf %489, %488 : vector<8x1xf32>
    %cst_99 = arith.constant 0.000000e+00 : f32
    %491 = vector.broadcast %cst_99 : f32 to vector<8x32xf32>
    %c0_i32_100 = arith.constant 0 : i32
    %c11_i32 = arith.constant 11 : i32
    %492 = arith.subi %c11_i32, %c0_i32_100 : i32
    %493 = arith.index_cast %c0_i32_100 : i32 to index
    %c0_101 = arith.constant 0 : index
    %c0_102 = arith.constant 0 : index
    %494 = vector.load %arg9[%493, %c0_101, %c0_102] : memref<12x8x256xf32, #tpu.memory_space<vmem>>, vector<1x8x128xf32>
    %495 = vector.shape_cast %494 : vector<1x8x128xf32> to vector<8x128xf32>
    %496 = arith.index_cast %492 : i32 to index
    %c0_103 = arith.constant 0 : index
    %c128_104 = arith.constant 128 : index
    %497 = vector.load %arg9[%496, %c0_103, %c128_104] : memref<12x8x256xf32, #tpu.memory_space<vmem>>, vector<1x8x128xf32>
    %498 = vector.shape_cast %497 : vector<1x8x128xf32> to vector<8x128xf32>
    %cst_105 = arith.constant dense<0.000000e+00> : vector<8x128xf32>
    %499 = tpu.matmul %491, %3, %cst_105 {dimension_numbers = #tpu.dot_dimension_numbers<[1], [0], [0], [1], [0, 0, 1, 1], [], []>} : vector<8x32xf32>, vector<32x128xf32>, vector<8x128xf32> -> vector<8x128xf32>
    %500 = arith.addf %495, %499 : vector<8x128xf32>
    %cst_106 = arith.constant dense<0.000000e+00> : vector<8x128xf32>
    %501 = tpu.matmul %491, %5, %cst_106 {dimension_numbers = #tpu.dot_dimension_numbers<[1], [0], [0], [1], [0, 0, 1, 1], [], []>} : vector<8x32xf32>, vector<32x128xf32>, vector<8x128xf32> -> vector<8x128xf32>
    %502 = arith.addf %498, %501 : vector<8x128xf32>
    %503 = vector.extract_strided_slice %500 {offsets = [0, 0], sizes = [8, 96], strides = [1, 1]} : vector<8x128xf32> to vector<8x96xf32>
    %504 = arith.negf %503 : vector<8x96xf32>
    %505 = math.exp %504 : vector<8x96xf32>
    %cst_107 = arith.constant 1.000000e+00 : f32
    %506 = vector.broadcast %cst_107 : f32 to vector<8x96xf32>
    %507 = arith.addf %506, %505 : vector<8x96xf32>
    %508 = arith.divf %506, %507 : vector<8x96xf32>
    %509 = vector.extract_strided_slice %502 {offsets = [0, 0], sizes = [8, 96], strides = [1, 1]} : vector<8x128xf32> to vector<8x96xf32>
    %510 = arith.negf %509 : vector<8x96xf32>
    %511 = math.exp %510 : vector<8x96xf32>
    %cst_108 = arith.constant 1.000000e+00 : f32
    %512 = vector.broadcast %cst_108 : f32 to vector<8x96xf32>
    %513 = arith.addf %512, %511 : vector<8x96xf32>
    %514 = arith.divf %512, %513 : vector<8x96xf32>
    %515 = vector.extract_strided_slice %500 {offsets = [0, 96], sizes = [8, 32], strides = [1, 1]} : vector<8x128xf32> to vector<8x32xf32>
    %516 = math.tanh %515 : vector<8x32xf32>
    %517 = vector.extract_strided_slice %502 {offsets = [0, 96], sizes = [8, 32], strides = [1, 1]} : vector<8x128xf32> to vector<8x32xf32>
    %518 = math.tanh %517 : vector<8x32xf32>
    %519 = vector.extract_strided_slice %508 {offsets = [0, 32], sizes = [8, 32], strides = [1, 1]} : vector<8x96xf32> to vector<8x32xf32>
    %520 = arith.mulf %519, %491 : vector<8x32xf32>
    %521 = vector.extract_strided_slice %508 {offsets = [0, 0], sizes = [8, 32], strides = [1, 1]} : vector<8x96xf32> to vector<8x32xf32>
    %522 = arith.mulf %521, %516 : vector<8x32xf32>
    %523 = arith.addf %520, %522 : vector<8x32xf32>
    %524 = vector.extract_strided_slice %514 {offsets = [0, 32], sizes = [8, 32], strides = [1, 1]} : vector<8x96xf32> to vector<8x32xf32>
    %525 = arith.mulf %524, %491 : vector<8x32xf32>
    %526 = vector.extract_strided_slice %514 {offsets = [0, 0], sizes = [8, 32], strides = [1, 1]} : vector<8x96xf32> to vector<8x32xf32>
    %527 = arith.mulf %526, %518 : vector<8x32xf32>
    %528 = arith.addf %525, %527 : vector<8x32xf32>
    %529 = vector.extract_strided_slice %508 {offsets = [0, 64], sizes = [8, 32], strides = [1, 1]} : vector<8x96xf32> to vector<8x32xf32>
    %530 = math.tanh %523 : vector<8x32xf32>
    %531 = arith.mulf %529, %530 : vector<8x32xf32>
    %532 = vector.extract_strided_slice %514 {offsets = [0, 64], sizes = [8, 32], strides = [1, 1]} : vector<8x96xf32> to vector<8x32xf32>
    %533 = math.tanh %528 : vector<8x32xf32>
    %534 = arith.mulf %532, %533 : vector<8x32xf32>
    %535 = vector.broadcast %c0_i32_100 : i32 to vector<8x1xi32>
    %536 = arith.cmpi sgt, %485, %535 : vector<8x1xi32>
    %537 = arith.extui %536 : vector<8x1xi1> to vector<8x1xi32>
    %538 = arith.sitofp %537 : vector<8x1xi32> to vector<8x1xf32>
    %539 = vector.broadcast %492 : i32 to vector<8x1xi32>
    %540 = arith.cmpi sgt, %485, %539 : vector<8x1xi32>
    %541 = arith.extui %540 : vector<8x1xi1> to vector<8x1xi32>
    %542 = arith.sitofp %541 : vector<8x1xi32> to vector<8x1xf32>
    %543 = vector.broadcast %538 : vector<8x1xf32> to vector<8x32xf32>
    %544 = arith.mulf %531, %543 : vector<8x32xf32>
    %545 = arith.addf %491, %544 : vector<8x32xf32>
    %546 = vector.broadcast %542 : vector<8x1xf32> to vector<8x32xf32>
    %547 = arith.mulf %534, %546 : vector<8x32xf32>
    %548 = arith.addf %491, %547 : vector<8x32xf32>
    %c1_i32_109 = arith.constant 1 : i32
    %c11_i32_110 = arith.constant 11 : i32
    %549 = arith.subi %c11_i32_110, %c1_i32_109 : i32
    %550 = arith.index_cast %c1_i32_109 : i32 to index
    %c0_111 = arith.constant 0 : index
    %c0_112 = arith.constant 0 : index
    %551 = vector.load %arg9[%550, %c0_111, %c0_112] : memref<12x8x256xf32, #tpu.memory_space<vmem>>, vector<1x8x128xf32>
    %552 = vector.shape_cast %551 : vector<1x8x128xf32> to vector<8x128xf32>
    %553 = arith.index_cast %549 : i32 to index
    %c0_113 = arith.constant 0 : index
    %c128_114 = arith.constant 128 : index
    %554 = vector.load %arg9[%553, %c0_113, %c128_114] : memref<12x8x256xf32, #tpu.memory_space<vmem>>, vector<1x8x128xf32>
    %555 = vector.shape_cast %554 : vector<1x8x128xf32> to vector<8x128xf32>
    %cst_115 = arith.constant dense<0.000000e+00> : vector<8x128xf32>
    %556 = tpu.matmul %531, %3, %cst_115 {dimension_numbers = #tpu.dot_dimension_numbers<[1], [0], [0], [1], [0, 0, 1, 1], [], []>} : vector<8x32xf32>, vector<32x128xf32>, vector<8x128xf32> -> vector<8x128xf32>
    %557 = arith.addf %552, %556 : vector<8x128xf32>
    %cst_116 = arith.constant dense<0.000000e+00> : vector<8x128xf32>
    %558 = tpu.matmul %534, %5, %cst_116 {dimension_numbers = #tpu.dot_dimension_numbers<[1], [0], [0], [1], [0, 0, 1, 1], [], []>} : vector<8x32xf32>, vector<32x128xf32>, vector<8x128xf32> -> vector<8x128xf32>
    %559 = arith.addf %555, %558 : vector<8x128xf32>
    %560 = vector.extract_strided_slice %557 {offsets = [0, 0], sizes = [8, 96], strides = [1, 1]} : vector<8x128xf32> to vector<8x96xf32>
    %561 = arith.negf %560 : vector<8x96xf32>
    %562 = math.exp %561 : vector<8x96xf32>
    %cst_117 = arith.constant 1.000000e+00 : f32
    %563 = vector.broadcast %cst_117 : f32 to vector<8x96xf32>
    %564 = arith.addf %563, %562 : vector<8x96xf32>
    %565 = arith.divf %563, %564 : vector<8x96xf32>
    %566 = vector.extract_strided_slice %559 {offsets = [0, 0], sizes = [8, 96], strides = [1, 1]} : vector<8x128xf32> to vector<8x96xf32>
    %567 = arith.negf %566 : vector<8x96xf32>
    %568 = math.exp %567 : vector<8x96xf32>
    %cst_118 = arith.constant 1.000000e+00 : f32
    %569 = vector.broadcast %cst_118 : f32 to vector<8x96xf32>
    %570 = arith.addf %569, %568 : vector<8x96xf32>
    %571 = arith.divf %569, %570 : vector<8x96xf32>
    %572 = vector.extract_strided_slice %557 {offsets = [0, 96], sizes = [8, 32], strides = [1, 1]} : vector<8x128xf32> to vector<8x32xf32>
    %573 = math.tanh %572 : vector<8x32xf32>
    %574 = vector.extract_strided_slice %559 {offsets = [0, 96], sizes = [8, 32], strides = [1, 1]} : vector<8x128xf32> to vector<8x32xf32>
    %575 = math.tanh %574 : vector<8x32xf32>
    %576 = vector.extract_strided_slice %565 {offsets = [0, 32], sizes = [8, 32], strides = [1, 1]} : vector<8x96xf32> to vector<8x32xf32>
    %577 = arith.mulf %576, %523 : vector<8x32xf32>
    %578 = vector.extract_strided_slice %565 {offsets = [0, 0], sizes = [8, 32], strides = [1, 1]} : vector<8x96xf32> to vector<8x32xf32>
    %579 = arith.mulf %578, %573 : vector<8x32xf32>
    %580 = arith.addf %577, %579 : vector<8x32xf32>
    %581 = vector.extract_strided_slice %571 {offsets = [0, 32], sizes = [8, 32], strides = [1, 1]} : vector<8x96xf32> to vector<8x32xf32>
    %582 = arith.mulf %581, %528 : vector<8x32xf32>
    %583 = vector.extract_strided_slice %571 {offsets = [0, 0], sizes = [8, 32], strides = [1, 1]} : vector<8x96xf32> to vector<8x32xf32>
    %584 = arith.mulf %583, %575 : vector<8x32xf32>
    %585 = arith.addf %582, %584 : vector<8x32xf32>
    %586 = vector.extract_strided_slice %565 {offsets = [0, 64], sizes = [8, 32], strides = [1, 1]} : vector<8x96xf32> to vector<8x32xf32>
    %587 = math.tanh %580 : vector<8x32xf32>
    %588 = arith.mulf %586, %587 : vector<8x32xf32>
    %589 = vector.extract_strided_slice %571 {offsets = [0, 64], sizes = [8, 32], strides = [1, 1]} : vector<8x96xf32> to vector<8x32xf32>
    %590 = math.tanh %585 : vector<8x32xf32>
    %591 = arith.mulf %589, %590 : vector<8x32xf32>
    %592 = vector.broadcast %c1_i32_109 : i32 to vector<8x1xi32>
    %593 = arith.cmpi sgt, %485, %592 : vector<8x1xi32>
    %594 = arith.extui %593 : vector<8x1xi1> to vector<8x1xi32>
    %595 = arith.sitofp %594 : vector<8x1xi32> to vector<8x1xf32>
    %596 = vector.broadcast %549 : i32 to vector<8x1xi32>
    %597 = arith.cmpi sgt, %485, %596 : vector<8x1xi32>
    %598 = arith.extui %597 : vector<8x1xi1> to vector<8x1xi32>
    %599 = arith.sitofp %598 : vector<8x1xi32> to vector<8x1xf32>
    %600 = vector.broadcast %595 : vector<8x1xf32> to vector<8x32xf32>
    %601 = arith.mulf %588, %600 : vector<8x32xf32>
    %602 = arith.addf %545, %601 : vector<8x32xf32>
    %603 = vector.broadcast %599 : vector<8x1xf32> to vector<8x32xf32>
    %604 = arith.mulf %591, %603 : vector<8x32xf32>
    %605 = arith.addf %548, %604 : vector<8x32xf32>
    %c2_i32_119 = arith.constant 2 : i32
    %c11_i32_120 = arith.constant 11 : i32
    %606 = arith.subi %c11_i32_120, %c2_i32_119 : i32
    %607 = arith.index_cast %c2_i32_119 : i32 to index
    %c0_121 = arith.constant 0 : index
    %c0_122 = arith.constant 0 : index
    %608 = vector.load %arg9[%607, %c0_121, %c0_122] : memref<12x8x256xf32, #tpu.memory_space<vmem>>, vector<1x8x128xf32>
    %609 = vector.shape_cast %608 : vector<1x8x128xf32> to vector<8x128xf32>
    %610 = arith.index_cast %606 : i32 to index
    %c0_123 = arith.constant 0 : index
    %c128_124 = arith.constant 128 : index
    %611 = vector.load %arg9[%610, %c0_123, %c128_124] : memref<12x8x256xf32, #tpu.memory_space<vmem>>, vector<1x8x128xf32>
    %612 = vector.shape_cast %611 : vector<1x8x128xf32> to vector<8x128xf32>
    %cst_125 = arith.constant dense<0.000000e+00> : vector<8x128xf32>
    %613 = tpu.matmul %588, %3, %cst_125 {dimension_numbers = #tpu.dot_dimension_numbers<[1], [0], [0], [1], [0, 0, 1, 1], [], []>} : vector<8x32xf32>, vector<32x128xf32>, vector<8x128xf32> -> vector<8x128xf32>
    %614 = arith.addf %609, %613 : vector<8x128xf32>
    %cst_126 = arith.constant dense<0.000000e+00> : vector<8x128xf32>
    %615 = tpu.matmul %591, %5, %cst_126 {dimension_numbers = #tpu.dot_dimension_numbers<[1], [0], [0], [1], [0, 0, 1, 1], [], []>} : vector<8x32xf32>, vector<32x128xf32>, vector<8x128xf32> -> vector<8x128xf32>
    %616 = arith.addf %612, %615 : vector<8x128xf32>
    %617 = vector.extract_strided_slice %614 {offsets = [0, 0], sizes = [8, 96], strides = [1, 1]} : vector<8x128xf32> to vector<8x96xf32>
    %618 = arith.negf %617 : vector<8x96xf32>
    %619 = math.exp %618 : vector<8x96xf32>
    %cst_127 = arith.constant 1.000000e+00 : f32
    %620 = vector.broadcast %cst_127 : f32 to vector<8x96xf32>
    %621 = arith.addf %620, %619 : vector<8x96xf32>
    %622 = arith.divf %620, %621 : vector<8x96xf32>
    %623 = vector.extract_strided_slice %616 {offsets = [0, 0], sizes = [8, 96], strides = [1, 1]} : vector<8x128xf32> to vector<8x96xf32>
    %624 = arith.negf %623 : vector<8x96xf32>
    %625 = math.exp %624 : vector<8x96xf32>
    %cst_128 = arith.constant 1.000000e+00 : f32
    %626 = vector.broadcast %cst_128 : f32 to vector<8x96xf32>
    %627 = arith.addf %626, %625 : vector<8x96xf32>
    %628 = arith.divf %626, %627 : vector<8x96xf32>
    %629 = vector.extract_strided_slice %614 {offsets = [0, 96], sizes = [8, 32], strides = [1, 1]} : vector<8x128xf32> to vector<8x32xf32>
    %630 = math.tanh %629 : vector<8x32xf32>
    %631 = vector.extract_strided_slice %616 {offsets = [0, 96], sizes = [8, 32], strides = [1, 1]} : vector<8x128xf32> to vector<8x32xf32>
    %632 = math.tanh %631 : vector<8x32xf32>
    %633 = vector.extract_strided_slice %622 {offsets = [0, 32], sizes = [8, 32], strides = [1, 1]} : vector<8x96xf32> to vector<8x32xf32>
    %634 = arith.mulf %633, %580 : vector<8x32xf32>
    %635 = vector.extract_strided_slice %622 {offsets = [0, 0], sizes = [8, 32], strides = [1, 1]} : vector<8x96xf32> to vector<8x32xf32>
    %636 = arith.mulf %635, %630 : vector<8x32xf32>
    %637 = arith.addf %634, %636 : vector<8x32xf32>
    %638 = vector.extract_strided_slice %628 {offsets = [0, 32], sizes = [8, 32], strides = [1, 1]} : vector<8x96xf32> to vector<8x32xf32>
    %639 = arith.mulf %638, %585 : vector<8x32xf32>
    %640 = vector.extract_strided_slice %628 {offsets = [0, 0], sizes = [8, 32], strides = [1, 1]} : vector<8x96xf32> to vector<8x32xf32>
    %641 = arith.mulf %640, %632 : vector<8x32xf32>
    %642 = arith.addf %639, %641 : vector<8x32xf32>
    %643 = vector.extract_strided_slice %622 {offsets = [0, 64], sizes = [8, 32], strides = [1, 1]} : vector<8x96xf32> to vector<8x32xf32>
    %644 = math.tanh %637 : vector<8x32xf32>
    %645 = arith.mulf %643, %644 : vector<8x32xf32>
    %646 = vector.extract_strided_slice %628 {offsets = [0, 64], sizes = [8, 32], strides = [1, 1]} : vector<8x96xf32> to vector<8x32xf32>
    %647 = math.tanh %642 : vector<8x32xf32>
    %648 = arith.mulf %646, %647 : vector<8x32xf32>
    %649 = vector.broadcast %c2_i32_119 : i32 to vector<8x1xi32>
    %650 = arith.cmpi sgt, %485, %649 : vector<8x1xi32>
    %651 = arith.extui %650 : vector<8x1xi1> to vector<8x1xi32>
    %652 = arith.sitofp %651 : vector<8x1xi32> to vector<8x1xf32>
    %653 = vector.broadcast %606 : i32 to vector<8x1xi32>
    %654 = arith.cmpi sgt, %485, %653 : vector<8x1xi32>
    %655 = arith.extui %654 : vector<8x1xi1> to vector<8x1xi32>
    %656 = arith.sitofp %655 : vector<8x1xi32> to vector<8x1xf32>
    %657 = vector.broadcast %652 : vector<8x1xf32> to vector<8x32xf32>
    %658 = arith.mulf %645, %657 : vector<8x32xf32>
    %659 = arith.addf %602, %658 : vector<8x32xf32>
    %660 = vector.broadcast %656 : vector<8x1xf32> to vector<8x32xf32>
    %661 = arith.mulf %648, %660 : vector<8x32xf32>
    %662 = arith.addf %605, %661 : vector<8x32xf32>
    %c3_i32_129 = arith.constant 3 : i32
    %c11_i32_130 = arith.constant 11 : i32
    %663 = arith.subi %c11_i32_130, %c3_i32_129 : i32
    %664 = arith.index_cast %c3_i32_129 : i32 to index
    %c0_131 = arith.constant 0 : index
    %c0_132 = arith.constant 0 : index
    %665 = vector.load %arg9[%664, %c0_131, %c0_132] : memref<12x8x256xf32, #tpu.memory_space<vmem>>, vector<1x8x128xf32>
    %666 = vector.shape_cast %665 : vector<1x8x128xf32> to vector<8x128xf32>
    %667 = arith.index_cast %663 : i32 to index
    %c0_133 = arith.constant 0 : index
    %c128_134 = arith.constant 128 : index
    %668 = vector.load %arg9[%667, %c0_133, %c128_134] : memref<12x8x256xf32, #tpu.memory_space<vmem>>, vector<1x8x128xf32>
    %669 = vector.shape_cast %668 : vector<1x8x128xf32> to vector<8x128xf32>
    %cst_135 = arith.constant dense<0.000000e+00> : vector<8x128xf32>
    %670 = tpu.matmul %645, %3, %cst_135 {dimension_numbers = #tpu.dot_dimension_numbers<[1], [0], [0], [1], [0, 0, 1, 1], [], []>} : vector<8x32xf32>, vector<32x128xf32>, vector<8x128xf32> -> vector<8x128xf32>
    %671 = arith.addf %666, %670 : vector<8x128xf32>
    %cst_136 = arith.constant dense<0.000000e+00> : vector<8x128xf32>
    %672 = tpu.matmul %648, %5, %cst_136 {dimension_numbers = #tpu.dot_dimension_numbers<[1], [0], [0], [1], [0, 0, 1, 1], [], []>} : vector<8x32xf32>, vector<32x128xf32>, vector<8x128xf32> -> vector<8x128xf32>
    %673 = arith.addf %669, %672 : vector<8x128xf32>
    %674 = vector.extract_strided_slice %671 {offsets = [0, 0], sizes = [8, 96], strides = [1, 1]} : vector<8x128xf32> to vector<8x96xf32>
    %675 = arith.negf %674 : vector<8x96xf32>
    %676 = math.exp %675 : vector<8x96xf32>
    %cst_137 = arith.constant 1.000000e+00 : f32
    %677 = vector.broadcast %cst_137 : f32 to vector<8x96xf32>
    %678 = arith.addf %677, %676 : vector<8x96xf32>
    %679 = arith.divf %677, %678 : vector<8x96xf32>
    %680 = vector.extract_strided_slice %673 {offsets = [0, 0], sizes = [8, 96], strides = [1, 1]} : vector<8x128xf32> to vector<8x96xf32>
    %681 = arith.negf %680 : vector<8x96xf32>
    %682 = math.exp %681 : vector<8x96xf32>
    %cst_138 = arith.constant 1.000000e+00 : f32
    %683 = vector.broadcast %cst_138 : f32 to vector<8x96xf32>
    %684 = arith.addf %683, %682 : vector<8x96xf32>
    %685 = arith.divf %683, %684 : vector<8x96xf32>
    %686 = vector.extract_strided_slice %671 {offsets = [0, 96], sizes = [8, 32], strides = [1, 1]} : vector<8x128xf32> to vector<8x32xf32>
    %687 = math.tanh %686 : vector<8x32xf32>
    %688 = vector.extract_strided_slice %673 {offsets = [0, 96], sizes = [8, 32], strides = [1, 1]} : vector<8x128xf32> to vector<8x32xf32>
    %689 = math.tanh %688 : vector<8x32xf32>
    %690 = vector.extract_strided_slice %679 {offsets = [0, 32], sizes = [8, 32], strides = [1, 1]} : vector<8x96xf32> to vector<8x32xf32>
    %691 = arith.mulf %690, %637 : vector<8x32xf32>
    %692 = vector.extract_strided_slice %679 {offsets = [0, 0], sizes = [8, 32], strides = [1, 1]} : vector<8x96xf32> to vector<8x32xf32>
    %693 = arith.mulf %692, %687 : vector<8x32xf32>
    %694 = arith.addf %691, %693 : vector<8x32xf32>
    %695 = vector.extract_strided_slice %685 {offsets = [0, 32], sizes = [8, 32], strides = [1, 1]} : vector<8x96xf32> to vector<8x32xf32>
    %696 = arith.mulf %695, %642 : vector<8x32xf32>
    %697 = vector.extract_strided_slice %685 {offsets = [0, 0], sizes = [8, 32], strides = [1, 1]} : vector<8x96xf32> to vector<8x32xf32>
    %698 = arith.mulf %697, %689 : vector<8x32xf32>
    %699 = arith.addf %696, %698 : vector<8x32xf32>
    %700 = vector.extract_strided_slice %679 {offsets = [0, 64], sizes = [8, 32], strides = [1, 1]} : vector<8x96xf32> to vector<8x32xf32>
    %701 = math.tanh %694 : vector<8x32xf32>
    %702 = arith.mulf %700, %701 : vector<8x32xf32>
    %703 = vector.extract_strided_slice %685 {offsets = [0, 64], sizes = [8, 32], strides = [1, 1]} : vector<8x96xf32> to vector<8x32xf32>
    %704 = math.tanh %699 : vector<8x32xf32>
    %705 = arith.mulf %703, %704 : vector<8x32xf32>
    %706 = vector.broadcast %c3_i32_129 : i32 to vector<8x1xi32>
    %707 = arith.cmpi sgt, %485, %706 : vector<8x1xi32>
    %708 = arith.extui %707 : vector<8x1xi1> to vector<8x1xi32>
    %709 = arith.sitofp %708 : vector<8x1xi32> to vector<8x1xf32>
    %710 = vector.broadcast %663 : i32 to vector<8x1xi32>
    %711 = arith.cmpi sgt, %485, %710 : vector<8x1xi32>
    %712 = arith.extui %711 : vector<8x1xi1> to vector<8x1xi32>
    %713 = arith.sitofp %712 : vector<8x1xi32> to vector<8x1xf32>
    %714 = vector.broadcast %709 : vector<8x1xf32> to vector<8x32xf32>
    %715 = arith.mulf %702, %714 : vector<8x32xf32>
    %716 = arith.addf %659, %715 : vector<8x32xf32>
    %717 = vector.broadcast %713 : vector<8x1xf32> to vector<8x32xf32>
    %718 = arith.mulf %705, %717 : vector<8x32xf32>
    %719 = arith.addf %662, %718 : vector<8x32xf32>
    %c4_i32_139 = arith.constant 4 : i32
    %c11_i32_140 = arith.constant 11 : i32
    %720 = arith.subi %c11_i32_140, %c4_i32_139 : i32
    %721 = arith.index_cast %c4_i32_139 : i32 to index
    %c0_141 = arith.constant 0 : index
    %c0_142 = arith.constant 0 : index
    %722 = vector.load %arg9[%721, %c0_141, %c0_142] : memref<12x8x256xf32, #tpu.memory_space<vmem>>, vector<1x8x128xf32>
    %723 = vector.shape_cast %722 : vector<1x8x128xf32> to vector<8x128xf32>
    %724 = arith.index_cast %720 : i32 to index
    %c0_143 = arith.constant 0 : index
    %c128_144 = arith.constant 128 : index
    %725 = vector.load %arg9[%724, %c0_143, %c128_144] : memref<12x8x256xf32, #tpu.memory_space<vmem>>, vector<1x8x128xf32>
    %726 = vector.shape_cast %725 : vector<1x8x128xf32> to vector<8x128xf32>
    %cst_145 = arith.constant dense<0.000000e+00> : vector<8x128xf32>
    %727 = tpu.matmul %702, %3, %cst_145 {dimension_numbers = #tpu.dot_dimension_numbers<[1], [0], [0], [1], [0, 0, 1, 1], [], []>} : vector<8x32xf32>, vector<32x128xf32>, vector<8x128xf32> -> vector<8x128xf32>
    %728 = arith.addf %723, %727 : vector<8x128xf32>
    %cst_146 = arith.constant dense<0.000000e+00> : vector<8x128xf32>
    %729 = tpu.matmul %705, %5, %cst_146 {dimension_numbers = #tpu.dot_dimension_numbers<[1], [0], [0], [1], [0, 0, 1, 1], [], []>} : vector<8x32xf32>, vector<32x128xf32>, vector<8x128xf32> -> vector<8x128xf32>
    %730 = arith.addf %726, %729 : vector<8x128xf32>
    %731 = vector.extract_strided_slice %728 {offsets = [0, 0], sizes = [8, 96], strides = [1, 1]} : vector<8x128xf32> to vector<8x96xf32>
    %732 = arith.negf %731 : vector<8x96xf32>
    %733 = math.exp %732 : vector<8x96xf32>
    %cst_147 = arith.constant 1.000000e+00 : f32
    %734 = vector.broadcast %cst_147 : f32 to vector<8x96xf32>
    %735 = arith.addf %734, %733 : vector<8x96xf32>
    %736 = arith.divf %734, %735 : vector<8x96xf32>
    %737 = vector.extract_strided_slice %730 {offsets = [0, 0], sizes = [8, 96], strides = [1, 1]} : vector<8x128xf32> to vector<8x96xf32>
    %738 = arith.negf %737 : vector<8x96xf32>
    %739 = math.exp %738 : vector<8x96xf32>
    %cst_148 = arith.constant 1.000000e+00 : f32
    %740 = vector.broadcast %cst_148 : f32 to vector<8x96xf32>
    %741 = arith.addf %740, %739 : vector<8x96xf32>
    %742 = arith.divf %740, %741 : vector<8x96xf32>
    %743 = vector.extract_strided_slice %728 {offsets = [0, 96], sizes = [8, 32], strides = [1, 1]} : vector<8x128xf32> to vector<8x32xf32>
    %744 = math.tanh %743 : vector<8x32xf32>
    %745 = vector.extract_strided_slice %730 {offsets = [0, 96], sizes = [8, 32], strides = [1, 1]} : vector<8x128xf32> to vector<8x32xf32>
    %746 = math.tanh %745 : vector<8x32xf32>
    %747 = vector.extract_strided_slice %736 {offsets = [0, 32], sizes = [8, 32], strides = [1, 1]} : vector<8x96xf32> to vector<8x32xf32>
    %748 = arith.mulf %747, %694 : vector<8x32xf32>
    %749 = vector.extract_strided_slice %736 {offsets = [0, 0], sizes = [8, 32], strides = [1, 1]} : vector<8x96xf32> to vector<8x32xf32>
    %750 = arith.mulf %749, %744 : vector<8x32xf32>
    %751 = arith.addf %748, %750 : vector<8x32xf32>
    %752 = vector.extract_strided_slice %742 {offsets = [0, 32], sizes = [8, 32], strides = [1, 1]} : vector<8x96xf32> to vector<8x32xf32>
    %753 = arith.mulf %752, %699 : vector<8x32xf32>
    %754 = vector.extract_strided_slice %742 {offsets = [0, 0], sizes = [8, 32], strides = [1, 1]} : vector<8x96xf32> to vector<8x32xf32>
    %755 = arith.mulf %754, %746 : vector<8x32xf32>
    %756 = arith.addf %753, %755 : vector<8x32xf32>
    %757 = vector.extract_strided_slice %736 {offsets = [0, 64], sizes = [8, 32], strides = [1, 1]} : vector<8x96xf32> to vector<8x32xf32>
    %758 = math.tanh %751 : vector<8x32xf32>
    %759 = arith.mulf %757, %758 : vector<8x32xf32>
    %760 = vector.extract_strided_slice %742 {offsets = [0, 64], sizes = [8, 32], strides = [1, 1]} : vector<8x96xf32> to vector<8x32xf32>
    %761 = math.tanh %756 : vector<8x32xf32>
    %762 = arith.mulf %760, %761 : vector<8x32xf32>
    %763 = vector.broadcast %c4_i32_139 : i32 to vector<8x1xi32>
    %764 = arith.cmpi sgt, %485, %763 : vector<8x1xi32>
    %765 = arith.extui %764 : vector<8x1xi1> to vector<8x1xi32>
    %766 = arith.sitofp %765 : vector<8x1xi32> to vector<8x1xf32>
    %767 = vector.broadcast %720 : i32 to vector<8x1xi32>
    %768 = arith.cmpi sgt, %485, %767 : vector<8x1xi32>
    %769 = arith.extui %768 : vector<8x1xi1> to vector<8x1xi32>
    %770 = arith.sitofp %769 : vector<8x1xi32> to vector<8x1xf32>
    %771 = vector.broadcast %766 : vector<8x1xf32> to vector<8x32xf32>
    %772 = arith.mulf %759, %771 : vector<8x32xf32>
    %773 = arith.addf %716, %772 : vector<8x32xf32>
    %774 = vector.broadcast %770 : vector<8x1xf32> to vector<8x32xf32>
    %775 = arith.mulf %762, %774 : vector<8x32xf32>
    %776 = arith.addf %719, %775 : vector<8x32xf32>
    %c5_i32_149 = arith.constant 5 : i32
    %c11_i32_150 = arith.constant 11 : i32
    %777 = arith.subi %c11_i32_150, %c5_i32_149 : i32
    %778 = arith.index_cast %c5_i32_149 : i32 to index
    %c0_151 = arith.constant 0 : index
    %c0_152 = arith.constant 0 : index
    %779 = vector.load %arg9[%778, %c0_151, %c0_152] : memref<12x8x256xf32, #tpu.memory_space<vmem>>, vector<1x8x128xf32>
    %780 = vector.shape_cast %779 : vector<1x8x128xf32> to vector<8x128xf32>
    %781 = arith.index_cast %777 : i32 to index
    %c0_153 = arith.constant 0 : index
    %c128_154 = arith.constant 128 : index
    %782 = vector.load %arg9[%781, %c0_153, %c128_154] : memref<12x8x256xf32, #tpu.memory_space<vmem>>, vector<1x8x128xf32>
    %783 = vector.shape_cast %782 : vector<1x8x128xf32> to vector<8x128xf32>
    %cst_155 = arith.constant dense<0.000000e+00> : vector<8x128xf32>
    %784 = tpu.matmul %759, %3, %cst_155 {dimension_numbers = #tpu.dot_dimension_numbers<[1], [0], [0], [1], [0, 0, 1, 1], [], []>} : vector<8x32xf32>, vector<32x128xf32>, vector<8x128xf32> -> vector<8x128xf32>
    %785 = arith.addf %780, %784 : vector<8x128xf32>
    %cst_156 = arith.constant dense<0.000000e+00> : vector<8x128xf32>
    %786 = tpu.matmul %762, %5, %cst_156 {dimension_numbers = #tpu.dot_dimension_numbers<[1], [0], [0], [1], [0, 0, 1, 1], [], []>} : vector<8x32xf32>, vector<32x128xf32>, vector<8x128xf32> -> vector<8x128xf32>
    %787 = arith.addf %783, %786 : vector<8x128xf32>
    %788 = vector.extract_strided_slice %785 {offsets = [0, 0], sizes = [8, 96], strides = [1, 1]} : vector<8x128xf32> to vector<8x96xf32>
    %789 = arith.negf %788 : vector<8x96xf32>
    %790 = math.exp %789 : vector<8x96xf32>
    %cst_157 = arith.constant 1.000000e+00 : f32
    %791 = vector.broadcast %cst_157 : f32 to vector<8x96xf32>
    %792 = arith.addf %791, %790 : vector<8x96xf32>
    %793 = arith.divf %791, %792 : vector<8x96xf32>
    %794 = vector.extract_strided_slice %787 {offsets = [0, 0], sizes = [8, 96], strides = [1, 1]} : vector<8x128xf32> to vector<8x96xf32>
    %795 = arith.negf %794 : vector<8x96xf32>
    %796 = math.exp %795 : vector<8x96xf32>
    %cst_158 = arith.constant 1.000000e+00 : f32
    %797 = vector.broadcast %cst_158 : f32 to vector<8x96xf32>
    %798 = arith.addf %797, %796 : vector<8x96xf32>
    %799 = arith.divf %797, %798 : vector<8x96xf32>
    %800 = vector.extract_strided_slice %785 {offsets = [0, 96], sizes = [8, 32], strides = [1, 1]} : vector<8x128xf32> to vector<8x32xf32>
    %801 = math.tanh %800 : vector<8x32xf32>
    %802 = vector.extract_strided_slice %787 {offsets = [0, 96], sizes = [8, 32], strides = [1, 1]} : vector<8x128xf32> to vector<8x32xf32>
    %803 = math.tanh %802 : vector<8x32xf32>
    %804 = vector.extract_strided_slice %793 {offsets = [0, 32], sizes = [8, 32], strides = [1, 1]} : vector<8x96xf32> to vector<8x32xf32>
    %805 = arith.mulf %804, %751 : vector<8x32xf32>
    %806 = vector.extract_strided_slice %793 {offsets = [0, 0], sizes = [8, 32], strides = [1, 1]} : vector<8x96xf32> to vector<8x32xf32>
    %807 = arith.mulf %806, %801 : vector<8x32xf32>
    %808 = arith.addf %805, %807 : vector<8x32xf32>
    %809 = vector.extract_strided_slice %799 {offsets = [0, 32], sizes = [8, 32], strides = [1, 1]} : vector<8x96xf32> to vector<8x32xf32>
    %810 = arith.mulf %809, %756 : vector<8x32xf32>
    %811 = vector.extract_strided_slice %799 {offsets = [0, 0], sizes = [8, 32], strides = [1, 1]} : vector<8x96xf32> to vector<8x32xf32>
    %812 = arith.mulf %811, %803 : vector<8x32xf32>
    %813 = arith.addf %810, %812 : vector<8x32xf32>
    %814 = vector.extract_strided_slice %793 {offsets = [0, 64], sizes = [8, 32], strides = [1, 1]} : vector<8x96xf32> to vector<8x32xf32>
    %815 = math.tanh %808 : vector<8x32xf32>
    %816 = arith.mulf %814, %815 : vector<8x32xf32>
    %817 = vector.extract_strided_slice %799 {offsets = [0, 64], sizes = [8, 32], strides = [1, 1]} : vector<8x96xf32> to vector<8x32xf32>
    %818 = math.tanh %813 : vector<8x32xf32>
    %819 = arith.mulf %817, %818 : vector<8x32xf32>
    %820 = vector.broadcast %c5_i32_149 : i32 to vector<8x1xi32>
    %821 = arith.cmpi sgt, %485, %820 : vector<8x1xi32>
    %822 = arith.extui %821 : vector<8x1xi1> to vector<8x1xi32>
    %823 = arith.sitofp %822 : vector<8x1xi32> to vector<8x1xf32>
    %824 = vector.broadcast %777 : i32 to vector<8x1xi32>
    %825 = arith.cmpi sgt, %485, %824 : vector<8x1xi32>
    %826 = arith.extui %825 : vector<8x1xi1> to vector<8x1xi32>
    %827 = arith.sitofp %826 : vector<8x1xi32> to vector<8x1xf32>
    %828 = vector.broadcast %823 : vector<8x1xf32> to vector<8x32xf32>
    %829 = arith.mulf %816, %828 : vector<8x32xf32>
    %830 = arith.addf %773, %829 : vector<8x32xf32>
    %831 = vector.broadcast %827 : vector<8x1xf32> to vector<8x32xf32>
    %832 = arith.mulf %819, %831 : vector<8x32xf32>
    %833 = arith.addf %776, %832 : vector<8x32xf32>
    %c6_i32_159 = arith.constant 6 : i32
    %c11_i32_160 = arith.constant 11 : i32
    %834 = arith.subi %c11_i32_160, %c6_i32_159 : i32
    %835 = arith.index_cast %c6_i32_159 : i32 to index
    %c0_161 = arith.constant 0 : index
    %c0_162 = arith.constant 0 : index
    %836 = vector.load %arg9[%835, %c0_161, %c0_162] : memref<12x8x256xf32, #tpu.memory_space<vmem>>, vector<1x8x128xf32>
    %837 = vector.shape_cast %836 : vector<1x8x128xf32> to vector<8x128xf32>
    %838 = arith.index_cast %834 : i32 to index
    %c0_163 = arith.constant 0 : index
    %c128_164 = arith.constant 128 : index
    %839 = vector.load %arg9[%838, %c0_163, %c128_164] : memref<12x8x256xf32, #tpu.memory_space<vmem>>, vector<1x8x128xf32>
    %840 = vector.shape_cast %839 : vector<1x8x128xf32> to vector<8x128xf32>
    %cst_165 = arith.constant dense<0.000000e+00> : vector<8x128xf32>
    %841 = tpu.matmul %816, %3, %cst_165 {dimension_numbers = #tpu.dot_dimension_numbers<[1], [0], [0], [1], [0, 0, 1, 1], [], []>} : vector<8x32xf32>, vector<32x128xf32>, vector<8x128xf32> -> vector<8x128xf32>
    %842 = arith.addf %837, %841 : vector<8x128xf32>
    %cst_166 = arith.constant dense<0.000000e+00> : vector<8x128xf32>
    %843 = tpu.matmul %819, %5, %cst_166 {dimension_numbers = #tpu.dot_dimension_numbers<[1], [0], [0], [1], [0, 0, 1, 1], [], []>} : vector<8x32xf32>, vector<32x128xf32>, vector<8x128xf32> -> vector<8x128xf32>
    %844 = arith.addf %840, %843 : vector<8x128xf32>
    %845 = vector.extract_strided_slice %842 {offsets = [0, 0], sizes = [8, 96], strides = [1, 1]} : vector<8x128xf32> to vector<8x96xf32>
    %846 = arith.negf %845 : vector<8x96xf32>
    %847 = math.exp %846 : vector<8x96xf32>
    %cst_167 = arith.constant 1.000000e+00 : f32
    %848 = vector.broadcast %cst_167 : f32 to vector<8x96xf32>
    %849 = arith.addf %848, %847 : vector<8x96xf32>
    %850 = arith.divf %848, %849 : vector<8x96xf32>
    %851 = vector.extract_strided_slice %844 {offsets = [0, 0], sizes = [8, 96], strides = [1, 1]} : vector<8x128xf32> to vector<8x96xf32>
    %852 = arith.negf %851 : vector<8x96xf32>
    %853 = math.exp %852 : vector<8x96xf32>
    %cst_168 = arith.constant 1.000000e+00 : f32
    %854 = vector.broadcast %cst_168 : f32 to vector<8x96xf32>
    %855 = arith.addf %854, %853 : vector<8x96xf32>
    %856 = arith.divf %854, %855 : vector<8x96xf32>
    %857 = vector.extract_strided_slice %842 {offsets = [0, 96], sizes = [8, 32], strides = [1, 1]} : vector<8x128xf32> to vector<8x32xf32>
    %858 = math.tanh %857 : vector<8x32xf32>
    %859 = vector.extract_strided_slice %844 {offsets = [0, 96], sizes = [8, 32], strides = [1, 1]} : vector<8x128xf32> to vector<8x32xf32>
    %860 = math.tanh %859 : vector<8x32xf32>
    %861 = vector.extract_strided_slice %850 {offsets = [0, 32], sizes = [8, 32], strides = [1, 1]} : vector<8x96xf32> to vector<8x32xf32>
    %862 = arith.mulf %861, %808 : vector<8x32xf32>
    %863 = vector.extract_strided_slice %850 {offsets = [0, 0], sizes = [8, 32], strides = [1, 1]} : vector<8x96xf32> to vector<8x32xf32>
    %864 = arith.mulf %863, %858 : vector<8x32xf32>
    %865 = arith.addf %862, %864 : vector<8x32xf32>
    %866 = vector.extract_strided_slice %856 {offsets = [0, 32], sizes = [8, 32], strides = [1, 1]} : vector<8x96xf32> to vector<8x32xf32>
    %867 = arith.mulf %866, %813 : vector<8x32xf32>
    %868 = vector.extract_strided_slice %856 {offsets = [0, 0], sizes = [8, 32], strides = [1, 1]} : vector<8x96xf32> to vector<8x32xf32>
    %869 = arith.mulf %868, %860 : vector<8x32xf32>
    %870 = arith.addf %867, %869 : vector<8x32xf32>
    %871 = vector.extract_strided_slice %850 {offsets = [0, 64], sizes = [8, 32], strides = [1, 1]} : vector<8x96xf32> to vector<8x32xf32>
    %872 = math.tanh %865 : vector<8x32xf32>
    %873 = arith.mulf %871, %872 : vector<8x32xf32>
    %874 = vector.extract_strided_slice %856 {offsets = [0, 64], sizes = [8, 32], strides = [1, 1]} : vector<8x96xf32> to vector<8x32xf32>
    %875 = math.tanh %870 : vector<8x32xf32>
    %876 = arith.mulf %874, %875 : vector<8x32xf32>
    %877 = vector.broadcast %c6_i32_159 : i32 to vector<8x1xi32>
    %878 = arith.cmpi sgt, %485, %877 : vector<8x1xi32>
    %879 = arith.extui %878 : vector<8x1xi1> to vector<8x1xi32>
    %880 = arith.sitofp %879 : vector<8x1xi32> to vector<8x1xf32>
    %881 = vector.broadcast %834 : i32 to vector<8x1xi32>
    %882 = arith.cmpi sgt, %485, %881 : vector<8x1xi32>
    %883 = arith.extui %882 : vector<8x1xi1> to vector<8x1xi32>
    %884 = arith.sitofp %883 : vector<8x1xi32> to vector<8x1xf32>
    %885 = vector.broadcast %880 : vector<8x1xf32> to vector<8x32xf32>
    %886 = arith.mulf %873, %885 : vector<8x32xf32>
    %887 = arith.addf %830, %886 : vector<8x32xf32>
    %888 = vector.broadcast %884 : vector<8x1xf32> to vector<8x32xf32>
    %889 = arith.mulf %876, %888 : vector<8x32xf32>
    %890 = arith.addf %833, %889 : vector<8x32xf32>
    %c7_i32_169 = arith.constant 7 : i32
    %c11_i32_170 = arith.constant 11 : i32
    %891 = arith.subi %c11_i32_170, %c7_i32_169 : i32
    %892 = arith.index_cast %c7_i32_169 : i32 to index
    %c0_171 = arith.constant 0 : index
    %c0_172 = arith.constant 0 : index
    %893 = vector.load %arg9[%892, %c0_171, %c0_172] : memref<12x8x256xf32, #tpu.memory_space<vmem>>, vector<1x8x128xf32>
    %894 = vector.shape_cast %893 : vector<1x8x128xf32> to vector<8x128xf32>
    %895 = arith.index_cast %891 : i32 to index
    %c0_173 = arith.constant 0 : index
    %c128_174 = arith.constant 128 : index
    %896 = vector.load %arg9[%895, %c0_173, %c128_174] : memref<12x8x256xf32, #tpu.memory_space<vmem>>, vector<1x8x128xf32>
    %897 = vector.shape_cast %896 : vector<1x8x128xf32> to vector<8x128xf32>
    %cst_175 = arith.constant dense<0.000000e+00> : vector<8x128xf32>
    %898 = tpu.matmul %873, %3, %cst_175 {dimension_numbers = #tpu.dot_dimension_numbers<[1], [0], [0], [1], [0, 0, 1, 1], [], []>} : vector<8x32xf32>, vector<32x128xf32>, vector<8x128xf32> -> vector<8x128xf32>
    %899 = arith.addf %894, %898 : vector<8x128xf32>
    %cst_176 = arith.constant dense<0.000000e+00> : vector<8x128xf32>
    %900 = tpu.matmul %876, %5, %cst_176 {dimension_numbers = #tpu.dot_dimension_numbers<[1], [0], [0], [1], [0, 0, 1, 1], [], []>} : vector<8x32xf32>, vector<32x128xf32>, vector<8x128xf32> -> vector<8x128xf32>
    %901 = arith.addf %897, %900 : vector<8x128xf32>
    %902 = vector.extract_strided_slice %899 {offsets = [0, 0], sizes = [8, 96], strides = [1, 1]} : vector<8x128xf32> to vector<8x96xf32>
    %903 = arith.negf %902 : vector<8x96xf32>
    %904 = math.exp %903 : vector<8x96xf32>
    %cst_177 = arith.constant 1.000000e+00 : f32
    %905 = vector.broadcast %cst_177 : f32 to vector<8x96xf32>
    %906 = arith.addf %905, %904 : vector<8x96xf32>
    %907 = arith.divf %905, %906 : vector<8x96xf32>
    %908 = vector.extract_strided_slice %901 {offsets = [0, 0], sizes = [8, 96], strides = [1, 1]} : vector<8x128xf32> to vector<8x96xf32>
    %909 = arith.negf %908 : vector<8x96xf32>
    %910 = math.exp %909 : vector<8x96xf32>
    %cst_178 = arith.constant 1.000000e+00 : f32
    %911 = vector.broadcast %cst_178 : f32 to vector<8x96xf32>
    %912 = arith.addf %911, %910 : vector<8x96xf32>
    %913 = arith.divf %911, %912 : vector<8x96xf32>
    %914 = vector.extract_strided_slice %899 {offsets = [0, 96], sizes = [8, 32], strides = [1, 1]} : vector<8x128xf32> to vector<8x32xf32>
    %915 = math.tanh %914 : vector<8x32xf32>
    %916 = vector.extract_strided_slice %901 {offsets = [0, 96], sizes = [8, 32], strides = [1, 1]} : vector<8x128xf32> to vector<8x32xf32>
    %917 = math.tanh %916 : vector<8x32xf32>
    %918 = vector.extract_strided_slice %907 {offsets = [0, 32], sizes = [8, 32], strides = [1, 1]} : vector<8x96xf32> to vector<8x32xf32>
    %919 = arith.mulf %918, %865 : vector<8x32xf32>
    %920 = vector.extract_strided_slice %907 {offsets = [0, 0], sizes = [8, 32], strides = [1, 1]} : vector<8x96xf32> to vector<8x32xf32>
    %921 = arith.mulf %920, %915 : vector<8x32xf32>
    %922 = arith.addf %919, %921 : vector<8x32xf32>
    %923 = vector.extract_strided_slice %913 {offsets = [0, 32], sizes = [8, 32], strides = [1, 1]} : vector<8x96xf32> to vector<8x32xf32>
    %924 = arith.mulf %923, %870 : vector<8x32xf32>
    %925 = vector.extract_strided_slice %913 {offsets = [0, 0], sizes = [8, 32], strides = [1, 1]} : vector<8x96xf32> to vector<8x32xf32>
    %926 = arith.mulf %925, %917 : vector<8x32xf32>
    %927 = arith.addf %924, %926 : vector<8x32xf32>
    %928 = vector.extract_strided_slice %907 {offsets = [0, 64], sizes = [8, 32], strides = [1, 1]} : vector<8x96xf32> to vector<8x32xf32>
    %929 = math.tanh %922 : vector<8x32xf32>
    %930 = arith.mulf %928, %929 : vector<8x32xf32>
    %931 = vector.extract_strided_slice %913 {offsets = [0, 64], sizes = [8, 32], strides = [1, 1]} : vector<8x96xf32> to vector<8x32xf32>
    %932 = math.tanh %927 : vector<8x32xf32>
    %933 = arith.mulf %931, %932 : vector<8x32xf32>
    %934 = vector.broadcast %c7_i32_169 : i32 to vector<8x1xi32>
    %935 = arith.cmpi sgt, %485, %934 : vector<8x1xi32>
    %936 = arith.extui %935 : vector<8x1xi1> to vector<8x1xi32>
    %937 = arith.sitofp %936 : vector<8x1xi32> to vector<8x1xf32>
    %938 = vector.broadcast %891 : i32 to vector<8x1xi32>
    %939 = arith.cmpi sgt, %485, %938 : vector<8x1xi32>
    %940 = arith.extui %939 : vector<8x1xi1> to vector<8x1xi32>
    %941 = arith.sitofp %940 : vector<8x1xi32> to vector<8x1xf32>
    %942 = vector.broadcast %937 : vector<8x1xf32> to vector<8x32xf32>
    %943 = arith.mulf %930, %942 : vector<8x32xf32>
    %944 = arith.addf %887, %943 : vector<8x32xf32>
    %945 = vector.broadcast %941 : vector<8x1xf32> to vector<8x32xf32>
    %946 = arith.mulf %933, %945 : vector<8x32xf32>
    %947 = arith.addf %890, %946 : vector<8x32xf32>
    %c8_i32_179 = arith.constant 8 : i32
    %c11_i32_180 = arith.constant 11 : i32
    %948 = arith.subi %c11_i32_180, %c8_i32_179 : i32
    %949 = arith.index_cast %c8_i32_179 : i32 to index
    %c0_181 = arith.constant 0 : index
    %c0_182 = arith.constant 0 : index
    %950 = vector.load %arg9[%949, %c0_181, %c0_182] : memref<12x8x256xf32, #tpu.memory_space<vmem>>, vector<1x8x128xf32>
    %951 = vector.shape_cast %950 : vector<1x8x128xf32> to vector<8x128xf32>
    %952 = arith.index_cast %948 : i32 to index
    %c0_183 = arith.constant 0 : index
    %c128_184 = arith.constant 128 : index
    %953 = vector.load %arg9[%952, %c0_183, %c128_184] : memref<12x8x256xf32, #tpu.memory_space<vmem>>, vector<1x8x128xf32>
    %954 = vector.shape_cast %953 : vector<1x8x128xf32> to vector<8x128xf32>
    %cst_185 = arith.constant dense<0.000000e+00> : vector<8x128xf32>
    %955 = tpu.matmul %930, %3, %cst_185 {dimension_numbers = #tpu.dot_dimension_numbers<[1], [0], [0], [1], [0, 0, 1, 1], [], []>} : vector<8x32xf32>, vector<32x128xf32>, vector<8x128xf32> -> vector<8x128xf32>
    %956 = arith.addf %951, %955 : vector<8x128xf32>
    %cst_186 = arith.constant dense<0.000000e+00> : vector<8x128xf32>
    %957 = tpu.matmul %933, %5, %cst_186 {dimension_numbers = #tpu.dot_dimension_numbers<[1], [0], [0], [1], [0, 0, 1, 1], [], []>} : vector<8x32xf32>, vector<32x128xf32>, vector<8x128xf32> -> vector<8x128xf32>
    %958 = arith.addf %954, %957 : vector<8x128xf32>
    %959 = vector.extract_strided_slice %956 {offsets = [0, 0], sizes = [8, 96], strides = [1, 1]} : vector<8x128xf32> to vector<8x96xf32>
    %960 = arith.negf %959 : vector<8x96xf32>
    %961 = math.exp %960 : vector<8x96xf32>
    %cst_187 = arith.constant 1.000000e+00 : f32
    %962 = vector.broadcast %cst_187 : f32 to vector<8x96xf32>
    %963 = arith.addf %962, %961 : vector<8x96xf32>
    %964 = arith.divf %962, %963 : vector<8x96xf32>
    %965 = vector.extract_strided_slice %958 {offsets = [0, 0], sizes = [8, 96], strides = [1, 1]} : vector<8x128xf32> to vector<8x96xf32>
    %966 = arith.negf %965 : vector<8x96xf32>
    %967 = math.exp %966 : vector<8x96xf32>
    %cst_188 = arith.constant 1.000000e+00 : f32
    %968 = vector.broadcast %cst_188 : f32 to vector<8x96xf32>
    %969 = arith.addf %968, %967 : vector<8x96xf32>
    %970 = arith.divf %968, %969 : vector<8x96xf32>
    %971 = vector.extract_strided_slice %956 {offsets = [0, 96], sizes = [8, 32], strides = [1, 1]} : vector<8x128xf32> to vector<8x32xf32>
    %972 = math.tanh %971 : vector<8x32xf32>
    %973 = vector.extract_strided_slice %958 {offsets = [0, 96], sizes = [8, 32], strides = [1, 1]} : vector<8x128xf32> to vector<8x32xf32>
    %974 = math.tanh %973 : vector<8x32xf32>
    %975 = vector.extract_strided_slice %964 {offsets = [0, 32], sizes = [8, 32], strides = [1, 1]} : vector<8x96xf32> to vector<8x32xf32>
    %976 = arith.mulf %975, %922 : vector<8x32xf32>
    %977 = vector.extract_strided_slice %964 {offsets = [0, 0], sizes = [8, 32], strides = [1, 1]} : vector<8x96xf32> to vector<8x32xf32>
    %978 = arith.mulf %977, %972 : vector<8x32xf32>
    %979 = arith.addf %976, %978 : vector<8x32xf32>
    %980 = vector.extract_strided_slice %970 {offsets = [0, 32], sizes = [8, 32], strides = [1, 1]} : vector<8x96xf32> to vector<8x32xf32>
    %981 = arith.mulf %980, %927 : vector<8x32xf32>
    %982 = vector.extract_strided_slice %970 {offsets = [0, 0], sizes = [8, 32], strides = [1, 1]} : vector<8x96xf32> to vector<8x32xf32>
    %983 = arith.mulf %982, %974 : vector<8x32xf32>
    %984 = arith.addf %981, %983 : vector<8x32xf32>
    %985 = vector.extract_strided_slice %964 {offsets = [0, 64], sizes = [8, 32], strides = [1, 1]} : vector<8x96xf32> to vector<8x32xf32>
    %986 = math.tanh %979 : vector<8x32xf32>
    %987 = arith.mulf %985, %986 : vector<8x32xf32>
    %988 = vector.extract_strided_slice %970 {offsets = [0, 64], sizes = [8, 32], strides = [1, 1]} : vector<8x96xf32> to vector<8x32xf32>
    %989 = math.tanh %984 : vector<8x32xf32>
    %990 = arith.mulf %988, %989 : vector<8x32xf32>
    %991 = vector.broadcast %c8_i32_179 : i32 to vector<8x1xi32>
    %992 = arith.cmpi sgt, %485, %991 : vector<8x1xi32>
    %993 = arith.extui %992 : vector<8x1xi1> to vector<8x1xi32>
    %994 = arith.sitofp %993 : vector<8x1xi32> to vector<8x1xf32>
    %995 = vector.broadcast %948 : i32 to vector<8x1xi32>
    %996 = arith.cmpi sgt, %485, %995 : vector<8x1xi32>
    %997 = arith.extui %996 : vector<8x1xi1> to vector<8x1xi32>
    %998 = arith.sitofp %997 : vector<8x1xi32> to vector<8x1xf32>
    %999 = vector.broadcast %994 : vector<8x1xf32> to vector<8x32xf32>
    %1000 = arith.mulf %987, %999 : vector<8x32xf32>
    %1001 = arith.addf %944, %1000 : vector<8x32xf32>
    %1002 = vector.broadcast %998 : vector<8x1xf32> to vector<8x32xf32>
    %1003 = arith.mulf %990, %1002 : vector<8x32xf32>
    %1004 = arith.addf %947, %1003 : vector<8x32xf32>
    %c9_i32 = arith.constant 9 : i32
    %c11_i32_189 = arith.constant 11 : i32
    %1005 = arith.subi %c11_i32_189, %c9_i32 : i32
    %1006 = arith.index_cast %c9_i32 : i32 to index
    %c0_190 = arith.constant 0 : index
    %c0_191 = arith.constant 0 : index
    %1007 = vector.load %arg9[%1006, %c0_190, %c0_191] : memref<12x8x256xf32, #tpu.memory_space<vmem>>, vector<1x8x128xf32>
    %1008 = vector.shape_cast %1007 : vector<1x8x128xf32> to vector<8x128xf32>
    %1009 = arith.index_cast %1005 : i32 to index
    %c0_192 = arith.constant 0 : index
    %c128_193 = arith.constant 128 : index
    %1010 = vector.load %arg9[%1009, %c0_192, %c128_193] : memref<12x8x256xf32, #tpu.memory_space<vmem>>, vector<1x8x128xf32>
    %1011 = vector.shape_cast %1010 : vector<1x8x128xf32> to vector<8x128xf32>
    %cst_194 = arith.constant dense<0.000000e+00> : vector<8x128xf32>
    %1012 = tpu.matmul %987, %3, %cst_194 {dimension_numbers = #tpu.dot_dimension_numbers<[1], [0], [0], [1], [0, 0, 1, 1], [], []>} : vector<8x32xf32>, vector<32x128xf32>, vector<8x128xf32> -> vector<8x128xf32>
    %1013 = arith.addf %1008, %1012 : vector<8x128xf32>
    %cst_195 = arith.constant dense<0.000000e+00> : vector<8x128xf32>
    %1014 = tpu.matmul %990, %5, %cst_195 {dimension_numbers = #tpu.dot_dimension_numbers<[1], [0], [0], [1], [0, 0, 1, 1], [], []>} : vector<8x32xf32>, vector<32x128xf32>, vector<8x128xf32> -> vector<8x128xf32>
    %1015 = arith.addf %1011, %1014 : vector<8x128xf32>
    %1016 = vector.extract_strided_slice %1013 {offsets = [0, 0], sizes = [8, 96], strides = [1, 1]} : vector<8x128xf32> to vector<8x96xf32>
    %1017 = arith.negf %1016 : vector<8x96xf32>
    %1018 = math.exp %1017 : vector<8x96xf32>
    %cst_196 = arith.constant 1.000000e+00 : f32
    %1019 = vector.broadcast %cst_196 : f32 to vector<8x96xf32>
    %1020 = arith.addf %1019, %1018 : vector<8x96xf32>
    %1021 = arith.divf %1019, %1020 : vector<8x96xf32>
    %1022 = vector.extract_strided_slice %1015 {offsets = [0, 0], sizes = [8, 96], strides = [1, 1]} : vector<8x128xf32> to vector<8x96xf32>
    %1023 = arith.negf %1022 : vector<8x96xf32>
    %1024 = math.exp %1023 : vector<8x96xf32>
    %cst_197 = arith.constant 1.000000e+00 : f32
    %1025 = vector.broadcast %cst_197 : f32 to vector<8x96xf32>
    %1026 = arith.addf %1025, %1024 : vector<8x96xf32>
    %1027 = arith.divf %1025, %1026 : vector<8x96xf32>
    %1028 = vector.extract_strided_slice %1013 {offsets = [0, 96], sizes = [8, 32], strides = [1, 1]} : vector<8x128xf32> to vector<8x32xf32>
    %1029 = math.tanh %1028 : vector<8x32xf32>
    %1030 = vector.extract_strided_slice %1015 {offsets = [0, 96], sizes = [8, 32], strides = [1, 1]} : vector<8x128xf32> to vector<8x32xf32>
    %1031 = math.tanh %1030 : vector<8x32xf32>
    %1032 = vector.extract_strided_slice %1021 {offsets = [0, 32], sizes = [8, 32], strides = [1, 1]} : vector<8x96xf32> to vector<8x32xf32>
    %1033 = arith.mulf %1032, %979 : vector<8x32xf32>
    %1034 = vector.extract_strided_slice %1021 {offsets = [0, 0], sizes = [8, 32], strides = [1, 1]} : vector<8x96xf32> to vector<8x32xf32>
    %1035 = arith.mulf %1034, %1029 : vector<8x32xf32>
    %1036 = arith.addf %1033, %1035 : vector<8x32xf32>
    %1037 = vector.extract_strided_slice %1027 {offsets = [0, 32], sizes = [8, 32], strides = [1, 1]} : vector<8x96xf32> to vector<8x32xf32>
    %1038 = arith.mulf %1037, %984 : vector<8x32xf32>
    %1039 = vector.extract_strided_slice %1027 {offsets = [0, 0], sizes = [8, 32], strides = [1, 1]} : vector<8x96xf32> to vector<8x32xf32>
    %1040 = arith.mulf %1039, %1031 : vector<8x32xf32>
    %1041 = arith.addf %1038, %1040 : vector<8x32xf32>
    %1042 = vector.extract_strided_slice %1021 {offsets = [0, 64], sizes = [8, 32], strides = [1, 1]} : vector<8x96xf32> to vector<8x32xf32>
    %1043 = math.tanh %1036 : vector<8x32xf32>
    %1044 = arith.mulf %1042, %1043 : vector<8x32xf32>
    %1045 = vector.extract_strided_slice %1027 {offsets = [0, 64], sizes = [8, 32], strides = [1, 1]} : vector<8x96xf32> to vector<8x32xf32>
    %1046 = math.tanh %1041 : vector<8x32xf32>
    %1047 = arith.mulf %1045, %1046 : vector<8x32xf32>
    %1048 = vector.broadcast %c9_i32 : i32 to vector<8x1xi32>
    %1049 = arith.cmpi sgt, %485, %1048 : vector<8x1xi32>
    %1050 = arith.extui %1049 : vector<8x1xi1> to vector<8x1xi32>
    %1051 = arith.sitofp %1050 : vector<8x1xi32> to vector<8x1xf32>
    %1052 = vector.broadcast %1005 : i32 to vector<8x1xi32>
    %1053 = arith.cmpi sgt, %485, %1052 : vector<8x1xi32>
    %1054 = arith.extui %1053 : vector<8x1xi1> to vector<8x1xi32>
    %1055 = arith.sitofp %1054 : vector<8x1xi32> to vector<8x1xf32>
    %1056 = vector.broadcast %1051 : vector<8x1xf32> to vector<8x32xf32>
    %1057 = arith.mulf %1044, %1056 : vector<8x32xf32>
    %1058 = arith.addf %1001, %1057 : vector<8x32xf32>
    %1059 = vector.broadcast %1055 : vector<8x1xf32> to vector<8x32xf32>
    %1060 = arith.mulf %1047, %1059 : vector<8x32xf32>
    %1061 = arith.addf %1004, %1060 : vector<8x32xf32>
    %c10_i32 = arith.constant 10 : i32
    %c11_i32_198 = arith.constant 11 : i32
    %1062 = arith.subi %c11_i32_198, %c10_i32 : i32
    %1063 = arith.index_cast %c10_i32 : i32 to index
    %c0_199 = arith.constant 0 : index
    %c0_200 = arith.constant 0 : index
    %1064 = vector.load %arg9[%1063, %c0_199, %c0_200] : memref<12x8x256xf32, #tpu.memory_space<vmem>>, vector<1x8x128xf32>
    %1065 = vector.shape_cast %1064 : vector<1x8x128xf32> to vector<8x128xf32>
    %1066 = arith.index_cast %1062 : i32 to index
    %c0_201 = arith.constant 0 : index
    %c128_202 = arith.constant 128 : index
    %1067 = vector.load %arg9[%1066, %c0_201, %c128_202] : memref<12x8x256xf32, #tpu.memory_space<vmem>>, vector<1x8x128xf32>
    %1068 = vector.shape_cast %1067 : vector<1x8x128xf32> to vector<8x128xf32>
    %cst_203 = arith.constant dense<0.000000e+00> : vector<8x128xf32>
    %1069 = tpu.matmul %1044, %3, %cst_203 {dimension_numbers = #tpu.dot_dimension_numbers<[1], [0], [0], [1], [0, 0, 1, 1], [], []>} : vector<8x32xf32>, vector<32x128xf32>, vector<8x128xf32> -> vector<8x128xf32>
    %1070 = arith.addf %1065, %1069 : vector<8x128xf32>
    %cst_204 = arith.constant dense<0.000000e+00> : vector<8x128xf32>
    %1071 = tpu.matmul %1047, %5, %cst_204 {dimension_numbers = #tpu.dot_dimension_numbers<[1], [0], [0], [1], [0, 0, 1, 1], [], []>} : vector<8x32xf32>, vector<32x128xf32>, vector<8x128xf32> -> vector<8x128xf32>
    %1072 = arith.addf %1068, %1071 : vector<8x128xf32>
    %1073 = vector.extract_strided_slice %1070 {offsets = [0, 0], sizes = [8, 96], strides = [1, 1]} : vector<8x128xf32> to vector<8x96xf32>
    %1074 = arith.negf %1073 : vector<8x96xf32>
    %1075 = math.exp %1074 : vector<8x96xf32>
    %cst_205 = arith.constant 1.000000e+00 : f32
    %1076 = vector.broadcast %cst_205 : f32 to vector<8x96xf32>
    %1077 = arith.addf %1076, %1075 : vector<8x96xf32>
    %1078 = arith.divf %1076, %1077 : vector<8x96xf32>
    %1079 = vector.extract_strided_slice %1072 {offsets = [0, 0], sizes = [8, 96], strides = [1, 1]} : vector<8x128xf32> to vector<8x96xf32>
    %1080 = arith.negf %1079 : vector<8x96xf32>
    %1081 = math.exp %1080 : vector<8x96xf32>
    %cst_206 = arith.constant 1.000000e+00 : f32
    %1082 = vector.broadcast %cst_206 : f32 to vector<8x96xf32>
    %1083 = arith.addf %1082, %1081 : vector<8x96xf32>
    %1084 = arith.divf %1082, %1083 : vector<8x96xf32>
    %1085 = vector.extract_strided_slice %1070 {offsets = [0, 96], sizes = [8, 32], strides = [1, 1]} : vector<8x128xf32> to vector<8x32xf32>
    %1086 = math.tanh %1085 : vector<8x32xf32>
    %1087 = vector.extract_strided_slice %1072 {offsets = [0, 96], sizes = [8, 32], strides = [1, 1]} : vector<8x128xf32> to vector<8x32xf32>
    %1088 = math.tanh %1087 : vector<8x32xf32>
    %1089 = vector.extract_strided_slice %1078 {offsets = [0, 32], sizes = [8, 32], strides = [1, 1]} : vector<8x96xf32> to vector<8x32xf32>
    %1090 = arith.mulf %1089, %1036 : vector<8x32xf32>
    %1091 = vector.extract_strided_slice %1078 {offsets = [0, 0], sizes = [8, 32], strides = [1, 1]} : vector<8x96xf32> to vector<8x32xf32>
    %1092 = arith.mulf %1091, %1086 : vector<8x32xf32>
    %1093 = arith.addf %1090, %1092 : vector<8x32xf32>
    %1094 = vector.extract_strided_slice %1084 {offsets = [0, 32], sizes = [8, 32], strides = [1, 1]} : vector<8x96xf32> to vector<8x32xf32>
    %1095 = arith.mulf %1094, %1041 : vector<8x32xf32>
    %1096 = vector.extract_strided_slice %1084 {offsets = [0, 0], sizes = [8, 32], strides = [1, 1]} : vector<8x96xf32> to vector<8x32xf32>
    %1097 = arith.mulf %1096, %1088 : vector<8x32xf32>
    %1098 = arith.addf %1095, %1097 : vector<8x32xf32>
    %1099 = vector.extract_strided_slice %1078 {offsets = [0, 64], sizes = [8, 32], strides = [1, 1]} : vector<8x96xf32> to vector<8x32xf32>
    %1100 = math.tanh %1093 : vector<8x32xf32>
    %1101 = arith.mulf %1099, %1100 : vector<8x32xf32>
    %1102 = vector.extract_strided_slice %1084 {offsets = [0, 64], sizes = [8, 32], strides = [1, 1]} : vector<8x96xf32> to vector<8x32xf32>
    %1103 = math.tanh %1098 : vector<8x32xf32>
    %1104 = arith.mulf %1102, %1103 : vector<8x32xf32>
    %1105 = vector.broadcast %c10_i32 : i32 to vector<8x1xi32>
    %1106 = arith.cmpi sgt, %485, %1105 : vector<8x1xi32>
    %1107 = arith.extui %1106 : vector<8x1xi1> to vector<8x1xi32>
    %1108 = arith.sitofp %1107 : vector<8x1xi32> to vector<8x1xf32>
    %1109 = vector.broadcast %1062 : i32 to vector<8x1xi32>
    %1110 = arith.cmpi sgt, %485, %1109 : vector<8x1xi32>
    %1111 = arith.extui %1110 : vector<8x1xi1> to vector<8x1xi32>
    %1112 = arith.sitofp %1111 : vector<8x1xi32> to vector<8x1xf32>
    %1113 = vector.broadcast %1108 : vector<8x1xf32> to vector<8x32xf32>
    %1114 = arith.mulf %1101, %1113 : vector<8x32xf32>
    %1115 = arith.addf %1058, %1114 : vector<8x32xf32>
    %1116 = vector.broadcast %1112 : vector<8x1xf32> to vector<8x32xf32>
    %1117 = arith.mulf %1104, %1116 : vector<8x32xf32>
    %1118 = arith.addf %1061, %1117 : vector<8x32xf32>
    %c11_i32_207 = arith.constant 11 : i32
    %c11_i32_208 = arith.constant 11 : i32
    %1119 = arith.subi %c11_i32_208, %c11_i32_207 : i32
    %1120 = arith.index_cast %c11_i32_207 : i32 to index
    %c0_209 = arith.constant 0 : index
    %c0_210 = arith.constant 0 : index
    %1121 = vector.load %arg9[%1120, %c0_209, %c0_210] : memref<12x8x256xf32, #tpu.memory_space<vmem>>, vector<1x8x128xf32>
    %1122 = vector.shape_cast %1121 : vector<1x8x128xf32> to vector<8x128xf32>
    %1123 = arith.index_cast %1119 : i32 to index
    %c0_211 = arith.constant 0 : index
    %c128_212 = arith.constant 128 : index
    %1124 = vector.load %arg9[%1123, %c0_211, %c128_212] : memref<12x8x256xf32, #tpu.memory_space<vmem>>, vector<1x8x128xf32>
    %1125 = vector.shape_cast %1124 : vector<1x8x128xf32> to vector<8x128xf32>
    %cst_213 = arith.constant dense<0.000000e+00> : vector<8x128xf32>
    %1126 = tpu.matmul %1101, %3, %cst_213 {dimension_numbers = #tpu.dot_dimension_numbers<[1], [0], [0], [1], [0, 0, 1, 1], [], []>} : vector<8x32xf32>, vector<32x128xf32>, vector<8x128xf32> -> vector<8x128xf32>
    %1127 = arith.addf %1122, %1126 : vector<8x128xf32>
    %cst_214 = arith.constant dense<0.000000e+00> : vector<8x128xf32>
    %1128 = tpu.matmul %1104, %5, %cst_214 {dimension_numbers = #tpu.dot_dimension_numbers<[1], [0], [0], [1], [0, 0, 1, 1], [], []>} : vector<8x32xf32>, vector<32x128xf32>, vector<8x128xf32> -> vector<8x128xf32>
    %1129 = arith.addf %1125, %1128 : vector<8x128xf32>
    %1130 = vector.extract_strided_slice %1127 {offsets = [0, 0], sizes = [8, 96], strides = [1, 1]} : vector<8x128xf32> to vector<8x96xf32>
    %1131 = arith.negf %1130 : vector<8x96xf32>
    %1132 = math.exp %1131 : vector<8x96xf32>
    %cst_215 = arith.constant 1.000000e+00 : f32
    %1133 = vector.broadcast %cst_215 : f32 to vector<8x96xf32>
    %1134 = arith.addf %1133, %1132 : vector<8x96xf32>
    %1135 = arith.divf %1133, %1134 : vector<8x96xf32>
    %1136 = vector.extract_strided_slice %1129 {offsets = [0, 0], sizes = [8, 96], strides = [1, 1]} : vector<8x128xf32> to vector<8x96xf32>
    %1137 = arith.negf %1136 : vector<8x96xf32>
    %1138 = math.exp %1137 : vector<8x96xf32>
    %cst_216 = arith.constant 1.000000e+00 : f32
    %1139 = vector.broadcast %cst_216 : f32 to vector<8x96xf32>
    %1140 = arith.addf %1139, %1138 : vector<8x96xf32>
    %1141 = arith.divf %1139, %1140 : vector<8x96xf32>
    %1142 = vector.extract_strided_slice %1127 {offsets = [0, 96], sizes = [8, 32], strides = [1, 1]} : vector<8x128xf32> to vector<8x32xf32>
    %1143 = math.tanh %1142 : vector<8x32xf32>
    %1144 = vector.extract_strided_slice %1129 {offsets = [0, 96], sizes = [8, 32], strides = [1, 1]} : vector<8x128xf32> to vector<8x32xf32>
    %1145 = math.tanh %1144 : vector<8x32xf32>
    %1146 = vector.extract_strided_slice %1135 {offsets = [0, 32], sizes = [8, 32], strides = [1, 1]} : vector<8x96xf32> to vector<8x32xf32>
    %1147 = arith.mulf %1146, %1093 : vector<8x32xf32>
    %1148 = vector.extract_strided_slice %1135 {offsets = [0, 0], sizes = [8, 32], strides = [1, 1]} : vector<8x96xf32> to vector<8x32xf32>
    %1149 = arith.mulf %1148, %1143 : vector<8x32xf32>
    %1150 = arith.addf %1147, %1149 : vector<8x32xf32>
    %1151 = vector.extract_strided_slice %1141 {offsets = [0, 32], sizes = [8, 32], strides = [1, 1]} : vector<8x96xf32> to vector<8x32xf32>
    %1152 = arith.mulf %1151, %1098 : vector<8x32xf32>
    %1153 = vector.extract_strided_slice %1141 {offsets = [0, 0], sizes = [8, 32], strides = [1, 1]} : vector<8x96xf32> to vector<8x32xf32>
    %1154 = arith.mulf %1153, %1145 : vector<8x32xf32>
    %1155 = arith.addf %1152, %1154 : vector<8x32xf32>
    %1156 = vector.extract_strided_slice %1135 {offsets = [0, 64], sizes = [8, 32], strides = [1, 1]} : vector<8x96xf32> to vector<8x32xf32>
    %1157 = math.tanh %1150 : vector<8x32xf32>
    %1158 = arith.mulf %1156, %1157 : vector<8x32xf32>
    %1159 = vector.extract_strided_slice %1141 {offsets = [0, 64], sizes = [8, 32], strides = [1, 1]} : vector<8x96xf32> to vector<8x32xf32>
    %1160 = math.tanh %1155 : vector<8x32xf32>
    %1161 = arith.mulf %1159, %1160 : vector<8x32xf32>
    %1162 = vector.broadcast %c11_i32_207 : i32 to vector<8x1xi32>
    %1163 = arith.cmpi sgt, %485, %1162 : vector<8x1xi32>
    %1164 = arith.extui %1163 : vector<8x1xi1> to vector<8x1xi32>
    %1165 = arith.sitofp %1164 : vector<8x1xi32> to vector<8x1xf32>
    %1166 = vector.broadcast %1119 : i32 to vector<8x1xi32>
    %1167 = arith.cmpi sgt, %485, %1166 : vector<8x1xi32>
    %1168 = arith.extui %1167 : vector<8x1xi1> to vector<8x1xi32>
    %1169 = arith.sitofp %1168 : vector<8x1xi32> to vector<8x1xf32>
    %1170 = vector.broadcast %1165 : vector<8x1xf32> to vector<8x32xf32>
    %1171 = arith.mulf %1158, %1170 : vector<8x32xf32>
    %1172 = arith.addf %1115, %1171 : vector<8x32xf32>
    %1173 = vector.broadcast %1169 : vector<8x1xf32> to vector<8x32xf32>
    %1174 = arith.mulf %1161, %1173 : vector<8x32xf32>
    %1175 = arith.addf %1118, %1174 : vector<8x32xf32>
    %c12_i32 = arith.constant 12 : i32
    %1176 = vector.broadcast %490 : vector<8x1xf32> to vector<8x32xf32>
    %1177 = arith.mulf %1172, %1176 : vector<8x32xf32>
    %1178 = vector.broadcast %490 : vector<8x1xf32> to vector<8x32xf32>
    %1179 = arith.mulf %1175, %1178 : vector<8x32xf32>
    %1180 = arith.addf %476, %1177 : vector<8x32xf32>
    %cst_217 = arith.constant 5.000000e-01 : f32
    %1181 = vector.broadcast %cst_217 : f32 to vector<8x32xf32>
    %1182 = arith.mulf %1181, %1180 : vector<8x32xf32>
    %c0_218 = arith.constant 0 : index
    %c0_219 = arith.constant 0 : index
    %1183 = vector.load %arg8[%c0_218, %c0_219] : memref<8x64xf32, #tpu.memory_space<vmem>>, vector<8x32xf32>
    tpu.vector_store %arg8[%c0_218, %c0_219], %1182 {strides = array<i32>} : memref<8x64xf32, #tpu.memory_space<vmem>>, vector<8x32xf32>,
    %1184 = arith.addf %478, %1179 : vector<8x32xf32>
    %cst_220 = arith.constant 5.000000e-01 : f32
    %1185 = vector.broadcast %cst_220 : f32 to vector<8x32xf32>
    %1186 = arith.mulf %1185, %1184 : vector<8x32xf32>
    %c0_221 = arith.constant 0 : index
    %c32 = arith.constant 32 : index
    %1187 = vector.load %arg8[%c0_221, %c32] : memref<8x64xf32, #tpu.memory_space<vmem>>, vector<8x32xf32>
    tpu.vector_store %arg8[%c0_221, %c32], %1186 {strides = array<i32>} : memref<8x64xf32, #tpu.memory_space<vmem>>, vector<8x32xf32>,
    return
  }
  func.func @transform_0(%arg0: i32) -> (i32, i32) {
    %c0_i32 = arith.constant 0 : i32
    %c0_i32_0 = arith.constant 0 : i32
    %c0_i32_1 = arith.constant 0 : i32
    return %c0_i32, %c0_i32_0 : i32, i32
  }
  func.func @transform_1(%arg0: i32) -> (i32, i32) {
    %c0_i32 = arith.constant 0 : i32
    %c0_i32_0 = arith.constant 0 : i32
    %c0_i32_1 = arith.constant 0 : i32
    return %c0_i32, %c0_i32_0 : i32, i32
  }
  func.func @transform_2(%arg0: i32) -> (i32, i32) {
    %c0_i32 = arith.constant 0 : i32
    %c0_i32_0 = arith.constant 0 : i32
    %c0_i32_1 = arith.constant 0 : i32
    return %c0_i32, %c0_i32_0 : i32, i32
  }
  func.func @transform_3(%arg0: i32) -> (i32, i32) {
    %c0_i32 = arith.constant 0 : i32
    %c0_i32_0 = arith.constant 0 : i32
    %c0_i32_1 = arith.constant 0 : i32
    return %c0_i32, %c0_i32_0 : i32, i32
  }
  func.func @transform_4(%arg0: i32) -> (i32, i32) {
    %c0_i32 = arith.constant 0 : i32
    %c0_i32_0 = arith.constant 0 : i32
    %c0_i32_1 = arith.constant 0 : i32
    return %c0_i32, %c0_i32_0 : i32, i32
  }
  func.func @transform_5(%arg0: i32) -> (i32, i32, i32) {
    %c0_i32 = arith.constant 0 : i32
    %c0_i32_0 = arith.constant 0 : i32
    %c0_i32_1 = arith.constant 0 : i32
    %c0_i32_2 = arith.constant 0 : i32
    return %c0_i32, %c0_i32_0, %c0_i32_1 : i32, i32, i32
  }
  func.func @transform_6(%arg0: i32) -> (i32, i32) {
    %c0_i32 = arith.constant 0 : i32
    %c0_i32_0 = arith.constant 0 : i32
    %c0_i32_1 = arith.constant 0 : i32
    return %c0_i32, %c0_i32_0 : i32, i32
  }
  func.func @transform_7(%arg0: i32) -> (i32, i32) {
    %c0_i32 = arith.constant 0 : i32
    %c0_i32_0 = arith.constant 0 : i32
    %c0_i32_1 = arith.constant 0 : i32
    return %c0_i32, %c0_i32_0 : i32, i32
  }
}

</mosaic_0001>

<bundles_post_ra>
// kernel: tpu_custom_call.1
= control target key start
LH: loop header
LB: loop body
LE: loop exit
PB: predicated region body
PF: predicated region fallthrough
CT: control target
= control target key end

     0   :  { %vm58_vm0 = vcmask 261120   ;;  %s4949_s0 = inlined_call_operand.vmem [shape: f32[64,32], index: 0, kind: input, shape index: {}]   ;;  %s4950_s1 = inlined_call_operand.vmem [shape: f32[96,32], index: 1, kind: input, shape index: {}]   ;;  %s4951_s2 = inlined_call_operand.vmem [shape: s32[8,1], index: 2, kind: input, shape index: {}]   ;;  %s4952_s3 = inlined_call_operand.vmem [shape: s32[8,1], index: 3, kind: input, shape index: {}]   ;;  %s4953_s4 = inlined_call_operand.vmem [shape: f32[32,256], index: 4, kind: input, shape index: {}]   ;;  %s4954_s5 = inlined_call_operand.vmem [shape: f32[2,32,128], index: 5, kind: input, shape index: {}]   ;;  %s4955_s6 = inlined_call_operand.vmem [shape: f32[1,256], index: 6, kind: input, shape index: {}]   ;;  %s4956_s7 = inlined_call_operand.hbm [shape: f32[8,64], index: 7, kind: output, shape index: {}]  }
   0x1   :  { %v33_v0 = vld [vmem:[%s4953_s4 + $0x30] sm:$0xff]  ;;  %v34_v1 = vld [vmem:[%s4953_s4 + $0x38] sm:$0xff]  ;;  %v31_v3 = vld [vmem:[%s4953_s4 + $0x20] sm:$0xff] }
   0x2   :  { %v3814_v2 = vld [vmem:[%s4954_s5 + $0x18] sm:$0xff]  ;;  %95 = vmatpush.msra.mxu0 %v33_v0  ;;  %136 = vmatpush.msra.mxu1 %v34_v1  ;;  %v32_v4 = vld [vmem:[%s4953_s4 + $0x28] sm:$0xff]  ;;  %v3825_v5 = vld [vmem:[%s4954_s5 + $0x10] sm:$0xff] }
   0x3   :  { %217 = vmatpush.msra.mxu2 %v3814_v2  ;;  %v29_v6 = vld [vmem:[%s4953_s4 + $0x10] sm:$0xff]  ;;  %v30_v7 = vld [vmem:[%s4953_s4 + $0x18] sm:$0xff]  ;;  %v3837_v8 = vld [vmem:[%s4954_s5 + $0x8] sm:$0xff] }
   0x4   :  { %96 = vmatpush.msra.mxu0 %v31_v3  ;;  %137 = vmatpush.msra.mxu1 %v32_v4  ;;  %v27_v9 = vld [vmem:[%s4953_s4] sm:$0xff]  ;;  %v28_v10 = vld [vmem:[%s4953_s4 + $0x8] sm:$0xff] }
   0x5   :  { %218 = vmatpush.msra.mxu2 %v3825_v5  ;;  %v3849_v11 = vld [vmem:[%s4954_s5] sm:$0xff] }
   0x6   :  { %97 = vmatpush.msra.mxu0 %v29_v6  ;;  %138 = vmatpush.msra.mxu1 %v30_v7  ;;  %v45_v12 = vld [vmem:[%s4949_s0] sm:$0xff] }
   0x7   :  { %12 = vsyncpa [#allocation4], 0  ;;  %219 = vmatpush.msra.mxu2 %v3837_v8  ;;  %v4957_v13 = vmov 0.0   ;;  %v46_v14 = vld [vmem:[%s4949_s0 + $0x8] sm:$0xff]  ;;  %v3870_v15 = vld [vmem:[%s4954_s5 + $0x38] sm:$0xff]  ;;  %s3760_s21 = smov 32  }
   0x8   :  { %98 = vmatpush.msra.mxu0 %v27_v9  ;;  %139 = vmatpush.msra.mxu1 %v28_v10  ;;  %v3875_v16 = vld [vmem:[%s4954_s5 + $0x30] sm:$0xff]  ;;  %v3891_v18 = vld [vmem:[%s4954_s5 + $0x28] sm:$0xff]  ;;  %v3896_v19 = vld [vmem:[%s4954_s5 + $0x20] sm:$0xff]  ;;  %s3185_s12 = sshll.u32 %s4956_s7, 4  ;;  %s3186_s12 = int_to_ptr.hbm [resolvable:$true] %s3185_s12 }
   0x9   :  { %220 = vmatpush.msra.mxu2 %v3849_v11  ;;  %3198 = vmatmul.msk.f32.vlgmr.msra.gmra.mxu0 %vm58_vm0, %v45_v12  ;;  %v47_v17 = vld [vmem:[%s4949_s0 + $0x10] sm:$0xff]  ;;  %v48_v20 = vld [vmem:[%s4949_s0 + $0x18] sm:$0xff]  ;;  %v49_v21 = vld [vmem:[%s4949_s0 + $0x20] sm:$0xff] }
   0xa   :  { %3206 = vmatmul.msk.f32.vlgmr.msra.gmra.mxu1 %vm58_vm0, %v45_v12  ;;  %221 = vmatmul.f32.vlgmr.msra.gmra.mxu2 %v4957_v13  ;;  %v50_v22 = vld [vmem:[%s4949_s0 + $0x28] sm:$0xff]  ;;  %v51_v23 = vld [vmem:[%s4949_s0 + $0x30] sm:$0xff]  ;;  %v52_v24 = vld [vmem:[%s4949_s0 + $0x38] sm:$0xff] }
   0xb   :  { %1386 = vmatpush.msrb.mxu0 %v33_v0  ;;  %1439 = vmatpush.msrb.mxu1 %v34_v1  ;;  %v1326_v25 = vld [vmem:[%s4950_s1] sm:$0xff]  ;;  %v1327_v26 = vld [vmem:[%s4950_s1 + $0x8] sm:$0xff]  ;;  %v1328_v27 = vld [vmem:[%s4950_s1 + $0x10] sm:$0xff] }
   0xc   :  { %362 = vmatpush.msrb.mxu2 %v3814_v2  ;;  %238 = vmatpush.msra.mxu3 %v3870_v15  ;;  %v1329_v28 = vld [vmem:[%s4950_s1 + $0x18] sm:$0xff]  ;;  %v1330_v29 = vld [vmem:[%s4950_s1 + $0x20] sm:$0xff]  ;;  %v1331_v30 = vld [vmem:[%s4950_s1 + $0x28] sm:$0xff] }
   0xd   :  { %1387 = vmatpush.msrb.mxu0 %v31_v3  ;;  %1440 = vmatpush.msrb.mxu1 %v32_v4  ;;  %v1332_v31 = vld [vmem:[%s4950_s1 + $0x30] sm:$0xff]  ;;  %v1333_v32 = vld [vmem:[%s4950_s1 + $0x38] sm:$0xff]  ;;  %v35_v33 = vld [vmem:[%s4955_s6] sm:$0x3] }
   0xe   :  { %363 = vmatpush.msrb.mxu2 %v3825_v5  ;;  %239 = vmatpush.msra.mxu3 %v3875_v16  ;;  %v3978_v34 = vperm.slane %v35_v33, 0  ;;  %v1334_v36 = vld [vmem:[%s4950_s1 + $0x40] sm:$0xff]  ;;  %v1335_v42 = vld [vmem:[%s4950_s1 + $0x48] sm:$0xff]  ;;  %v1336_v45 = vld [vmem:[%s4950_s1 + $0x50] sm:$0xff]  ;;  %v4019_v51 = vperm.slane %v35_v33, 1 }
   0xf   :  { %1388 = vmatpush.msrb.mxu0 %v29_v6  ;;  %1441 = vmatpush.msrb.mxu1 %v30_v7  ;;  %v1337_v47 = vld [vmem:[%s4950_s1 + $0x58] sm:$0xff]  ;;  %s3761_s1 = smov 64  }
  0x10   :  { %364 = vmatpush.msrb.mxu2 %v3837_v8  ;;  %240 = vmatpush.msra.mxu3 %v3891_v18 }
  0x11   :  { %3199 = vmatmul.msk.f32.gmra.mxu0 %vm58_vm0, %v46_v14  ;;  %1442 = vmatpush.msrb.mxu1 %v28_v10 }
  0x12   :  { %3207 = vmatmul.msk.f32.gmra.mxu1 %vm58_vm0, %v46_v14  ;;  %1389 = vmatpush.msrb.mxu0 %v27_v9 }
  0x13   :  { %365 = vmatpush.msrb.mxu2 %v3849_v11  ;;  %241 = vmatpush.msra.mxu3 %v3896_v19 }
  0x14   :  { %242 = vmatmul.f32.vlgmr.msra.gmra.mxu3 %v4957_v13 }
  0x15   :  { %512 = vmatpush.msra.mxu2 %v3814_v2  ;;  %388 = vmatpush.msrb.mxu3 %v3870_v15 }
  0x17   :  { %513 = vmatpush.msra.mxu2 %v3825_v5  ;;  %389 = vmatpush.msrb.mxu3 %v3875_v16 }
  0x19   :  { %514 = vmatpush.msra.mxu2 %v3837_v8  ;;  %3200 = vmatmul.msk.f32.gmra.mxu0 %vm58_vm0, %v47_v17 }
  0x1a   :  { %3208 = vmatmul.msk.f32.gmra.mxu1 %vm58_vm0, %v47_v17  ;;  %390 = vmatpush.msrb.mxu3 %v3891_v18 }
  0x1b   :  { %515 = vmatpush.msra.mxu2 %v3849_v11 }
  0x1c   :  { %391 = vmatpush.msrb.mxu3 %v3896_v19 }
  0x1e   :  { %538 = vmatpush.msra.mxu3 %v3870_v15 }
  0x20   :  { %539 = vmatpush.msra.mxu3 %v3875_v16 }
  0x21   :  { %3201 = vmatmul.msk.f32.gmra.mxu0 %vm58_vm0, %v48_v20 }
  0x22   :  { %3209 = vmatmul.msk.f32.gmra.mxu1 %vm58_vm0, %v48_v20  ;;  %540 = vmatpush.msra.mxu3 %v3891_v18 }
  0x24   :  { %541 = vmatpush.msra.mxu3 %v3896_v19 }
  0x29   :  { %3202 = vmatmul.msk.f32.gmra.mxu0 %vm58_vm0, %v49_v21 }
  0x2a   :  { %3210 = vmatmul.msk.f32.gmra.mxu1 %vm58_vm0, %v49_v21 }
  0x31   :  { %3203 = vmatmul.msk.f32.gmra.mxu0 %vm58_vm0, %v50_v22 }
  0x32   :  { %3211 = vmatmul.msk.f32.gmra.mxu1 %vm58_vm0, %v50_v22 }
  0x39   :  { %3204 = vmatmul.msk.f32.gmra.mxu0 %vm58_vm0, %v51_v23 }
  0x3a   :  { %3212 = vmatmul.msk.f32.gmra.mxu1 %vm58_vm0, %v51_v23 }
  0x41   :  { %3205 = vmatmul.msk.f32.gmra.mxu0 %vm58_vm0, %v52_v24 }
  0x42   :  { %3213 = vmatmul.msk.f32.gmra.mxu1 %vm58_vm0, %v52_v24 }
  0x49   :  { %3252 = vmatmul.msk.f32.vlgmr.msrb.gmra.mxu0 %vm58_vm0, %v1326_v25 }
  0x4a   :  { %3264 = vmatmul.msk.f32.vlgmr.msrb.gmra.mxu1 %vm58_vm0, %v1326_v25 }
  0x51   :  { %3253 = vmatmul.msk.f32.gmra.mxu0 %vm58_vm0, %v1327_v26 }
  0x52   :  { %3265 = vmatmul.msk.f32.gmra.mxu1 %vm58_vm0, %v1327_v26 }
  0x59   :  { %3254 = vmatmul.msk.f32.gmra.mxu0 %vm58_vm0, %v1328_v27 }
  0x5a   :  { %3266 = vmatmul.msk.f32.gmra.mxu1 %vm58_vm0, %v1328_v27 }
  0x61   :  { %3255 = vmatmul.msk.f32.gmra.mxu0 %vm58_vm0, %v1329_v28 }
  0x62   :  { %3267 = vmatmul.msk.f32.gmra.mxu1 %vm58_vm0, %v1329_v28 }
  0x69   :  { %3256 = vmatmul.msk.f32.gmra.mxu0 %vm58_vm0, %v1330_v29 }
  0x6a   :  { %3268 = vmatmul.msk.f32.gmra.mxu1 %vm58_vm0, %v1330_v29 }
  0x71   :  { %3257 = vmatmul.msk.f32.gmra.mxu0 %vm58_vm0, %v1331_v30 }
  0x72   :  { %3269 = vmatmul.msk.f32.gmra.mxu1 %vm58_vm0, %v1331_v30 }
  0x79   :  { %3258 = vmatmul.msk.f32.gmra.mxu0 %vm58_vm0, %v1332_v31 }
  0x7a   :  { %3270 = vmatmul.msk.f32.gmra.mxu1 %vm58_vm0, %v1332_v31 }
  0x81   :  { %3259 = vmatmul.msk.f32.gmra.mxu0 %vm58_vm0, %v1333_v32 }
  0x82   :  { %3271 = vmatmul.msk.f32.gmra.mxu1 %vm58_vm0, %v1333_v32 }
  0x86   :  { %v100_v37 = vpop.f32.mrf.mxu0 }
  0x87   :  { %v3980_v35 = vpop.f32.mrf.mxu1  ;;  %v101_v38 = vadd.f32 %v100_v37, %v3978_v34 }
  0x89   :  { %3260 = vmatmul.msk.f32.gmra.mxu0 %vm58_vm0, %v1334_v36 }
  0x8a   :  { %3272 = vmatmul.msk.f32.gmra.mxu1 %vm58_vm0, %v1334_v36 }
  0x8d   :  { %v3988_v39 = vpop.f32.mrf.mxu2 }
  0x8e   :  { %v225_v40 = vadd.f32 %v3988_v39, %v101_v38 }
  0x8f   :  { %v3991_v41 = vpop.f32.mrf.mxu1 }
  0x90   :  { %3393 = vtanh.f32 %v225_v40  ;;  %v3214_v57 = vmul.f32 -1.442695, %v225_v40 }
  0x91   :  { %3261 = vmatmul.msk.f32.gmra.mxu0 %vm58_vm0, %v1335_v42 }
  0x92   :  { %3273 = vmatmul.msk.f32.gmra.mxu1 %vm58_vm0, %v1335_v42 }
  0x96   :  { %v3394_v43 = vpop.eup %3393 }
  0x97   :  { %v3998_v44 = vpop.f32.mrf.mxu1  ;;  %289 = vrot.lane.b32.xlu0 %v3394_v43, %s3760_s21  ;;  %v4021_v53 = vpop.f32.mrf.mxu3 }
  0x99   :  { %3262 = vmatmul.msk.f32.gmra.mxu0 %vm58_vm0, %v1336_v45 }
  0x9a   :  { %3274 = vmatmul.msk.f32.gmra.mxu1 %vm58_vm0, %v1336_v45 }
  0x9f   :  { %v4006_v46 = vpop.f32.mrf.mxu1 }
  0xa1   :  { %3263 = vmatmul.msk.f32.gmra.mxu0 %vm58_vm0, %v1337_v47 }
  0xa2   :  { %3275 = vmatmul.msk.f32.gmra.mxu1 %vm58_vm0, %v1337_v47 }
  0xa7   :  { %v4013_v48 = vpop.f32.mrf.mxu1 }
  0xaf   :  { %v4015_v49 = vpop.f32.mrf.mxu1 }
  0xb7   :  { %v4017_v50 = vpop.f32.mrf.mxu1 }
  0xbf   :  { %v162_v52 = vpop.f32.mrf.mxu1 }
  0xc0   :  { %v163_v54 = vadd.f32 %v162_v52, %v4019_v51 }
  0xc2   :  { %v246_v55 = vadd.f32 %v4021_v53, %v163_v54 }
  0xc4   :  { %3395 = vtanh.f32 %v246_v55  ;;  %v3215_v12 = vmul.f32 -1.442695, %v246_v55 }
  0xc5   :  { %3397 = vpow2.f32 %v3214_v57  ;;  %v103_v57 = vpop.f32.mrf.mxu0 }
  0xca   :  { %v3396_v56 = vpop.eup %3395 }
  0xcb   :  { %300 = vrot.lane.b32.xlu0 %v3396_v56, %s3760_s21  ;;  %v3398_v58 = vpop.eup %3397 }
  0xcc   :  { %v250_v59 = vadd.f32 1.0, %v3398_v58  ;;  %v104_v58 = vadd.f32 %v103_v57, %v3978_v34 }
  0xce   :  { %3399 = vrcp.f32 %v250_v59  ;;  %vm256_vm1 = vweird.f32 %v250_v59  ;;  %v262_v0 = vand.u32 2147483648, %v250_v59  ;;  %v260_v3 = vand.u32 2147483647, %v250_v59 }
  0xcf   :  { %3401 = vpow2.f32 %v3215_v12 }
  0xd0   :  { %v263_v4 = vor.u32 1.1754944e-38, %v262_v0  ;;  %vm261_vm4 = vcmp.eq.f32.partialorder %v260_v3, 8.507059e+37 }
  0xd4   :  { %v3400_v60 = vpop.eup %3399 }
  0xd5   :  { %v252_v61 = vmul.f32 %v3400_v60, %v250_v59  ;;  %vm257_vm2 = vweird.f32 %v3400_v60  ;;  %v3402_v14 = vpop.eup %3401 }
  0xd6   :  { %vm258_vm3 = vmor %vm256_vm1, %vm257_vm2  ;;  %v269_v17 = vadd.f32 1.0, %v3402_v14 }
  0xd7   :  { %v253_v62 = vsub.f32 1.0, %v252_v61 }
  0xd8   :  { %3403 = vrcp.f32 %v269_v17  ;;  %v281_v25 = vand.u32 2147483648, %v269_v17  ;;  %vm275_vm6 = vweird.f32 %v269_v17  ;;  %v279_v26 = vand.u32 2147483647, %v269_v17 }
  0xd9   :  { %v254_v63 = vmul.f32 %v3400_v60, %v253_v62  ;;  %v160_v62 = vadd.f32 %v4017_v50, %v4019_v51 }
  0xda   :  { %v282_v28 = vor.u32 1.1754944e-38, %v281_v25  ;;  %vm280_vm8 = vcmp.eq.f32.partialorder %v279_v26, 8.507059e+37 }
  0xdb   :  { %v255_v1 = vadd.f32 %v3400_v60, %v254_v63 }
  0xdd   :  { %v259_v6 = vsel %vm258_vm3, %v3400_v60, %v255_v1 }
  0xde   :  { %v264_v9 = vsel %vm261_vm4, %v263_v4, %v259_v6  ;;  %v3404_v20 = vpop.eup %3403 }
  0xdf   :  { %v271_v21 = vmul.f32 %v3404_v20, %v269_v17  ;;  %vm276_vm5 = vweird.f32 %v3404_v20  ;;  %v287_v32 = vmul.f32 0.0, %v264_v9 }
  0xe0   :  { %vm277_vm7 = vmor %vm275_vm6, %vm276_vm5 }
  0xe1   :  { %v272_v22 = vsub.f32 1.0, %v271_v21 }
  0xe3   :  { %v273_v23 = vmul.f32 %v3404_v20, %v272_v22 }
  0xe5   :  { %v274_v24 = vadd.f32 %v3404_v20, %v273_v23 }
  0xe7   :  { %v278_v27 = vsel %vm277_vm7, %v3404_v20, %v274_v24 }
  0xe8   :  { %v283_v29 = vsel %vm280_vm8, %v282_v28, %v278_v27 }
  0xe9   :  { %v298_v38 = vmul.f32 0.0, %v283_v29 }
 0x109   :  { %v290_v7 = vpop.permute.xlu0 %289 }
 0x10a   :  { %v292_v10 = vmul.f32 %v290_v7, %v264_v9 }
 0x10c   :  { %294 = vrot.lane.b32.xlu1 %v292_v10, %s3760_s21 }
 0x13d   :  { %v301_v30 = vpop.permute.xlu0 %300 }
 0x13e   :  { %v303_v31 = vmul.f32 %v301_v30, %v283_v29 }
 0x140   :  { %305 = vrot.lane.b32.xlu1 %v303_v31, %s3760_s21 }
 0x17e   :  { %v295_v33 = vpop.permute.xlu1 %294 }
 0x17f   :  { %v4028_v36 = vadd.f32 %v295_v33, %v287_v32 }
 0x181   :  { %3405 = vtanh.f32 %v4028_v36 }
 0x187   :  { %v3406_v37 = vpop.eup %3405 }
 0x188   :  { %311 = vrot.lane.b32.xlu2 %v3406_v37, %s3760_s21 }
 0x1b2   :  { %v306_v40 = vpop.permute.xlu1 %305 }
 0x1b3   :  { %v4032_v42 = vadd.f32 %v306_v40, %v298_v38 }
 0x1b5   :  { %3407 = vtanh.f32 %v4032_v42 }
 0x1bb   :  { %v3408_v43 = vpop.eup %3407 }
 0x1bc   :  { %317 = vrot.lane.b32.xlu2 %v3408_v43, %s3760_s21 }
 0x1e2   :  { %v312_v45 = vpop.permute.xlu2 %311 }
 0x1e3   :  { %v4036_v47 = vmul.f32 %v312_v45, %v264_v9 }
 0x1e5   :  { %346 = vrot.lane.b32.xlu0 %v4036_v47, %s3761_s1 }
 0x216   :  { %v318_v52 = vpop.permute.xlu2 %317 }
 0x217   :  { %v4040_v54 = vmul.f32 %v318_v52, %v283_v29 }
 0x219   :  { %372 = vrot.lane.b32.xlu1 %v4040_v54, %s3761_s1 }
 0x257   :  { %v347_v55 = vpop.permute.xlu0 %346 }
 0x258   :  { %3218 = vmatmul.msk.f32.vlgmr.msrb.gmra.mxu2 %vm58_vm0, %v347_v55 }
 0x259   :  { %662 = vmatpush.msrb.mxu2 %v3814_v2 }
 0x25b   :  { %663 = vmatpush.msrb.mxu2 %v3825_v5 }
 0x25d   :  { %664 = vmatpush.msrb.mxu2 %v3837_v8 }
 0x25f   :  { %665 = vmatpush.msrb.mxu2 %v3849_v11 }
 0x28b   :  { %v373_v56 = vpop.permute.xlu1 %372 }
 0x28c   :  { %3219 = vmatmul.msk.f32.vlgmr.msrb.gmra.mxu3 %vm58_vm0, %v373_v56 }
 0x28d   :  { %688 = vmatpush.msrb.mxu3 %v3870_v15 }
 0x28f   :  { %689 = vmatpush.msrb.mxu3 %v3875_v16 }
 0x291   :  { %690 = vmatpush.msrb.mxu3 %v3891_v18 }
 0x293   :  { %691 = vmatpush.msrb.mxu3 %v3896_v19 }
 0x2db   :  { %v367_v59 = vpop.f32.mrf.mxu2 }
 0x2dc   :  { %v370_v60 = vadd.f32 %v367_v59, %v104_v58 }
 0x2de   :  { %3409 = vtanh.f32 %v370_v60  ;;  %v3220_v1 = vmul.f32 -1.442695, %v370_v60 }
 0x2e4   :  { %v3410_v61 = vpop.eup %3409 }
 0x2e5   :  { %439 = vrot.lane.b32.xlu2 %v3410_v61, %s3760_s21 }
 0x30f   :  { %v393_v63 = vpop.f32.mrf.mxu3 }
 0x310   :  { %v396_v0 = vadd.f32 %v393_v63, %v160_v62 }
 0x312   :  { %3411 = vtanh.f32 %v396_v0  ;;  %v3221_v25 = vmul.f32 -1.442695, %v396_v0 }
 0x313   :  { %3413 = vpow2.f32 %v3220_v1 }
 0x318   :  { %v3412_v3 = vpop.eup %3411 }
 0x319   :  { %450 = vrot.lane.b32.xlu0 %v3412_v3, %s3760_s21  ;;  %v3414_v4 = vpop.eup %3413 }
 0x31a   :  { %v400_v6 = vadd.f32 1.0, %v3414_v4  ;;  %v106_v4 = vpop.f32.mrf.mxu0 }
 0x31c   :  { %3415 = vrcp.f32 %v400_v6  ;;  %v412_v17 = vand.u32 2147483648, %v400_v6  ;;  %vm406_vm10 = vweird.f32 %v400_v6  ;;  %v410_v50 = vand.u32 2147483647, %v400_v6 }
 0x31d   :  { %3417 = vpow2.f32 %v3221_v25 }
 0x31e   :  { %v413_v21 = vor.u32 1.1754944e-38, %v412_v17  ;;  %vm411_vm12 = vcmp.eq.f32.partialorder %v410_v50, 8.507059e+37 }
 0x322   :  { %v3416_v7 = vpop.eup %3415 }
 0x323   :  { %v402_v9 = vmul.f32 %v3416_v7, %v400_v6  ;;  %vm407_vm9 = vweird.f32 %v3416_v7  ;;  %v3418_v26 = vpop.eup %3417  ;;  %v107_v6 = vadd.f32 %v106_v4, %v3978_v34 }
 0x324   :  { %vm408_vm11 = vmor %vm406_vm10, %vm407_vm9  ;;  %v419_v27 = vadd.f32 1.0, %v3418_v26 }
 0x325   :  { %v403_v10 = vsub.f32 1.0, %v402_v9 }
 0x326   :  { %3419 = vrcp.f32 %v419_v27  ;;  %v431_v33 = vand.u32 2147483648, %v419_v27  ;;  %vm425_vm14 = vweird.f32 %v419_v27  ;;  %v429_v37 = vand.u32 2147483647, %v419_v27 }
 0x327   :  { %v404_v12 = vmul.f32 %v3416_v7, %v403_v10 }
 0x328   :  { %v432_v40 = vor.u32 1.1754944e-38, %v431_v33  ;;  %vm430_vm1 = vcmp.eq.f32.partialorder %v429_v37, 8.507059e+37 }
 0x329   :  { %v405_v14 = vadd.f32 %v3416_v7, %v404_v12  ;;  %v157_v12 = vadd.f32 %v4015_v49, %v4019_v51 }
 0x32b   :  { %v409_v20 = vsel %vm408_vm11, %v3416_v7, %v405_v14 }
 0x32c   :  { %v414_v22 = vsel %vm411_vm12, %v413_v21, %v409_v20  ;;  %v3420_v28 = vpop.eup %3419 }
 0x32d   :  { %v421_v29 = vmul.f32 %v3420_v28, %v419_v27  ;;  %vm426_vm13 = vweird.f32 %v3420_v28  ;;  %v437_v55 = vmul.f32 %v414_v22, %v4028_v36 }
 0x32e   :  { %vm427_vm15 = vmor %vm425_vm14, %vm426_vm13 }
 0x32f   :  { %v422_v30 = vsub.f32 1.0, %v421_v29 }
 0x331   :  { %v423_v31 = vmul.f32 %v3420_v28, %v422_v30 }
 0x333   :  { %v424_v32 = vadd.f32 %v3420_v28, %v423_v31 }
 0x335   :  { %v428_v38 = vsel %vm427_vm15, %v3420_v28, %v424_v32 }
 0x336   :  { %v433_v45 = vsel %vm430_vm1, %v432_v40, %v428_v38 }
 0x337   :  { %v448_v59 = vmul.f32 %v433_v45, %v4032_v42 }
 0x33f   :  { %v440_v23 = vpop.permute.xlu2 %439 }
 0x340   :  { %v442_v24 = vmul.f32 %v440_v23, %v414_v22 }
 0x342   :  { %444 = vrot.lane.b32.xlu1 %v442_v24, %s3760_s21 }
 0x38b   :  { %v451_v43 = vpop.permute.xlu0 %450 }
 0x38c   :  { %v453_v52 = vmul.f32 %v451_v43, %v433_v45 }
 0x38e   :  { %455 = vrot.lane.b32.xlu2 %v453_v52, %s3760_s21 }
 0x3b4   :  { %v445_v56 = vpop.permute.xlu1 %444 }
 0x3b5   :  { %v4062_v57 = vadd.f32 %v445_v56, %v437_v55 }
 0x3b7   :  { %3421 = vtanh.f32 %v4062_v57 }
 0x3bd   :  { %v3422_v58 = vpop.eup %3421 }
 0x3be   :  { %461 = vrot.lane.b32.xlu0 %v3422_v58, %s3760_s21 }
 0x3e8   :  { %v456_v60 = vpop.permute.xlu2 %455 }
 0x3e9   :  { %v4067_v61 = vadd.f32 %v456_v60, %v448_v59 }
 0x3eb   :  { %3423 = vtanh.f32 %v4067_v61 }
 0x3f1   :  { %v3424_v62 = vpop.eup %3423 }
 0x3f2   :  { %467 = vrot.lane.b32.xlu1 %v3424_v62, %s3760_s21 }
 0x430   :  { %v462_v63 = vpop.permute.xlu0 %461 }
 0x431   :  { %v4071_v36 = vmul.f32 %v462_v63, %v414_v22 }
 0x433   :  { %496 = vrot.lane.b32.xlu2 %v4071_v36, %s3761_s1 }
 0x464   :  { %v468_v0 = vpop.permute.xlu1 %467 }
 0x465   :  { %v4075_v1 = vmul.f32 %v468_v0, %v433_v45 }
 0x467   :  { %522 = vrot.lane.b32.xlu0 %v4075_v1, %s3761_s1 }
 0x48d   :  { %v497_v42 = vpop.permute.xlu2 %496 }
 0x48e   :  { %3224 = vmatmul.msk.f32.vlgmr.msra.gmra.mxu2 %vm58_vm0, %v497_v42 }
 0x48f   :  { %810 = vmatpush.msra.mxu2 %v3814_v2 }
 0x491   :  { %811 = vmatpush.msra.mxu2 %v3825_v5 }
 0x493   :  { %812 = vmatpush.msra.mxu2 %v3837_v8 }
 0x495   :  { %813 = vmatpush.msra.mxu2 %v3849_v11 }
 0x4d9   :  { %v523_v3 = vpop.permute.xlu0 %522 }
 0x4da   :  { %3225 = vmatmul.msk.f32.vlgmr.msra.gmra.mxu3 %vm58_vm0, %v523_v3 }
 0x4db   :  { %836 = vmatpush.msra.mxu3 %v3870_v15 }
 0x4dd   :  { %837 = vmatpush.msra.mxu3 %v3875_v16 }
 0x4df   :  { %838 = vmatpush.msra.mxu3 %v3891_v18 }
 0x4e1   :  { %839 = vmatpush.msra.mxu3 %v3896_v19 }
 0x511   :  { %v517_v7 = vpop.f32.mrf.mxu2 }
 0x512   :  { %v520_v9 = vadd.f32 %v517_v7, %v107_v6 }
 0x514   :  { %3425 = vtanh.f32 %v520_v9  ;;  %v3226_v50 = vmul.f32 -1.442695, %v520_v9 }
 0x51a   :  { %v3426_v10 = vpop.eup %3425 }
 0x51b   :  { %589 = vrot.lane.b32.xlu1 %v3426_v10, %s3760_s21 }
 0x55d   :  { %v543_v14 = vpop.f32.mrf.mxu3 }
 0x55e   :  { %v546_v17 = vadd.f32 %v543_v14, %v157_v12 }
 0x560   :  { %3427 = vtanh.f32 %v546_v17  ;;  %v3227_v37 = vmul.f32 -1.442695, %v546_v17 }
 0x561   :  { %3429 = vpow2.f32 %v3226_v50 }
 0x566   :  { %v3428_v20 = vpop.eup %3427 }
 0x567   :  { %600 = vrot.lane.b32.xlu2 %v3428_v20, %s3760_s21  ;;  %v3430_v21 = vpop.eup %3429 }
 0x568   :  { %v550_v22 = vadd.f32 1.0, %v3430_v21 }
 0x56a   :  { %3431 = vrcp.f32 %v550_v22  ;;  %v562_v28 = vand.u32 2147483648, %v550_v22  ;;  %vm556_vm3 = vweird.f32 %v550_v22  ;;  %v560_v49 = vand.u32 2147483647, %v550_v22 }
 0x56b   :  { %3433 = vpow2.f32 %v3227_v37 }
 0x56c   :  { %v563_v30 = vor.u32 1.1754944e-38, %v562_v28  ;;  %vm561_vm5 = vcmp.eq.f32.partialorder %v560_v49, 8.507059e+37 }
 0x570   :  { %v3432_v23 = vpop.eup %3431 }
 0x571   :  { %v552_v24 = vmul.f32 %v3432_v23, %v550_v22  ;;  %vm557_vm2 = vweird.f32 %v3432_v23  ;;  %v3434_v38 = vpop.eup %3433  ;;  %v109_v22 = vpop.f32.mrf.mxu0 }
 0x572   :  { %vm558_vm4 = vmor %vm556_vm3, %vm557_vm2  ;;  %v569_v40 = vadd.f32 1.0, %v3434_v38 }
 0x573   :  { %v553_v25 = vsub.f32 1.0, %v552_v24 }
 0x574   :  { %3435 = vrcp.f32 %v569_v40  ;;  %v581_v58 = vand.u32 2147483648, %v569_v40  ;;  %vm575_vm7 = vweird.f32 %v569_v40  ;;  %v579_v59 = vand.u32 2147483647, %v569_v40 }
 0x575   :  { %v554_v26 = vmul.f32 %v3432_v23, %v553_v25 }
 0x576   :  { %v582_v62 = vor.u32 1.1754944e-38, %v581_v58  ;;  %vm580_vm9 = vcmp.eq.f32.partialorder %v579_v59, 8.507059e+37 }
 0x577   :  { %v555_v27 = vadd.f32 %v3432_v23, %v554_v26 }
 0x579   :  { %v559_v29 = vsel %vm558_vm4, %v3432_v23, %v555_v27  ;;  %v110_v23 = vadd.f32 %v109_v22, %v3978_v34  ;;  %v154_v27 = vadd.f32 %v4013_v48, %v4019_v51 }
 0x57a   :  { %v564_v32 = vsel %vm561_vm5, %v563_v30, %v559_v29  ;;  %v3436_v43 = vpop.eup %3435 }
 0x57b   :  { %v571_v45 = vmul.f32 %v3436_v43, %v569_v40  ;;  %vm576_vm6 = vweird.f32 %v3436_v43  ;;  %v587_v3 = vmul.f32 %v564_v32, %v4062_v57 }
 0x57c   :  { %vm577_vm8 = vmor %vm575_vm7, %vm576_vm6 }
 0x57d   :  { %v572_v52 = vsub.f32 1.0, %v571_v45 }
 0x57f   :  { %v573_v55 = vmul.f32 %v3436_v43, %v572_v52 }
 0x581   :  { %v574_v56 = vadd.f32 %v3436_v43, %v573_v55 }
 0x583   :  { %v578_v60 = vsel %vm577_vm8, %v3436_v43, %v574_v56 }
 0x584   :  { %v583_v63 = vsel %vm580_vm9, %v582_v62, %v578_v60 }
 0x585   :  { %v598_v9 = vmul.f32 %v583_v63, %v4067_v61 }
 0x58d   :  { %v590_v31 = vpop.permute.xlu1 %589 }
 0x58e   :  { %v592_v33 = vmul.f32 %v590_v31, %v564_v32 }
 0x590   :  { %594 = vrot.lane.b32.xlu0 %v592_v33, %s3760_s21 }
 0x5c1   :  { %v601_v0 = vpop.permute.xlu2 %600 }
 0x5c2   :  { %v603_v42 = vmul.f32 %v601_v0, %v583_v63 }
 0x5c4   :  { %605 = vrot.lane.b32.xlu1 %v603_v42, %s3760_s21 }
 0x602   :  { %v595_v4 = vpop.permute.xlu0 %594 }
 0x603   :  { %v4097_v6 = vadd.f32 %v595_v4, %v587_v3 }
 0x605   :  { %3437 = vtanh.f32 %v4097_v6 }
 0x60b   :  { %v3438_v7 = vpop.eup %3437 }
 0x60c   :  { %611 = vrot.lane.b32.xlu2 %v3438_v7, %s3760_s21 }
 0x636   :  { %v606_v10 = vpop.permute.xlu1 %605 }
 0x637   :  { %v4102_v12 = vadd.f32 %v606_v10, %v598_v9 }
 0x639   :  { %3439 = vtanh.f32 %v4102_v12 }
 0x63f   :  { %v3440_v14 = vpop.eup %3439 }
 0x640   :  { %617 = vrot.lane.b32.xlu0 %v3440_v14, %s3760_s21 }
 0x666   :  { %v612_v17 = vpop.permute.xlu2 %611 }
 0x667   :  { %v4106_v57 = vmul.f32 %v612_v17, %v564_v32 }
 0x669   :  { %646 = vrot.lane.b32.xlu1 %v4106_v57, %s3761_s1 }
 0x6b2   :  { %v618_v50 = vpop.permute.xlu0 %617 }
 0x6b3   :  { %v4110_v20 = vmul.f32 %v618_v50, %v583_v63 }
 0x6b5   :  { %672 = vrot.lane.b32.xlu2 %v4110_v20, %s3761_s1 }
 0x6db   :  { %v647_v61 = vpop.permute.xlu1 %646 }
 0x6dc   :  { %3230 = vmatmul.msk.f32.vlgmr.msrb.gmra.mxu2 %vm58_vm0, %v647_v61 }
 0x6dd   :  { %942 = vmatpush.msrb.mxu2 %v3814_v2 }
 0x6df   :  { %943 = vmatpush.msrb.mxu2 %v3825_v5 }
 0x6e1   :  { %944 = vmatpush.msrb.mxu2 %v3837_v8 }
 0x6e3   :  { %945 = vmatpush.msrb.mxu2 %v3849_v11 }
 0x70f   :  { %v673_v21 = vpop.permute.xlu2 %672 }
 0x710   :  { %3231 = vmatmul.msk.f32.vlgmr.msrb.gmra.mxu3 %vm58_vm0, %v673_v21 }
 0x711   :  { %968 = vmatpush.msrb.mxu3 %v3870_v15 }
 0x713   :  { %969 = vmatpush.msrb.mxu3 %v3875_v16 }
 0x715   :  { %970 = vmatpush.msrb.mxu3 %v3891_v18 }
 0x717   :  { %971 = vmatpush.msrb.mxu3 %v3896_v19 }
 0x75f   :  { %v667_v24 = vpop.f32.mrf.mxu2 }
 0x760   :  { %v670_v25 = vadd.f32 %v667_v24, %v110_v23 }
 0x762   :  { %3441 = vtanh.f32 %v670_v25  ;;  %v3232_v30 = vmul.f32 -1.442695, %v670_v25 }
 0x768   :  { %v3442_v26 = vpop.eup %3441 }
 0x769   :  { %739 = vrot.lane.b32.xlu0 %v3442_v26, %s3760_s21 }
 0x793   :  { %v693_v28 = vpop.f32.mrf.mxu3 }
 0x794   :  { %v696_v49 = vadd.f32 %v693_v28, %v154_v27 }
 0x796   :  { %3443 = vtanh.f32 %v696_v49  ;;  %v3233_v60 = vmul.f32 -1.442695, %v696_v49 }
 0x797   :  { %3445 = vpow2.f32 %v3232_v30 }
 0x79c   :  { %v3444_v29 = vpop.eup %3443 }
 0x79d   :  { %750 = vrot.lane.b32.xlu1 %v3444_v29, %s3760_s21  ;;  %v3446_v31 = vpop.eup %3445 }
 0x79e   :  { %v700_v32 = vadd.f32 1.0, %v3446_v31 }
 0x7a0   :  { %3447 = vrcp.f32 %v700_v32  ;;  %v712_v45 = vand.u32 2147483648, %v700_v32  ;;  %vm706_vm11 = vweird.f32 %v700_v32  ;;  %v710_v48 = vand.u32 2147483647, %v700_v32 }
 0x7a1   :  { %3449 = vpow2.f32 %v3233_v60 }
 0x7a2   :  { %v713_v55 = vor.u32 1.1754944e-38, %v712_v45  ;;  %vm711_vm13 = vcmp.eq.f32.partialorder %v710_v48, 8.507059e+37 }
 0x7a6   :  { %v3448_v33 = vpop.eup %3447 }
 0x7a7   :  { %v702_v37 = vmul.f32 %v3448_v33, %v700_v32  ;;  %vm707_vm10 = vweird.f32 %v3448_v33  ;;  %v3450_v62 = vpop.eup %3449 }
 0x7a8   :  { %vm708_vm12 = vmor %vm706_vm11, %vm707_vm10  ;;  %v719_v63 = vadd.f32 1.0, %v3450_v62 }
 0x7a9   :  { %v703_v38 = vsub.f32 1.0, %v702_v37 }
 0x7aa   :  { %3451 = vrcp.f32 %v719_v63  ;;  %v731_v9 = vand.u32 2147483648, %v719_v63  ;;  %vm725_vm15 = vweird.f32 %v719_v63  ;;  %v729_v10 = vand.u32 2147483647, %v719_v63 }
 0x7ab   :  { %v704_v40 = vmul.f32 %v3448_v33, %v703_v38 }
 0x7ac   :  { %v732_v17 = vor.u32 1.1754944e-38, %v731_v9  ;;  %vm730_vm2 = vcmp.eq.f32.partialorder %v729_v10, 8.507059e+37 }
 0x7ad   :  { %v705_v43 = vadd.f32 %v3448_v33, %v704_v40 }
 0x7af   :  { %v709_v52 = vsel %vm708_vm12, %v3448_v33, %v705_v43  ;;  %v112_v33 = vpop.f32.mrf.mxu0 }
 0x7b0   :  { %v714_v58 = vsel %vm711_vm13, %v713_v55, %v709_v52  ;;  %v3452_v0 = vpop.eup %3451 }
 0x7b1   :  { %v721_v42 = vmul.f32 %v3452_v0, %v719_v63  ;;  %vm726_vm14 = vweird.f32 %v3452_v0  ;;  %v737_v22 = vmul.f32 %v714_v58, %v4097_v6 }
 0x7b2   :  { %vm727_vm1 = vmor %vm725_vm15, %vm726_vm14 }
 0x7b3   :  { %v722_v3 = vsub.f32 1.0, %v721_v42 }
 0x7b5   :  { %v723_v4 = vmul.f32 %v3452_v0, %v722_v3 }
 0x7b7   :  { %v724_v7 = vadd.f32 %v3452_v0, %v723_v4 }
 0x7b9   :  { %v728_v14 = vsel %vm727_vm1, %v3452_v0, %v724_v7 }
 0x7ba   :  { %v733_v61 = vsel %vm730_vm2, %v732_v17, %v728_v14 }
 0x7bb   :  { %v748_v26 = vmul.f32 %v733_v61, %v4102_v12 }
 0x7db   :  { %v740_v56 = vpop.permute.xlu0 %739 }
 0x7dc   :  { %v742_v59 = vmul.f32 %v740_v56, %v714_v58 }
 0x7de   :  { %744 = vrot.lane.b32.xlu2 %v742_v59, %s3760_s21 }
 0x80f   :  { %v751_v50 = vpop.permute.xlu1 %750 }
 0x810   :  { %v753_v21 = vmul.f32 %v751_v50, %v733_v61 }
 0x812   :  { %755 = vrot.lane.b32.xlu0 %v753_v21, %s3760_s21 }
 0x838   :  { %v745_v23 = vpop.permute.xlu2 %744 }
 0x839   :  { %v4132_v24 = vadd.f32 %v745_v23, %v737_v22 }
 0x83b   :  { %3453 = vtanh.f32 %v4132_v24 }
 0x841   :  { %v3454_v25 = vpop.eup %3453 }
 0x842   :  { %761 = vrot.lane.b32.xlu1 %v3454_v25, %s3760_s21 }
 0x884   :  { %v756_v27 = vpop.permute.xlu0 %755 }
 0x885   :  { %v4137_v28 = vadd.f32 %v756_v27, %v748_v26 }
 0x887   :  { %3455 = vtanh.f32 %v4137_v28 }
 0x88d   :  { %v3456_v49 = vpop.eup %3455 }
 0x88e   :  { %767 = vrot.lane.b32.xlu2 %v3456_v49, %s3760_s21 }
 0x8b4   :  { %v762_v29 = vpop.permute.xlu1 %761 }
 0x8b5   :  { %v4141_v6 = vmul.f32 %v762_v29, %v714_v58 }
 0x8b7   :  { %794 = vrot.lane.b32.xlu0 %v4141_v6, %s3761_s1 }
 0x8e8   :  { %v768_v30 = vpop.permute.xlu2 %767 }
 0x8e9   :  { %v4145_v31 = vmul.f32 %v768_v30, %v733_v61 }
 0x8eb   :  { %820 = vrot.lane.b32.xlu1 %v4145_v31, %s3761_s1 }
 0x929   :  { %v795_v12 = vpop.permute.xlu0 %794 }
 0x92a   :  { %3236 = vmatmul.msk.f32.vlgmr.msra.gmra.mxu2 %vm58_vm0, %v795_v12 }
 0x92b   :  { %1074 = vmatpush.msra.mxu2 %v3814_v2  ;;  %v113_v2 = vadd.f32 %v112_v33, %v3978_v34 }
 0x92d   :  { %1075 = vmatpush.msra.mxu2 %v3825_v5 }
 0x92f   :  { %1076 = vmatpush.msra.mxu2 %v3837_v8 }
 0x931   :  { %1077 = vmatpush.msra.mxu2 %v3849_v11  ;;  %v151_v11 = vadd.f32 %v4006_v46, %v4019_v51 }
 0x95d   :  { %v821_v32 = vpop.permute.xlu1 %820 }
 0x95e   :  { %3237 = vmatmul.msk.f32.vlgmr.msra.gmra.mxu3 %vm58_vm0, %v821_v32 }
 0x95f   :  { %1100 = vmatpush.msra.mxu3 %v3870_v15 }
 0x961   :  { %1101 = vmatpush.msra.mxu3 %v3875_v16 }
 0x963   :  { %1102 = vmatpush.msra.mxu3 %v3891_v18 }
 0x965   :  { %1103 = vmatpush.msra.mxu3 %v3896_v19 }
 0x9ad   :  { %v815_v37 = vpop.f32.mrf.mxu2 }
 0x9ae   :  { %v818_v5 = vadd.f32 %v815_v37, %v113_v2 }
 0x9b0   :  { %3457 = vtanh.f32 %v818_v5  ;;  %v3238_v40 = vmul.f32 -1.442695, %v818_v5 }
 0x9b6   :  { %v3458_v8 = vpop.eup %3457 }
 0x9b7   :  { %887 = vrot.lane.b32.xlu2 %v3458_v8, %s3760_s21 }
 0x9e1   :  { %v841_v38 = vpop.f32.mrf.mxu3 }
 0x9e2   :  { %v844_v15 = vadd.f32 %v841_v38, %v151_v11  ;;  %v4188_v38 = vld [vmem:[%s4954_s5 + $0x18] sm:$0xff] }
 0x9e4   :  { %3459 = vtanh.f32 %v844_v15  ;;  %v3239_v3 = vmul.f32 -1.442695, %v844_v15  ;;  %v4194_v15 = vld [vmem:[%s4954_s5 + $0x10] sm:$0xff] }
 0x9e5   :  { %3461 = vpow2.f32 %v3238_v40  ;;  %v4200_v40 = vld [vmem:[%s4954_s5 + $0x8] sm:$0xff] }
 0x9ea   :  { %v3460_v16 = vpop.eup %3459 }
 0x9eb   :  { %898 = vrot.lane.b32.xlu0 %v3460_v16, %s3760_s21  ;;  %v3462_v43 = vpop.eup %3461  ;;  %v4206_v16 = vld [vmem:[%s4954_s5] sm:$0xff] }
 0x9ec   :  { %v848_v45 = vadd.f32 1.0, %v3462_v43 }
 0x9ee   :  { %3463 = vrcp.f32 %v848_v45  ;;  %v860_v59 = vand.u32 2147483648, %v848_v45  ;;  %vm854_vm4 = vweird.f32 %v848_v45  ;;  %v858_v46 = vand.u32 2147483647, %v848_v45 }
 0x9ef   :  { %3465 = vpow2.f32 %v3239_v3 }
 0x9f0   :  { %v861_v62 = vor.u32 1.1754944e-38, %v860_v59  ;;  %vm859_vm6 = vcmp.eq.f32.partialorder %v858_v46, 8.507059e+37  ;;  %v148_v46 = vadd.f32 %v3998_v44, %v4019_v51 }
 0x9f4   :  { %v3464_v48 = vpop.eup %3463 }
 0x9f5   :  { %v850_v52 = vmul.f32 %v3464_v48, %v848_v45  ;;  %vm855_vm3 = vweird.f32 %v3464_v48  ;;  %v3466_v4 = vpop.eup %3465  ;;  %v4213_v45 = vld [vmem:[%s4954_s5 + $0x38] sm:$0xff] }
 0x9f6   :  { %vm856_vm5 = vmor %vm854_vm4, %vm855_vm3  ;;  %v867_v7 = vadd.f32 1.0, %v3466_v4 }
 0x9f7   :  { %v851_v55 = vsub.f32 1.0, %v850_v52  ;;  %v115_v52 = vpop.f32.mrf.mxu0 }
 0x9f8   :  { %3467 = vrcp.f32 %v867_v7  ;;  %v879_v61 = vand.u32 2147483648, %v867_v7  ;;  %vm873_vm8 = vweird.f32 %v867_v7  ;;  %v877_v21 = vand.u32 2147483647, %v867_v7 }
 0x9f9   :  { %v852_v56 = vmul.f32 %v3464_v48, %v851_v55  ;;  %v116_v55 = vadd.f32 %v115_v52, %v3978_v34 }
 0x9fa   :  { %v880_v23 = vor.u32 1.1754944e-38, %v879_v61  ;;  %vm878_vm10 = vcmp.eq.f32.partialorder %v877_v21, 8.507059e+37 }
 0x9fb   :  { %v853_v58 = vadd.f32 %v3464_v48, %v852_v56 }
 0x9fd   :  { %v857_v60 = vsel %vm856_vm5, %v3464_v48, %v853_v58  ;;  %v4219_v48 = vld [vmem:[%s4954_s5 + $0x30] sm:$0xff] }
 0x9fe   :  { %v862_v63 = vsel %vm859_vm6, %v861_v62, %v857_v60  ;;  %v3468_v9 = vpop.eup %3467 }
 0x9ff   :  { %v869_v10 = vmul.f32 %v3468_v9, %v867_v7  ;;  %vm874_vm7 = vweird.f32 %v3468_v9  ;;  %v885_v49 = vmul.f32 %v862_v63, %v4132_v24 }
 0xa00   :  { %vm875_vm9 = vmor %vm873_vm8, %vm874_vm7 }
 0xa01   :  { %v870_v14 = vsub.f32 1.0, %v869_v10 }
 0xa03   :  { %v871_v17 = vmul.f32 %v3468_v9, %v870_v14 }
 0xa05   :  { %v872_v50 = vadd.f32 %v3468_v9, %v871_v17 }
 0xa07   :  { %v876_v22 = vsel %vm875_vm9, %v3468_v9, %v872_v50 }
 0xa08   :  { %v881_v26 = vsel %vm878_vm10, %v880_v23, %v876_v22 }
 0xa09   :  { %v896_v32 = vmul.f32 %v881_v26, %v4137_v28 }
 0xa11   :  { %v888_v0 = vpop.permute.xlu2 %887 }
 0xa12   :  { %v890_v42 = vmul.f32 %v888_v0, %v862_v63 }
 0xa14   :  { %892 = vrot.lane.b32.xlu1 %v890_v42, %s3760_s21 }
 0xa5d   :  { %v899_v25 = vpop.permute.xlu0 %898 }
 0xa5e   :  { %v901_v27 = vmul.f32 %v899_v25, %v881_v26 }
 0xa60   :  { %903 = vrot.lane.b32.xlu2 %v901_v27, %s3760_s21 }
 0xa86   :  { %v893_v29 = vpop.permute.xlu1 %892 }
 0xa87   :  { %v4167_v30 = vadd.f32 %v893_v29, %v885_v49 }
 0xa89   :  { %3469 = vtanh.f32 %v4167_v30 }
 0xa8f   :  { %v3470_v12 = vpop.eup %3469 }
 0xa90   :  { %909 = vrot.lane.b32.xlu0 %v3470_v12, %s3760_s21 }
 0xaba   :  { %v904_v33 = vpop.permute.xlu2 %903 }
 0xabb   :  { %v4172_v2 = vadd.f32 %v904_v33, %v896_v32 }
 0xabd   :  { %3471 = vtanh.f32 %v4172_v2 }
 0xac3   :  { %v3472_v37 = vpop.eup %3471 }
 0xac4   :  { %915 = vrot.lane.b32.xlu1 %v3472_v37, %s3760_s21 }
 0xb02   :  { %v910_v5 = vpop.permute.xlu0 %909 }
 0xb03   :  { %v4176_v24 = vmul.f32 %v910_v5, %v862_v63 }
 0xb05   :  { %926 = vrot.lane.b32.xlu2 %v4176_v24, %s3761_s1 }
 0xb36   :  { %v916_v8 = vpop.permute.xlu1 %915 }
 0xb37   :  { %v4180_v11 = vmul.f32 %v916_v8, %v881_v26 }
 0xb39   :  { %4962 = vst [vmem:[#allocation6_spill] sm:$0xff] %v4180_v11  ;;  %952 = vrot.lane.b32.xlu0 %v4180_v11, %s3761_s1 }
 0xb5f   :  { %v927_v28 = vpop.permute.xlu2 %926 }
 0xb60   :  { %3240 = vmatmul.msk.f32.vlgmr.msrb.gmra.mxu2 %vm58_vm0, %v927_v28 }
 0xb61   :  { %1206 = vmatpush.msrb.mxu2 %v4188_v38 }
 0xb63   :  { %1207 = vmatpush.msrb.mxu2 %v4194_v15 }
 0xb65   :  { %1208 = vmatpush.msrb.mxu2 %v4200_v40 }
 0xb67   :  { %1209 = vmatpush.msrb.mxu2 %v4206_v16 }
 0xbab   :  { %v953_v43 = vpop.permute.xlu0 %952 }
 0xbac   :  { %3241 = vmatmul.msk.f32.vlgmr.msrb.gmra.mxu3 %vm58_vm0, %v953_v43 }
 0xbad   :  { %1232 = vmatpush.msrb.mxu3 %v4213_v45 }
 0xbaf   :  { %1233 = vmatpush.msrb.mxu3 %v4219_v48 }
 0xbb1   :  { %1234 = vmatpush.msrb.mxu3 %v3891_v18 }
 0xbb3   :  { %1235 = vmatpush.msrb.mxu3 %v3896_v19 }
 0xbe3   :  { %v947_v56 = vpop.f32.mrf.mxu2 }
 0xbe4   :  { %v950_v58 = vadd.f32 %v947_v56, %v116_v55 }
 0xbe6   :  { %3473 = vtanh.f32 %v950_v58  ;;  %v3242_v63 = vmul.f32 -1.442695, %v950_v58 }
 0xbec   :  { %v3474_v59 = vpop.eup %3473 }
 0xbed   :  { %1019 = vrot.lane.b32.xlu1 %v3474_v59, %s3760_s21 }
 0xc2f   :  { %v973_v60 = vpop.f32.mrf.mxu3 }
 0xc30   :  { %v976_v62 = vadd.f32 %v973_v60, %v148_v46 }
 0xc32   :  { %3475 = vtanh.f32 %v976_v62  ;;  %v3243_v22 = vmul.f32 -1.442695, %v976_v62 }
 0xc33   :  { %3477 = vpow2.f32 %v3242_v63 }
 0xc38   :  { %v3476_v18 = vpop.eup %3475 }
 0xc39   :  { %1030 = vrot.lane.b32.xlu2 %v3476_v18, %s3760_s21  ;;  %v3478_v19 = vpop.eup %3477  ;;  %v118_v18 = vpop.f32.mrf.mxu0 }
 0xc3a   :  { %v980_v0 = vadd.f32 1.0, %v3478_v19 }
 0xc3c   :  { %3479 = vrcp.f32 %v980_v0  ;;  %v992_v10 = vand.u32 2147483648, %v980_v0  ;;  %vm986_vm12 = vweird.f32 %v980_v0  ;;  %v990_v44 = vand.u32 2147483647, %v980_v0 }
 0xc3d   :  { %3481 = vpow2.f32 %v3243_v22 }
 0xc3e   :  { %v993_v17 = vor.u32 1.1754944e-38, %v992_v10  ;;  %vm991_vm14 = vcmp.eq.f32.partialorder %v990_v44, 8.507059e+37 }
 0xc41   :  { %v4245_v19 = vpop.f32.mrf.mxu0 }
 0xc42   :  { %v3480_v42 = vpop.eup %3479 }
 0xc43   :  { %v982_v3 = vmul.f32 %v3480_v42, %v980_v0  ;;  %vm987_vm11 = vweird.f32 %v3480_v42  ;;  %v3482_v23 = vpop.eup %3481 }
 0xc44   :  { %vm988_vm13 = vmor %vm986_vm12, %vm987_vm11  ;;  %v999_v25 = vadd.f32 1.0, %v3482_v23 }
 0xc45   :  { %v983_v4 = vsub.f32 1.0, %v982_v3 }
 0xc46   :  { %3483 = vrcp.f32 %v999_v25  ;;  %v1011_v32 = vand.u32 2147483648, %v999_v25  ;;  %vm1005_vm1 = vweird.f32 %v999_v25  ;;  %v1009_v33 = vand.u32 2147483647, %v999_v25 }
 0xc47   :  { %v984_v7 = vmul.f32 %v3480_v42, %v983_v4 }
 0xc48   :  { %v1012_v5 = vor.u32 1.1754944e-38, %v1011_v32  ;;  %vm1010_vm3 = vcmp.eq.f32.partialorder %v1009_v33, 8.507059e+37  ;;  %v119_v33 = vadd.f32 %v118_v18, %v3978_v34 }
 0xc49   :  { %v985_v9 = vadd.f32 %v3480_v42, %v984_v7  ;;  %v1391_v0 = vpop.f32.mrf.mxu0 }
 0xc4b   :  { %v989_v14 = vsel %vm988_vm13, %v3480_v42, %v985_v9 }
 0xc4c   :  { %v994_v61 = vsel %vm991_vm14, %v993_v17, %v989_v14  ;;  %v3484_v26 = vpop.eup %3483 }
 0xc4d   :  { %v1001_v27 = vmul.f32 %v3484_v26, %v999_v25  ;;  %vm1006_vm15 = vweird.f32 %v3484_v26  ;;  %v1017_v52 = vmul.f32 %v994_v61, %v4167_v30 }
 0xc4e   :  { %vm1007_vm2 = vmor %vm1005_vm1, %vm1006_vm15 }
 0xc4f   :  { %v1002_v49 = vsub.f32 1.0, %v1001_v27 }
 0xc51   :  { %v1003_v29 = vmul.f32 %v3484_v26, %v1002_v49 }
 0xc53   :  { %v1004_v12 = vadd.f32 %v3484_v26, %v1003_v29 }
 0xc55   :  { %v1008_v37 = vsel %vm1007_vm2, %v3484_v26, %v1004_v12 }
 0xc56   :  { %v1013_v8 = vsel %vm1010_vm3, %v1012_v5, %v1008_v37 }
 0xc57   :  { %v1028_v59 = vmul.f32 %v1013_v8, %v4172_v2  ;;  %v1392_v2 = vadd.f32 %v1391_v0, %v3978_v34 }
 0xc59   :  { %v1525_v42 = vadd.f32 %v1392_v2, %v3988_v39  ;;  %v4259_v39 = vpop.f32.mrf.mxu1 }
 0xc5b   :  { %v3276_v27 = vmul.f32 -1.442695, %v1525_v42 }
 0xc5f   :  { %v1020_v50 = vpop.permute.xlu1 %1019 }
 0xc60   :  { %v1022_v21 = vmul.f32 %v1020_v50, %v994_v61  ;;  %v4273_v50 = vld [vmem:[%s4954_s5 + $0x28] sm:$0xff] }
 0xc61   :  { %v4261_v10 = vpop.f32.mrf.mxu1 }
 0xc62   :  { %1024 = vrot.lane.b32.xlu0 %v1022_v21, %s3760_s21 }
 0xc69   :  { %v4263_v44 = vpop.f32.mrf.mxu1 }
 0xc71   :  { %v4265_v14 = vpop.f32.mrf.mxu1 }
 0xc79   :  { %v4282_v21 = vpop.f32.mrf.mxu1 }
 0xc81   :  { %v4284_v22 = vpop.f32.mrf.mxu1 }
 0xc89   :  { %v4286_v23 = vpop.f32.mrf.mxu1 }
 0xc91   :  { %v4288_v25 = vpop.f32.mrf.mxu1 }
 0xc93   :  { %v1031_v28 = vpop.permute.xlu2 %1030 }
 0xc94   :  { %v1033_v43 = vmul.f32 %v1031_v28, %v1013_v8 }
 0xc96   :  { %1035 = vrot.lane.b32.xlu1 %v1033_v43, %s3760_s21 }
 0xc99   :  { %v4290_v26 = vpop.f32.mrf.mxu1 }
 0xca1   :  { %v4292_v49 = vpop.f32.mrf.mxu1 }
 0xca9   :  { %v4294_v12 = vpop.f32.mrf.mxu1 }
 0xcb1   :  { %v1477_v37 = vpop.f32.mrf.mxu1 }
 0xcb2   :  { %v1478_v43 = vadd.f32 %v1477_v37, %v4019_v51 }
 0xcd4   :  { %v1025_v55 = vpop.permute.xlu0 %1024 }
 0xcd5   :  { %v4232_v56 = vadd.f32 %v1025_v55, %v1017_v52  ;;  %v1526_v55 = vadd.f32 %v1478_v43, %v4021_v53 }
 0xcd7   :  { %3485 = vtanh.f32 %v4232_v56 }
 0xcdd   :  { %v3486_v58 = vpop.eup %3485 }
 0xcde   :  { %1041 = vrot.lane.b32.xlu2 %v3486_v58, %s3760_s21 }
 0xd08   :  { %v1036_v46 = vpop.permute.xlu1 %1035 }
 0xd09   :  { %v4237_v60 = vadd.f32 %v1036_v46, %v1028_v59 }
 0xd0b   :  { %3487 = vtanh.f32 %v4237_v60 }
 0xd0c   :  { %3489 = vtanh.f32 %v1525_v42 }
 0xd0d   :  { %3491 = vpow2.f32 %v3276_v27 }
 0xd11   :  { %v3488_v62 = vpop.eup %3487 }
 0xd12   :  { %1047 = vrot.lane.b32.xlu0 %v3488_v62, %s3760_s21  ;;  %v3490_v7 = vpop.eup %3489 }
 0xd13   :  { %v3492_v29 = vpop.eup %3491 }
 0xd14   :  { %v1530_v32 = vadd.f32 1.0, %v3492_v29 }
 0xd16   :  { %3493 = vrcp.f32 %v1530_v32  ;;  %v1542_v18 = vand.u32 2147483648, %v1530_v32  ;;  %vm1536_vm5 = vweird.f32 %v1530_v32  ;;  %v1540_v0 = vand.u32 2147483647, %v1530_v32 }
 0xd18   :  { %v1543_v42 = vor.u32 1.1754944e-38, %v1542_v18  ;;  %vm1541_vm7 = vcmp.eq.f32.partialorder %v1540_v0, 8.507059e+37 }
 0xd38   :  { %v1042_v63 = vpop.permute.xlu2 %1041 }
 0xd39   :  { %v4241_v30 = vmul.f32 %v1042_v63, %v994_v61  ;;  %v4279_v61 = vld [vmem:[%s4954_s5 + $0x20] sm:$0xff] }
 0xd3b   :  { %1058 = vrot.lane.b32.xlu1 %v4241_v30, %s3761_s1 }
 0xd84   :  { %v1048_v3 = vpop.permute.xlu0 %1047 }
 0xd85   :  { %v4249_v4 = vmul.f32 %v1048_v3, %v1013_v8  ;;  %v3494_v8 = vpop.eup %3493 }
 0xd86   :  { %v1532_v52 = vmul.f32 %v3494_v8, %v1530_v32  ;;  %vm1537_vm4 = vweird.f32 %v3494_v8 }
 0xd87   :  { %4963 = vst [vmem:[#allocation7_spill] sm:$0xff] %v4249_v4  ;;  %1084 = vrot.lane.b32.xlu2 %v4249_v4, %s3761_s1  ;;  %vm1538_vm6 = vmor %vm1536_vm5, %vm1537_vm4 }
 0xd88   :  { %v1533_v58 = vsub.f32 1.0, %v1532_v52 }
 0xd8a   :  { %v1534_v46 = vmul.f32 %v3494_v8, %v1533_v58 }
 0xd8c   :  { %v1535_v62 = vadd.f32 %v3494_v8, %v1534_v46 }
 0xd8e   :  { %v1539_v2 = vsel %vm1538_vm6, %v3494_v8, %v1535_v62 }
 0xd8f   :  { %1569 = vrot.lane.b32.xlu2 %v3490_v7, %s3760_s21  ;;  %v4301_v53 = vsel %vm1541_vm7, %v1543_v42, %v1539_v2 }
 0xdad   :  { %v1059_v9 = vpop.permute.xlu1 %1058 }
 0xdae   :  { %3244 = vmatmul.msk.f32.vlgmr.msra.gmra.mxu2 %vm58_vm0, %v1059_v9  ;;  %v145_v9 = vadd.f32 %v3991_v41, %v4019_v51 }
 0xdaf   :  { %1641 = vmatpush.msra.mxu2 %v4188_v38 }
 0xdb1   :  { %1642 = vmatpush.msra.mxu2 %v4194_v15 }
 0xdb3   :  { %1643 = vmatpush.msra.mxu2 %v4200_v40 }
 0xdb5   :  { %1644 = vmatpush.msra.mxu2 %v4206_v16 }
 0xde1   :  { %v1085_v17 = vpop.permute.xlu2 %1084 }
 0xde2   :  { %3245 = vmatmul.msk.f32.vlgmr.msra.gmra.mxu3 %vm58_vm0, %v1085_v17 }
 0xde3   :  { %1667 = vmatpush.msra.mxu3 %v4213_v45 }
 0xde5   :  { %1668 = vmatpush.msra.mxu3 %v4219_v48 }
 0xde7   :  { %1669 = vmatpush.msra.mxu3 %v4273_v50 }
 0xde9   :  { %1670 = vmatpush.msra.mxu3 %v4279_v61  ;;  %v1570_v3 = vpop.permute.xlu2 %1569 }
 0xdea   :  { %v1572_v7 = vmul.f32 %v1570_v3, %v4301_v53 }
 0xe31   :  { %v1079_v5 = vpop.f32.mrf.mxu2 }
 0xe32   :  { %v1082_v28 = vadd.f32 %v1079_v5, %v119_v33  ;;  %v3277_v33 = vmul.f32 -1.442695, %v1526_v55 }
 0xe34   :  { %3495 = vtanh.f32 %v1082_v28  ;;  %v3246_v32 = vmul.f32 -1.442695, %v1082_v28 }
 0xe35   :  { %3497 = vtanh.f32 %v1526_v55 }
 0xe3a   :  { %v3496_v59 = vpop.eup %3495 }
 0xe3b   :  { %1151 = vrot.lane.b32.xlu0 %v3496_v59, %s3760_s21  ;;  %v3498_v63 = vpop.eup %3497 }
 0xe43   :  { %1580 = vrot.lane.b32.xlu0 %v3498_v63, %s3760_s21 }
 0xe4b   :  { %1574 = vrot.lane.b32.xlu0 %v1572_v7, %s3760_s21 }
 0xe65   :  { %v1105_v17 = vpop.f32.mrf.mxu3 }
 0xe66   :  { %v1108_v27 = vadd.f32 %v1105_v17, %v145_v9 }
 0xe68   :  { %3499 = vtanh.f32 %v1108_v27 }
 0xe69   :  { %3501 = vpow2.f32 %v3246_v32 }
 0xe6a   :  { %3503 = vpow2.f32 %v3277_v33 }
 0xe6e   :  { %v3500_v29 = vpop.eup %3499 }
 0xe6f   :  { %1162 = vrot.lane.b32.xlu1 %v3500_v29, %s3760_s21  ;;  %v3502_v37 = vpop.eup %3501 }
 0xe70   :  { %v1112_v5 = vadd.f32 1.0, %v3502_v37  ;;  %v3504_v8 = vpop.eup %3503 }
 0xe71   :  { %v1549_v43 = vadd.f32 1.0, %v3504_v8 }
 0xe72   :  { %3505 = vrcp.f32 %v1112_v5  ;;  %v1124_v0 = vand.u32 2147483648, %v1112_v5  ;;  %vm1118_vm9 = vweird.f32 %v1112_v5  ;;  %v1122_v28 = vand.u32 2147483647, %v1112_v5 }
 0xe73   :  { %3507 = vrcp.f32 %v1549_v43  ;;  %v1561_v29 = vand.u32 2147483648, %v1549_v43  ;;  %vm1555_vm13 = vweird.f32 %v1549_v43  ;;  %v1559_v32 = vand.u32 2147483647, %v1549_v43 }
 0xe74   :  { %v1125_v42 = vor.u32 1.1754944e-38, %v1124_v0  ;;  %vm1123_vm11 = vcmp.eq.f32.partialorder %v1122_v28, 8.507059e+37 }
 0xe75   :  { %v1562_v37 = vor.u32 1.1754944e-38, %v1561_v29  ;;  %vm1560_vm15 = vcmp.eq.f32.partialorder %v1559_v32, 8.507059e+37 }
 0xe78   :  { %v3506_v52 = vpop.eup %3505 }
 0xe79   :  { %v1114_v58 = vmul.f32 %v3506_v52, %v1112_v5  ;;  %v3508_v41 = vpop.eup %3507  ;;  %vm1119_vm8 = vweird.f32 %v3506_v52  ;;  %v3247_v5 = vmul.f32 -1.442695, %v1108_v27 }
 0xe7a   :  { %v1551_v62 = vmul.f32 %v3508_v41, %v1549_v43  ;;  %vm1120_vm10 = vmor %vm1118_vm9, %vm1119_vm8  ;;  %vm1556_vm12 = vweird.f32 %v3508_v41 }
 0xe7b   :  { %v1115_v59 = vsub.f32 1.0, %v1114_v58  ;;  %vm1557_vm14 = vmor %vm1555_vm13, %vm1556_vm12  ;;  %3509 = vpow2.f32 %v3247_v5 }
 0xe7c   :  { %v1552_v18 = vsub.f32 1.0, %v1551_v62 }
 0xe7d   :  { %v1116_v46 = vmul.f32 %v3506_v52, %v1115_v59  ;;  %v1567_v59 = vmul.f32 0.0, %v4301_v53 }
 0xe7e   :  { %v1553_v2 = vmul.f32 %v3508_v41, %v1552_v18 }
 0xe7f   :  { %v1117_v63 = vadd.f32 %v3506_v52, %v1116_v46 }
 0xe80   :  { %v1554_v17 = vadd.f32 %v3508_v41, %v1553_v2 }
 0xe81   :  { %v1121_v55 = vsel %vm1120_vm10, %v3506_v52, %v1117_v63  ;;  %v3510_v62 = vpop.eup %3509 }
 0xe82   :  { %v4308_v7 = vsel %vm1123_vm11, %v1125_v42, %v1121_v55  ;;  %v1558_v33 = vsel %vm1557_vm14, %v3508_v41, %v1554_v17  ;;  %v1131_v43 = vadd.f32 1.0, %v3510_v62 }
 0xe83   :  { %v1563_v8 = vsel %vm1560_vm15, %v1562_v37, %v1558_v33  ;;  %v1149_v33 = vmul.f32 %v4308_v7, %v4232_v56 }
 0xe84   :  { %v1143_v2 = vand.u32 2147483648, %v1131_v43  ;;  %vm1137_vm2 = vweird.f32 %v1131_v43  ;;  %v1141_v42 = vand.u32 2147483647, %v1131_v43 }
 0xe86   :  { %vm1142_vm4 = vcmp.eq.f32.partialorder %v1141_v42, 8.507059e+37 }
 0xead   :  { %v1152_v3 = vpop.permute.xlu0 %1151 }
 0xeae   :  { %v1154_v9 = vmul.f32 %v1152_v3, %v4308_v7 }
 0xeb0   :  { %1156 = vrot.lane.b32.xlu1 %v1154_v9, %s3760_s21  ;;  %v1144_v9 = vor.u32 1.1754944e-38, %v1143_v2 }
 0xeb5   :  { %v1581_v52 = vpop.permute.xlu0 %1580 }
 0xeb6   :  { %v1583_v58 = vmul.f32 %v1581_v52, %v1563_v8  ;;  %v1578_v52 = vmul.f32 0.0, %v1563_v8 }
 0xeb8   :  { %1585 = vrot.lane.b32.xlu1 %v1583_v58, %s3760_s21 }
 0xebd   :  { %v1575_v46 = vpop.permute.xlu0 %1574 }
 0xebe   :  { %v4314_v63 = vadd.f32 %v1575_v46, %v1567_v59 }
 0xec0   :  { %3511 = vtanh.f32 %v4314_v63 }
 0xec1   :  { %3513 = vrcp.f32 %v1131_v43 }
 0xec6   :  { %v3512_v41 = vpop.eup %3511 }
 0xec7   :  { %1591 = vrot.lane.b32.xlu1 %v3512_v41, %s3760_s21  ;;  %v3514_v27 = vpop.eup %3513 }
 0xec8   :  { %v1133_v18 = vmul.f32 %v3514_v27, %v1131_v43  ;;  %vm1138_vm1 = vweird.f32 %v3514_v27 }
 0xec9   :  { %vm1139_vm3 = vmor %vm1137_vm2, %vm1138_vm1 }
 0xeca   :  { %v1134_v0 = vsub.f32 1.0, %v1133_v18 }
 0xecc   :  { %v1135_v28 = vmul.f32 %v3514_v27, %v1134_v0 }
 0xece   :  { %v1136_v55 = vadd.f32 %v3514_v27, %v1135_v28 }
 0xed0   :  { %v1140_v3 = vsel %vm1139_vm3, %v3514_v27, %v1136_v55 }
 0xed1   :  { %v1145_v29 = vsel %vm1142_vm4, %v1144_v9, %v1140_v3 }
 0xed2   :  { %v1160_v41 = vmul.f32 %v1145_v29, %v4237_v60 }
 0xee1   :  { %v1163_v17 = vpop.permute.xlu1 %1162 }
 0xee2   :  { %v1165_v32 = vmul.f32 %v1163_v17, %v1145_v29  ;;  %v122_v17 = vadd.f32 %v4245_v19, %v3978_v34  ;;  %v1475_v19 = vadd.f32 %v4294_v12, %v4019_v51 }
 0xee4   :  { %1167 = vrot.lane.b32.xlu2 %v1165_v32, %s3760_s21 }
 0xf22   :  { %v1157_v37 = vpop.permute.xlu1 %1156 }
 0xf23   :  { %v4321_v5 = vadd.f32 %v1157_v37, %v1149_v33  ;;  %v1394_v33 = vpop.f32.mrf.mxu0 }
 0xf24   :  { %v1395_v37 = vadd.f32 %v1394_v33, %v3978_v34 }
 0xf25   :  { %3515 = vtanh.f32 %v4321_v5 }
 0xf2a   :  { %v1586_v58 = vpop.permute.xlu1 %1585 }
 0xf2b   :  { %v3516_v59 = vpop.eup %3515  ;;  %v4324_v46 = vadd.f32 %v1586_v58, %v1578_v52 }
 0xf2c   :  { %1173 = vrot.lane.b32.xlu2 %v3516_v59, %s3760_s21 }
 0xf2d   :  { %3517 = vtanh.f32 %v4324_v46 }
 0xf33   :  { %v3518_v62 = vpop.eup %3517 }
 0xf34   :  { %1597 = vrot.lane.b32.xlu2 %v3518_v62, %s3760_s21  ;;  %v142_v62 = vadd.f32 %v3980_v35, %v4019_v51 }
 0xf39   :  { %v1592_v43 = vpop.permute.xlu1 %1591 }
 0xf3a   :  { %v4330_v56 = vmul.f32 %v1592_v43, %v4301_v53 }
 0xf3c   :  { %1625 = vrot.lane.b32.xlu2 %v4330_v56, %s3761_s1 }
 0xf3e   :  { %v1168_v27 = vpop.permute.xlu2 %1167 }
 0xf3f   :  { %v4335_v18 = vadd.f32 %v1168_v27, %v1160_v41 }
 0xf41   :  { %3519 = vtanh.f32 %v4335_v18 }
 0xf47   :  { %v3520_v0 = vpop.eup %3519 }
 0xf48   :  { %1179 = vrot.lane.b32.xlu0 %v3520_v0, %s3760_s21 }
 0xf86   :  { %v1174_v28 = vpop.permute.xlu2 %1173 }
 0xf87   :  { %v4340_v55 = vmul.f32 %v1174_v28, %v4308_v7 }
 0xf89   :  { %1190 = vrot.lane.b32.xlu0 %v4340_v55, %s3761_s1 }
 0xf8e   :  { %v1598_v53 = vpop.permute.xlu2 %1597 }
 0xf8f   :  { %v4344_v2 = vmul.f32 %v1598_v53, %v1563_v8 }
 0xf91   :  { %1651 = vrot.lane.b32.xlu0 %v4344_v2, %s3761_s1 }
 0xf96   :  { %v1626_v7 = vpop.permute.xlu2 %1625 }
 0xfba   :  { %v1180_v60 = vpop.permute.xlu0 %1179 }
 0xfbb   :  { %v4348_v42 = vmul.f32 %v1180_v60, %v1145_v29 }
 0xfbd   :  { %4964 = vst [vmem:[#allocation8_spill] sm:$0xff] %v4348_v42  ;;  %1216 = vrot.lane.b32.xlu1 %v4348_v42, %s3761_s1 }
 0xffb   :  { %v1191_v3 = vpop.permute.xlu0 %1190 }
 0xffc   :  { %3248 = vmatmul.msk.f32.vlgmr.msrb.gmra.mxu2 %vm58_vm0, %v1191_v3 }
 0xffd   :  { %1790 = vmatpush.msrb.mxu2 %v4188_v38 }
 0xfff   :  { %1791 = vmatpush.msrb.mxu2 %v4194_v15 }
0x1001   :  { %1792 = vmatpush.msrb.mxu2 %v4200_v40 }
0x1003   :  { %1793 = vmatpush.msrb.mxu2 %v4206_v16  ;;  %v1652_v9 = vpop.permute.xlu0 %1651 }
0x1004   :  { %3280 = vmatmul.msk.f32.vlgmr.msra.gmra.mxu2 %vm58_vm0, %v1626_v7 }
0x1005   :  { %1939 = vmatpush.msra.mxu2 %v4188_v38 }
0x1007   :  { %1940 = vmatpush.msra.mxu2 %v4194_v15 }
0x1009   :  { %1941 = vmatpush.msra.mxu2 %v4200_v40 }
0x100b   :  { %1942 = vmatpush.msra.mxu2 %v4206_v16 }
0x102f   :  { %v1217_v8 = vpop.permute.xlu1 %1216 }
0x1030   :  { %3249 = vmatmul.msk.f32.vlgmr.msrb.gmra.mxu3 %vm58_vm0, %v1217_v8 }
0x1031   :  { %1816 = vmatpush.msrb.mxu3 %v4213_v45 }
0x1033   :  { %1817 = vmatpush.msrb.mxu3 %v4219_v48 }
0x1035   :  { %1818 = vmatpush.msrb.mxu3 %v4273_v50 }
0x1037   :  { %1819 = vmatpush.msrb.mxu3 %v4279_v61 }
0x1038   :  { %3281 = vmatmul.msk.f32.vlgmr.msra.gmra.mxu3 %vm58_vm0, %v1652_v9 }
0x1039   :  { %1965 = vmatpush.msra.mxu3 %v4213_v45 }
0x103b   :  { %1966 = vmatpush.msra.mxu3 %v4219_v48 }
0x103d   :  { %1967 = vmatpush.msra.mxu3 %v4273_v50 }
0x103f   :  { %1968 = vmatpush.msra.mxu3 %v4279_v61 }
0x107f   :  { %v1211_v29 = vpop.f32.mrf.mxu2 }
0x1080   :  { %v4374_v32 = vadd.f32 %v1211_v29, %v122_v17 }
0x1087   :  { %v1646_v52 = vpop.f32.mrf.mxu2 }
0x1088   :  { %v1649_v58 = vadd.f32 %v1646_v52, %v1395_v37 }
0x108a   :  { %3521 = vtanh.f32 %v1649_v58  ;;  %v3282_v53 = vmul.f32 -1.442695, %v1649_v58 }
0x1090   :  { %v3522_v59 = vpop.eup %3521 }
0x1091   :  { %1718 = vrot.lane.b32.xlu1 %v3522_v59, %s3760_s21 }
0x10b3   :  { %v1237_v43 = vpop.f32.mrf.mxu3 }
0x10b4   :  { %v4380_v41 = vadd.f32 %v1237_v43, %v142_v62 }
0x10bb   :  { %v1672_v27 = vpop.f32.mrf.mxu3 }
0x10bc   :  { %v1675_v0 = vadd.f32 %v1672_v27, %v1475_v19 }
0x10be   :  { %3523 = vtanh.f32 %v1675_v0  ;;  %v3283_v35 = vmul.f32 -1.442695, %v1675_v0 }
0x10bf   :  { %3525 = vpow2.f32 %v3282_v53 }
0x10c4   :  { %v3524_v28 = vpop.eup %3523 }
0x10c5   :  { %1729 = vrot.lane.b32.xlu2 %v3524_v28, %s3760_s21  ;;  %v3526_v60 = vpop.eup %3525 }
0x10c6   :  { %v1679_v3 = vadd.f32 1.0, %v3526_v60 }
0x10c8   :  { %3527 = vrcp.f32 %v1679_v3  ;;  %v1691_v12 = vand.u32 2147483648, %v1679_v3  ;;  %vm1685_vm6 = vweird.f32 %v1679_v3  ;;  %v1689_v37 = vand.u32 2147483647, %v1679_v3 }
0x10c9   :  { %3529 = vpow2.f32 %v3283_v35 }
0x10ca   :  { %v1692_v58 = vor.u32 1.1754944e-38, %v1691_v12  ;;  %vm1690_vm8 = vcmp.eq.f32.partialorder %v1689_v37, 8.507059e+37 }
0x10ce   :  { %v3528_v7 = vpop.eup %3527 }
0x10cf   :  { %v1681_v8 = vmul.f32 %v3528_v7, %v1679_v3  ;;  %v3530_v29 = vpop.eup %3529  ;;  %vm1686_vm5 = vweird.f32 %v3528_v7 }
0x10d0   :  { %v1698_v52 = vadd.f32 1.0, %v3530_v29  ;;  %vm1687_vm7 = vmor %vm1685_vm6, %vm1686_vm5 }
0x10d1   :  { %v1682_v9 = vsub.f32 1.0, %v1681_v8 }
0x10d2   :  { %3531 = vrcp.f32 %v1698_v52  ;;  %v1710_v8 = vand.u32 2147483648, %v1698_v52  ;;  %vm1704_vm10 = vweird.f32 %v1698_v52  ;;  %v1708_v3 = vand.u32 2147483647, %v1698_v52 }
0x10d3   :  { %v1683_v17 = vmul.f32 %v3528_v7, %v1682_v9 }
0x10d4   :  { %vm1709_vm12 = vcmp.eq.f32.partialorder %v1708_v3, 8.507059e+37 }
0x10d5   :  { %v1684_v33 = vadd.f32 %v3528_v7, %v1683_v17 }
0x10d7   :  { %v1688_v59 = vsel %vm1687_vm7, %v3528_v7, %v1684_v33  ;;  %v1711_v7 = vor.u32 1.1754944e-38, %v1710_v8 }
0x10d8   :  { %v1693_v43 = vsel %vm1690_vm8, %v1692_v58, %v1688_v59  ;;  %v3532_v27 = vpop.eup %3531 }
0x10d9   :  { %v1700_v0 = vmul.f32 %v3532_v27, %v1698_v52  ;;  %vm1705_vm9 = vweird.f32 %v3532_v27  ;;  %v1716_v33 = vmul.f32 %v1693_v43, %v4314_v63 }
0x10da   :  { %vm1706_vm11 = vmor %vm1704_vm10, %vm1705_vm9 }
0x10db   :  { %v1701_v28 = vsub.f32 1.0, %v1700_v0 }
0x10dd   :  { %v1702_v53 = vmul.f32 %v3532_v27, %v1701_v28 }
0x10df   :  { %v1703_v60 = vadd.f32 %v3532_v27, %v1702_v53  ;;  %v1397_v53 = vpop.f32.mrf.mxu0 }
0x10e1   :  { %v1707_v35 = vsel %vm1706_vm11, %v3532_v27, %v1703_v60  ;;  %v1398_v60 = vadd.f32 %v1397_v53, %v3978_v34 }
0x10e2   :  { %v1712_v9 = vsel %vm1709_vm12, %v1711_v7, %v1707_v35  ;;  %v1472_v7 = vadd.f32 %v4292_v49, %v4019_v51 }
0x10e3   :  { %v1727_v52 = vmul.f32 %v1712_v9, %v4324_v46 }
0x1103   :  { %v1719_v62 = vpop.permute.xlu1 %1718 }
0x1104   :  { %v1721_v19 = vmul.f32 %v1719_v62, %v1693_v43 }
0x1106   :  { %1723 = vrot.lane.b32.xlu0 %v1721_v19, %s3760_s21 }
0x111f   :  { %v1730_v17 = vpop.permute.xlu2 %1729 }
0x1120   :  { %v1732_v29 = vmul.f32 %v1730_v17, %v1712_v9 }
0x1122   :  { %1734 = vrot.lane.b32.xlu1 %v1732_v29, %s3760_s21 }
0x1178   :  { %v1724_v12 = vpop.permute.xlu0 %1723 }
0x1179   :  { %v4388_v37 = vadd.f32 %v1724_v12, %v1716_v33 }
0x117b   :  { %3533 = vtanh.f32 %v4388_v37 }
0x1181   :  { %v3534_v59 = vpop.eup %3533 }
0x1182   :  { %1740 = vrot.lane.b32.xlu2 %v3534_v59, %s3760_s21 }
0x1194   :  { %v1735_v58 = vpop.permute.xlu1 %1734 }
0x1195   :  { %v4393_v62 = vadd.f32 %v1735_v58, %v1727_v52 }
0x1197   :  { %3535 = vtanh.f32 %v4393_v62 }
0x119d   :  { %v3536_v19 = vpop.eup %3535 }
0x119e   :  { %1746 = vrot.lane.b32.xlu0 %v3536_v19, %s3760_s21 }
0x11dc   :  { %v1741_v27 = vpop.permute.xlu2 %1740 }
0x11dd   :  { %v4397_v63 = vmul.f32 %v1741_v27, %v1693_v43 }
0x11df   :  { %1774 = vrot.lane.b32.xlu1 %v4397_v63, %s3761_s1 }
0x1210   :  { %v1747_v0 = vpop.permute.xlu0 %1746 }
0x1211   :  { %v4401_v28 = vmul.f32 %v1747_v0, %v1712_v9 }
0x1213   :  { %1800 = vrot.lane.b32.xlu2 %v4401_v28, %s3761_s1 }
0x1251   :  { %v1775_v46 = vpop.permute.xlu1 %1774 }
0x1252   :  { %3286 = vmatmul.msk.f32.vlgmr.msrb.gmra.mxu2 %vm58_vm0, %v1775_v46 }
0x1253   :  { %2087 = vmatpush.msrb.mxu2 %v4188_v38 }
0x1255   :  { %2088 = vmatpush.msrb.mxu2 %v4194_v15 }
0x1257   :  { %2089 = vmatpush.msrb.mxu2 %v4200_v40 }
0x1259   :  { %2090 = vmatpush.msrb.mxu2 %v4206_v16 }
0x126d   :  { %v1801_v43 = vpop.permute.xlu2 %1800 }
0x126e   :  { %3287 = vmatmul.msk.f32.vlgmr.msrb.gmra.mxu3 %vm58_vm0, %v1801_v43 }
0x126f   :  { %2113 = vmatpush.msrb.mxu3 %v4213_v45 }
0x1271   :  { %2114 = vmatpush.msrb.mxu3 %v4219_v48 }
0x1273   :  { %2115 = vmatpush.msrb.mxu3 %v4273_v50 }
0x1275   :  { %2116 = vmatpush.msrb.mxu3 %v4279_v61 }
0x12d5   :  { %v1795_v8 = vpop.f32.mrf.mxu2 }
0x12d6   :  { %v1798_v3 = vadd.f32 %v1795_v8, %v1398_v60 }
0x12d8   :  { %3537 = vtanh.f32 %v1798_v3  ;;  %v3288_v33 = vmul.f32 -1.442695, %v1798_v3 }
0x12de   :  { %v3538_v35 = vpop.eup %3537 }
0x12df   :  { %1867 = vrot.lane.b32.xlu0 %v3538_v35, %s3760_s21 }
0x12f1   :  { %v1821_v9 = vpop.f32.mrf.mxu3 }
0x12f2   :  { %v1824_v17 = vadd.f32 %v1821_v9, %v1472_v7 }
0x12f4   :  { %3539 = vtanh.f32 %v1824_v17  ;;  %v3289_v19 = vmul.f32 -1.442695, %v1824_v17 }
0x12f5   :  { %3541 = vpow2.f32 %v3288_v33 }
0x12fa   :  { %v3540_v29 = vpop.eup %3539 }
0x12fb   :  { %1878 = vrot.lane.b32.xlu1 %v3540_v29, %s3760_s21  ;;  %v3542_v12 = vpop.eup %3541 }
0x12fc   :  { %v1828_v59 = vadd.f32 1.0, %v3542_v12 }
0x12fe   :  { %3543 = vrcp.f32 %v1828_v59  ;;  %v1840_v49 = vand.u32 2147483648, %v1828_v59  ;;  %vm1834_vm14 = vweird.f32 %v1828_v59  ;;  %v1838_v53 = vand.u32 2147483647, %v1828_v59 }
0x12ff   :  { %3545 = vpow2.f32 %v3289_v19 }
0x1300   :  { %v1841_v3 = vor.u32 1.1754944e-38, %v1840_v49  ;;  %vm1839_vm1 = vcmp.eq.f32.partialorder %v1838_v53, 8.507059e+37 }
0x1304   :  { %v3544_v52 = vpop.eup %3543 }
0x1305   :  { %v1830_v58 = vmul.f32 %v3544_v52, %v1828_v59  ;;  %v3546_v46 = vpop.eup %3545  ;;  %vm1835_vm13 = vweird.f32 %v3544_v52 }
0x1306   :  { %v1847_v60 = vadd.f32 1.0, %v3546_v46  ;;  %vm1836_vm15 = vmor %vm1834_vm14, %vm1835_vm13 }
0x1307   :  { %v1831_v27 = vsub.f32 1.0, %v1830_v58 }
0x1308   :  { %3547 = vrcp.f32 %v1847_v60  ;;  %v1859_v19 = vand.u32 2147483648, %v1847_v60  ;;  %vm1853_vm3 = vweird.f32 %v1847_v60  ;;  %v1857_v59 = vand.u32 2147483647, %v1847_v60 }
0x1309   :  { %v1832_v0 = vmul.f32 %v3544_v52, %v1831_v27 }
0x130a   :  { %vm1858_vm5 = vcmp.eq.f32.partialorder %v1857_v59, 8.507059e+37 }
0x130b   :  { %v1833_v43 = vadd.f32 %v3544_v52, %v1832_v0 }
0x130d   :  { %v1837_v8 = vsel %vm1836_vm15, %v3544_v52, %v1833_v43  ;;  %v1860_v52 = vor.u32 1.1754944e-38, %v1859_v19 }
0x130e   :  { %v1842_v7 = vsel %vm1839_vm1, %v1841_v3, %v1837_v8  ;;  %v3548_v17 = vpop.eup %3547 }
0x130f   :  { %v1849_v29 = vmul.f32 %v3548_v17, %v1847_v60  ;;  %vm1854_vm2 = vweird.f32 %v3548_v17  ;;  %v1865_v49 = vmul.f32 %v1842_v7, %v4388_v37 }
0x1310   :  { %vm1855_vm4 = vmor %vm1853_vm3, %vm1854_vm2 }
0x1311   :  { %v1850_v33 = vsub.f32 1.0, %v1849_v29 }
0x1313   :  { %v1851_v12 = vmul.f32 %v3548_v17, %v1850_v33 }
0x1315   :  { %v1852_v58 = vadd.f32 %v3548_v17, %v1851_v12 }
0x1317   :  { %v1856_v27 = vsel %vm1855_vm4, %v3548_v17, %v1852_v58  ;;  %v1400_v58 = vpop.f32.mrf.mxu0 }
0x1318   :  { %v1861_v46 = vsel %vm1858_vm5, %v1860_v52, %v1856_v27 }
0x1319   :  { %v1876_v60 = vmul.f32 %v1861_v46, %v4393_v62 }
0x1351   :  { %v1868_v35 = vpop.permute.xlu0 %1867 }
0x1352   :  { %v1870_v9 = vmul.f32 %v1868_v35, %v1842_v7 }
0x1354   :  { %1872 = vrot.lane.b32.xlu2 %v1870_v9, %s3760_s21 }
0x136d   :  { %v1879_v0 = vpop.permute.xlu1 %1878 }
0x136e   :  { %v1881_v43 = vmul.f32 %v1879_v0, %v1861_v46 }
0x1370   :  { %1883 = vrot.lane.b32.xlu0 %v1881_v43, %s3760_s21 }
0x13ae   :  { %v1873_v53 = vpop.permute.xlu2 %1872 }
0x13af   :  { %v4423_v8 = vadd.f32 %v1873_v53, %v1865_v49 }
0x13b1   :  { %3549 = vtanh.f32 %v4423_v8 }
0x13b7   :  { %v3550_v3 = vpop.eup %3549 }
0x13b8   :  { %1889 = vrot.lane.b32.xlu1 %v3550_v3, %s3760_s21 }
0x13e2   :  { %v1884_v35 = vpop.permute.xlu0 %1883 }
0x13e3   :  { %v4428_v9 = vadd.f32 %v1884_v35, %v1876_v60 }
0x13e5   :  { %3551 = vtanh.f32 %v4428_v9 }
0x13eb   :  { %v3552_v17 = vpop.eup %3551 }
0x13ec   :  { %1895 = vrot.lane.b32.xlu2 %v3552_v17, %s3760_s21 }
0x142a   :  { %v1890_v29 = vpop.permute.xlu1 %1889 }
0x142b   :  { %v4432_v37 = vmul.f32 %v1890_v29, %v1842_v7 }
0x142d   :  { %1923 = vrot.lane.b32.xlu0 %v4432_v37, %s3761_s1 }
0x1446   :  { %v1896_v33 = vpop.permute.xlu2 %1895 }
0x1447   :  { %v4436_v12 = vmul.f32 %v1896_v33, %v1861_v46 }
0x1449   :  { %1949 = vrot.lane.b32.xlu1 %v4436_v12, %s3761_s1 }
0x149f   :  { %v1924_v62 = vpop.permute.xlu0 %1923 }
0x14a0   :  { %3292 = vmatmul.msk.f32.vlgmr.msra.gmra.mxu2 %vm58_vm0, %v1924_v62 }
0x14a1   :  { %2235 = vmatpush.msra.mxu2 %v4188_v38  ;;  %v1401_v38 = vadd.f32 %v1400_v58, %v3978_v34 }
0x14a3   :  { %2236 = vmatpush.msra.mxu2 %v4194_v15 }
0x14a5   :  { %2237 = vmatpush.msra.mxu2 %v4200_v40 }
0x14a7   :  { %2238 = vmatpush.msra.mxu2 %v4206_v16  ;;  %v1469_v16 = vadd.f32 %v4290_v26, %v4019_v51 }
0x14bb   :  { %v1950_v7 = vpop.permute.xlu1 %1949 }
0x14bc   :  { %3293 = vmatmul.msk.f32.vlgmr.msra.gmra.mxu3 %vm58_vm0, %v1950_v7 }
0x14bd   :  { %2261 = vmatpush.msra.mxu3 %v4213_v45 }
0x14bf   :  { %2262 = vmatpush.msra.mxu3 %v4219_v48 }
0x14c1   :  { %2263 = vmatpush.msra.mxu3 %v4273_v50 }
0x14c3   :  { %2264 = vmatpush.msra.mxu3 %v4279_v61 }
0x1523   :  { %v1944_v19 = vpop.f32.mrf.mxu2 }
0x1524   :  { %v1947_v15 = vadd.f32 %v1944_v19, %v1401_v38 }
0x1526   :  { %3553 = vtanh.f32 %v1947_v15  ;;  %v3294_v27 = vmul.f32 -1.442695, %v1947_v15 }
0x152c   :  { %v3554_v40 = vpop.eup %3553 }
0x152d   :  { %2016 = vrot.lane.b32.xlu2 %v3554_v40, %s3760_s21 }
0x153f   :  { %v1970_v59 = vpop.f32.mrf.mxu3 }
0x1540   :  { %v1973_v45 = vadd.f32 %v1970_v59, %v1469_v16 }
0x1542   :  { %3555 = vtanh.f32 %v1973_v45  ;;  %v3295_v7 = vmul.f32 -1.442695, %v1973_v45 }
0x1543   :  { %3557 = vpow2.f32 %v3294_v27 }
0x1548   :  { %v3556_v48 = vpop.eup %3555 }
0x1549   :  { %2027 = vrot.lane.b32.xlu0 %v3556_v48, %s3760_s21  ;;  %v3558_v52 = vpop.eup %3557 }
0x154a   :  { %v1977_v0 = vadd.f32 1.0, %v3558_v52 }
0x154c   :  { %3559 = vrcp.f32 %v1977_v0  ;;  %v1989_v60 = vand.u32 2147483648, %v1977_v0  ;;  %vm1983_vm7 = vweird.f32 %v1977_v0  ;;  %v1987_v26 = vand.u32 2147483647, %v1977_v0 }
0x154d   :  { %3561 = vpow2.f32 %v3295_v7 }
0x154e   :  { %v1990_v17 = vor.u32 1.1754944e-38, %v1989_v60  ;;  %vm1988_vm9 = vcmp.eq.f32.partialorder %v1987_v26, 8.507059e+37 }
0x1552   :  { %v3560_v46 = vpop.eup %3559 }
0x1553   :  { %v1979_v43 = vmul.f32 %v3560_v46, %v1977_v0  ;;  %vm1984_vm6 = vweird.f32 %v3560_v46  ;;  %v3562_v58 = vpop.eup %3561 }
0x1554   :  { %vm1985_vm8 = vmor %vm1983_vm7, %vm1984_vm6  ;;  %v1996_v38 = vadd.f32 1.0, %v3562_v58 }
0x1555   :  { %v1980_v49 = vsub.f32 1.0, %v1979_v43 }
0x1556   :  { %3563 = vrcp.f32 %v1996_v38  ;;  %v2008_v48 = vand.u32 2147483648, %v1996_v38  ;;  %vm2002_vm11 = vweird.f32 %v1996_v38  ;;  %v2006_v27 = vand.u32 2147483647, %v1996_v38 }
0x1557   :  { %v1981_v53 = vmul.f32 %v3560_v46, %v1980_v49 }
0x1558   :  { %v2009_v0 = vor.u32 1.1754944e-38, %v2008_v48  ;;  %vm2007_vm13 = vcmp.eq.f32.partialorder %v2006_v27, 8.507059e+37  ;;  %v1403_v48 = vpop.f32.mrf.mxu0 }
0x1559   :  { %v1982_v3 = vadd.f32 %v3560_v46, %v1981_v53  ;;  %v1404_v27 = vadd.f32 %v1403_v48, %v3978_v34 }
0x155b   :  { %v1986_v35 = vsel %vm1985_vm8, %v3560_v46, %v1982_v3 }
0x155c   :  { %v1991_v29 = vsel %vm1988_vm9, %v1990_v17, %v1986_v35  ;;  %v3564_v19 = vpop.eup %3563 }
0x155d   :  { %v1998_v15 = vmul.f32 %v3564_v19, %v1996_v38  ;;  %vm2003_vm10 = vweird.f32 %v3564_v19  ;;  %v2014_v49 = vmul.f32 %v1991_v29, %v4423_v8  ;;  %v4479_v38 = vld [vmem:[%s4954_s5 + $0x18] sm:$0xff] }
0x155e   :  { %vm2004_vm12 = vmor %vm2002_vm11, %vm2003_vm10 }
0x155f   :  { %v1999_v40 = vsub.f32 1.0, %v1998_v15  ;;  %v4497_v15 = vld [vmem:[%s4954_s5] sm:$0xff] }
0x1561   :  { %v2000_v16 = vmul.f32 %v3564_v19, %v1999_v40 }
0x1563   :  { %v2001_v59 = vadd.f32 %v3564_v19, %v2000_v16  ;;  %v4504_v16 = vld [vmem:[%s4954_s5 + $0x38] sm:$0xff] }
0x1565   :  { %v2005_v52 = vsel %vm2004_vm12, %v3564_v19, %v2001_v59  ;;  %v4491_v19 = vld [vmem:[%s4954_s5 + $0x8] sm:$0xff]  ;;  %v4510_v59 = vld [vmem:[%s4954_s5 + $0x30] sm:$0xff] }
0x1566   :  { %v2010_v43 = vsel %vm2007_vm13, %v2009_v0, %v2005_v52 }
0x1567   :  { %v2025_v26 = vmul.f32 %v2010_v43, %v4428_v9 }
0x1587   :  { %v2017_v33 = vpop.permute.xlu2 %2016 }
0x1588   :  { %v2019_v62 = vmul.f32 %v2017_v33, %v1991_v29 }
0x158a   :  { %2021 = vrot.lane.b32.xlu1 %v2019_v62, %s3760_s21 }
0x15bb   :  { %v2028_v46 = vpop.permute.xlu0 %2027 }
0x15bc   :  { %v2030_v45 = vmul.f32 %v2028_v46, %v2010_v43 }
0x15be   :  { %2032 = vrot.lane.b32.xlu2 %v2030_v45, %s3760_s21 }
0x15fc   :  { %v2022_v53 = vpop.permute.xlu1 %2021 }
0x15fd   :  { %v4458_v3 = vadd.f32 %v2022_v53, %v2014_v49 }
0x15ff   :  { %3565 = vtanh.f32 %v4458_v3 }
0x1605   :  { %v3566_v60 = vpop.eup %3565 }
0x1606   :  { %2038 = vrot.lane.b32.xlu0 %v3566_v60, %s3760_s21 }
0x1618   :  { %v2033_v35 = vpop.permute.xlu2 %2032 }
0x1619   :  { %v4463_v17 = vadd.f32 %v2033_v35, %v2025_v26 }
0x161b   :  { %3567 = vtanh.f32 %v4463_v17 }
0x1621   :  { %v3568_v33 = vpop.eup %3567 }
0x1622   :  { %2044 = vrot.lane.b32.xlu1 %v3568_v33, %s3760_s21 }
0x1678   :  { %v2039_v62 = vpop.permute.xlu0 %2038 }
0x1679   :  { %v4467_v8 = vmul.f32 %v2039_v62, %v1991_v29  ;;  %v4485_v29 = vld [vmem:[%s4954_s5 + $0x10] sm:$0xff] }
0x167b   :  { %2071 = vrot.lane.b32.xlu2 %v4467_v8, %s3761_s1 }
0x1694   :  { %v2045_v7 = vpop.permute.xlu1 %2044 }
0x1695   :  { %v4471_v58 = vmul.f32 %v2045_v7, %v2010_v43  ;;  %v1466_v43 = vadd.f32 %v4288_v25, %v4019_v51 }
0x1697   :  { %2097 = vrot.lane.b32.xlu0 %v4471_v58, %s3761_s1 }
0x16d5   :  { %v2072_v9 = vpop.permute.xlu2 %2071 }
0x16d6   :  { %3298 = vmatmul.msk.f32.vlgmr.msrb.gmra.mxu2 %vm58_vm0, %v2072_v9 }
0x16d7   :  { %2383 = vmatpush.msrb.mxu2 %v4479_v38 }
0x16d9   :  { %2384 = vmatpush.msrb.mxu2 %v4485_v29 }
0x16db   :  { %2385 = vmatpush.msrb.mxu2 %v4491_v19 }
0x16dd   :  { %2386 = vmatpush.msrb.mxu2 %v4497_v15 }
0x1709   :  { %v2098_v40 = vpop.permute.xlu0 %2097 }
0x170a   :  { %3299 = vmatmul.msk.f32.vlgmr.msrb.gmra.mxu3 %vm58_vm0, %v2098_v40 }
0x170b   :  { %2409 = vmatpush.msrb.mxu3 %v4504_v16 }
0x170d   :  { %2410 = vmatpush.msrb.mxu3 %v4510_v59 }
0x170f   :  { %2411 = vmatpush.msrb.mxu3 %v4273_v50 }
0x1711   :  { %2412 = vmatpush.msrb.mxu3 %v4279_v61 }
0x1759   :  { %v2092_v52 = vpop.f32.mrf.mxu2 }
0x175a   :  { %v2095_v0 = vadd.f32 %v2092_v52, %v1404_v27 }
0x175c   :  { %3569 = vtanh.f32 %v2095_v0  ;;  %v3300_v50 = vmul.f32 -1.442695, %v2095_v0 }
0x1762   :  { %v3570_v46 = vpop.eup %3569 }
0x1763   :  { %2164 = vrot.lane.b32.xlu1 %v3570_v46, %s3760_s21 }
0x178d   :  { %v2118_v45 = vpop.f32.mrf.mxu3 }
0x178e   :  { %v2121_v49 = vadd.f32 %v2118_v45, %v1466_v43 }
0x1790   :  { %3571 = vtanh.f32 %v2121_v49  ;;  %v3301_v33 = vmul.f32 -1.442695, %v2121_v49 }
0x1791   :  { %3573 = vpow2.f32 %v3300_v50 }
0x1796   :  { %v3572_v53 = vpop.eup %3571 }
0x1797   :  { %2175 = vrot.lane.b32.xlu2 %v3572_v53, %s3760_s21  ;;  %v3574_v61 = vpop.eup %3573 }
0x1798   :  { %v2125_v60 = vadd.f32 1.0, %v3574_v61 }
0x179a   :  { %3575 = vrcp.f32 %v2125_v60  ;;  %v2137_v25 = vand.u32 2147483648, %v2125_v60  ;;  %vm2131_vm15 = vweird.f32 %v2125_v60  ;;  %v2135_v48 = vand.u32 2147483647, %v2125_v60 }
0x179b   :  { %3577 = vpow2.f32 %v3301_v33 }
0x179c   :  { %v2138_v0 = vor.u32 1.1754944e-38, %v2137_v25  ;;  %vm2136_vm2 = vcmp.eq.f32.partialorder %v2135_v48, 8.507059e+37 }
0x17a0   :  { %v3576_v26 = vpop.eup %3575 }
0x17a1   :  { %v2127_v35 = vmul.f32 %v3576_v26, %v2125_v60  ;;  %v3578_v9 = vpop.eup %3577  ;;  %vm2132_vm14 = vweird.f32 %v3576_v26 }
0x17a2   :  { %v2144_v27 = vadd.f32 1.0, %v3578_v9  ;;  %vm2133_vm1 = vmor %vm2131_vm15, %vm2132_vm14 }
0x17a3   :  { %v2128_v62 = vsub.f32 1.0, %v2127_v35 }
0x17a4   :  { %3579 = vrcp.f32 %v2144_v27  ;;  %v2156_v33 = vand.u32 2147483648, %v2144_v27  ;;  %vm2150_vm4 = vweird.f32 %v2144_v27  ;;  %v2154_v60 = vand.u32 2147483647, %v2144_v27 }
0x17a5   :  { %v2129_v7 = vmul.f32 %v3576_v26, %v2128_v62 }
0x17a6   :  { %vm2155_vm6 = vcmp.eq.f32.partialorder %v2154_v60, 8.507059e+37  ;;  %v1406_v60 = vpop.f32.mrf.mxu0 }
0x17a7   :  { %v2130_v40 = vadd.f32 %v3576_v26, %v2129_v7 }
0x17a9   :  { %v2134_v52 = vsel %vm2133_vm1, %v3576_v26, %v2130_v40  ;;  %v2157_v26 = vor.u32 1.1754944e-38, %v2156_v33  ;;  %v4557_v33 = vld [vmem:[%s4954_s5 + $0x20] sm:$0xff] }
0x17aa   :  { %v2139_v43 = vsel %vm2136_vm2, %v2138_v0, %v2134_v52  ;;  %v3580_v49 = vpop.eup %3579 }
0x17ab   :  { %v2146_v53 = vmul.f32 %v3580_v49, %v2144_v27  ;;  %vm2151_vm3 = vweird.f32 %v3580_v49  ;;  %v2162_v25 = vmul.f32 %v2139_v43, %v4458_v3 }
0x17ac   :  { %vm2152_vm5 = vmor %vm2150_vm4, %vm2151_vm3 }
0x17ad   :  { %v2147_v50 = vsub.f32 1.0, %v2146_v53 }
0x17af   :  { %v2148_v61 = vmul.f32 %v3580_v49, %v2147_v50 }
0x17b1   :  { %v2149_v35 = vadd.f32 %v3580_v49, %v2148_v61 }
0x17b3   :  { %v2153_v62 = vsel %vm2152_vm5, %v3580_v49, %v2149_v35  ;;  %v4551_v35 = vld [vmem:[%s4954_s5 + $0x28] sm:$0xff] }
0x17b4   :  { %v2158_v7 = vsel %vm2155_vm6, %v2157_v26, %v2153_v62  ;;  %v1407_v62 = vadd.f32 %v1406_v60, %v3978_v34 }
0x17b5   :  { %v2173_v27 = vmul.f32 %v2158_v7, %v4463_v17 }
0x17d5   :  { %v2165_v46 = vpop.permute.xlu1 %2164 }
0x17d6   :  { %v2167_v45 = vmul.f32 %v2165_v46, %v2139_v43 }
0x17d8   :  { %2169 = vrot.lane.b32.xlu0 %v2167_v45, %s3760_s21 }
0x17f1   :  { %v2176_v9 = vpop.permute.xlu2 %2175 }
0x17f2   :  { %v2178_v40 = vmul.f32 %v2176_v9, %v2158_v7 }
0x17f4   :  { %2180 = vrot.lane.b32.xlu1 %v2178_v40, %s3760_s21  ;;  %v1463_v40 = vadd.f32 %v4286_v23, %v4019_v51 }
0x184a   :  { %v2170_v48 = vpop.permute.xlu0 %2169 }
0x184b   :  { %v4523_v52 = vadd.f32 %v2170_v48, %v2162_v25 }
0x184d   :  { %3581 = vtanh.f32 %v4523_v52 }
0x1853   :  { %v3582_v0 = vpop.eup %3581 }
0x1854   :  { %2186 = vrot.lane.b32.xlu2 %v3582_v0, %s3760_s21 }
0x1866   :  { %v2181_v46 = vpop.permute.xlu1 %2180 }
0x1867   :  { %v4528_v45 = vadd.f32 %v2181_v46, %v2173_v27 }
0x1869   :  { %3583 = vtanh.f32 %v4528_v45 }
0x186f   :  { %v3584_v49 = vpop.eup %3583 }
0x1870   :  { %2192 = vrot.lane.b32.xlu0 %v3584_v49, %s3760_s21 }
0x18ae   :  { %v2187_v53 = vpop.permute.xlu2 %2186 }
0x18af   :  { %v4532_v3 = vmul.f32 %v2187_v53, %v2139_v43 }
0x18b1   :  { %2219 = vrot.lane.b32.xlu1 %v4532_v3, %s3761_s1 }
0x18e2   :  { %v2193_v50 = vpop.permute.xlu0 %2192 }
0x18e3   :  { %v4536_v61 = vmul.f32 %v2193_v50, %v2158_v7 }
0x18e5   :  { %2245 = vrot.lane.b32.xlu2 %v4536_v61, %s3761_s1 }
0x1923   :  { %v2220_v17 = vpop.permute.xlu1 %2219 }
0x1924   :  { %3304 = vmatmul.msk.f32.vlgmr.msra.gmra.mxu2 %vm58_vm0, %v2220_v17 }
0x1925   :  { %2515 = vmatpush.msra.mxu2 %v4479_v38 }
0x1927   :  { %2516 = vmatpush.msra.mxu2 %v4485_v29 }
0x1929   :  { %2517 = vmatpush.msra.mxu2 %v4491_v19 }
0x192b   :  { %2518 = vmatpush.msra.mxu2 %v4497_v15 }
0x193f   :  { %v2246_v43 = vpop.permute.xlu2 %2245 }
0x1940   :  { %3305 = vmatmul.msk.f32.vlgmr.msra.gmra.mxu3 %vm58_vm0, %v2246_v43 }
0x1941   :  { %2541 = vmatpush.msra.mxu3 %v4504_v16 }
0x1943   :  { %2542 = vmatpush.msra.mxu3 %v4510_v59 }
0x1945   :  { %2543 = vmatpush.msra.mxu3 %v4551_v35 }
0x1947   :  { %2544 = vmatpush.msra.mxu3 %v4557_v33 }
0x19a7   :  { %v2240_v26 = vpop.f32.mrf.mxu2 }
0x19a8   :  { %v2243_v7 = vadd.f32 %v2240_v26, %v1407_v62 }
0x19aa   :  { %3585 = vtanh.f32 %v2243_v7  ;;  %v3306_v27 = vmul.f32 -1.442695, %v2243_v7 }
0x19b0   :  { %v3586_v9 = vpop.eup %3585 }
0x19b1   :  { %2312 = vrot.lane.b32.xlu0 %v3586_v9, %s3760_s21 }
0x19c3   :  { %v2266_v25 = vpop.f32.mrf.mxu3 }
0x19c4   :  { %v2269_v48 = vadd.f32 %v2266_v25, %v1463_v40 }
0x19c6   :  { %3587 = vtanh.f32 %v2269_v48  ;;  %v3307_v17 = vmul.f32 -1.442695, %v2269_v48 }
0x19c7   :  { %3589 = vpow2.f32 %v3306_v27 }
0x19cc   :  { %v3588_v0 = vpop.eup %3587 }
0x19cd   :  { %2323 = vrot.lane.b32.xlu1 %v3588_v0, %s3760_s21  ;;  %v3590_v46 = vpop.eup %3589 }
0x19ce   :  { %v2273_v49 = vadd.f32 1.0, %v3590_v46 }
0x19d0   :  { %3591 = vrcp.f32 %v2273_v49  ;;  %v2285_v23 = vand.u32 2147483648, %v2273_v49  ;;  %vm2279_vm8 = vweird.f32 %v2273_v49  ;;  %v2283_v9 = vand.u32 2147483647, %v2273_v49 }
0x19d1   :  { %3593 = vpow2.f32 %v3307_v17 }
0x19d2   :  { %v2286_v7 = vor.u32 1.1754944e-38, %v2285_v23  ;;  %vm2284_vm10 = vcmp.eq.f32.partialorder %v2283_v9, 8.507059e+37 }
0x19d6   :  { %v3592_v53 = vpop.eup %3591 }
0x19d7   :  { %v2275_v50 = vmul.f32 %v3592_v53, %v2273_v49  ;;  %v3594_v62 = vpop.eup %3593  ;;  %vm2280_vm7 = vweird.f32 %v3592_v53 }
0x19d8   :  { %v2292_v40 = vadd.f32 1.0, %v3594_v62  ;;  %vm2281_vm9 = vmor %vm2279_vm8, %vm2280_vm7 }
0x19d9   :  { %v2276_v43 = vsub.f32 1.0, %v2275_v50 }
0x19da   :  { %3595 = vrcp.f32 %v2292_v40  ;;  %v2304_v13 = vand.u32 2147483648, %v2292_v40  ;;  %vm2298_vm12 = vweird.f32 %v2292_v40  ;;  %v2302_v49 = vand.u32 2147483647, %v2292_v40 }
0x19db   :  { %v2277_v60 = vmul.f32 %v3592_v53, %v2276_v43 }
0x19dc   :  { %vm2303_vm14 = vcmp.eq.f32.partialorder %v2302_v49, 8.507059e+37  ;;  %v1409_v49 = vpop.f32.mrf.mxu0 }
0x19dd   :  { %v2278_v26 = vadd.f32 %v3592_v53, %v2277_v60 }
0x19df   :  { %v2282_v25 = vsel %vm2281_vm9, %v3592_v53, %v2278_v26  ;;  %v2305_v53 = vor.u32 1.1754944e-38, %v2304_v13 }
0x19e0   :  { %v2287_v27 = vsel %vm2284_vm10, %v2286_v7, %v2282_v25  ;;  %v3596_v48 = vpop.eup %3595 }
0x19e1   :  { %v2294_v50 = vmul.f32 %v3596_v48, %v2292_v40  ;;  %vm2299_vm11 = vweird.f32 %v3596_v48  ;;  %v2310_v25 = vmul.f32 %v2287_v27, %v4523_v52 }
0x19e2   :  { %vm2300_vm13 = vmor %vm2298_vm12, %vm2299_vm11 }
0x19e3   :  { %v2295_v17 = vsub.f32 1.0, %v2294_v50 }
0x19e5   :  { %v2296_v43 = vmul.f32 %v3596_v48, %v2295_v17 }
0x19e7   :  { %v2297_v60 = vadd.f32 %v3596_v48, %v2296_v43 }
0x19e9   :  { %v2301_v62 = vsel %vm2300_vm13, %v3596_v48, %v2297_v60 }
0x19ea   :  { %v2306_v23 = vsel %vm2303_vm14, %v2305_v53, %v2301_v62  ;;  %v1410_v62 = vadd.f32 %v1409_v49, %v3978_v34 }
0x19eb   :  { %v2321_v40 = vmul.f32 %v2306_v23, %v4528_v45 }
0x1a23   :  { %v2313_v0 = vpop.permute.xlu0 %2312 }
0x1a24   :  { %v2315_v46 = vmul.f32 %v2313_v0, %v2287_v27 }
0x1a26   :  { %2317 = vrot.lane.b32.xlu2 %v2315_v46, %s3760_s21 }
0x1a3f   :  { %v2324_v26 = vpop.permute.xlu1 %2323 }
0x1a40   :  { %v2326_v9 = vmul.f32 %v2324_v26, %v2306_v23 }
0x1a42   :  { %2328 = vrot.lane.b32.xlu0 %v2326_v9, %s3760_s21  ;;  %v1460_v9 = vadd.f32 %v4284_v22, %v4019_v51 }
0x1a80   :  { %v2318_v7 = vpop.permute.xlu2 %2317 }
0x1a81   :  { %v4568_v0 = vadd.f32 %v2318_v7, %v2310_v25 }
0x1a83   :  { %3597 = vtanh.f32 %v4568_v0 }
0x1a89   :  { %v3598_v46 = vpop.eup %3597 }
0x1a8a   :  { %2334 = vrot.lane.b32.xlu1 %v3598_v46, %s3760_s21 }
0x1ab4   :  { %v2329_v48 = vpop.permute.xlu0 %2328 }
0x1ab5   :  { %v4573_v13 = vadd.f32 %v2329_v48, %v2321_v40 }
0x1ab7   :  { %3599 = vtanh.f32 %v4573_v13 }
0x1abd   :  { %v3600_v50 = vpop.eup %3599 }
0x1abe   :  { %2340 = vrot.lane.b32.xlu2 %v3600_v50, %s3760_s21 }
0x1afc   :  { %v2335_v17 = vpop.permute.xlu1 %2334 }
0x1afd   :  { %v4577_v52 = vmul.f32 %v2335_v17, %v2287_v27 }
0x1aff   :  { %2367 = vrot.lane.b32.xlu0 %v4577_v52, %s3761_s1 }
0x1b18   :  { %v2341_v43 = vpop.permute.xlu2 %2340 }
0x1b19   :  { %v4581_v60 = vmul.f32 %v2341_v43, %v2306_v23 }
0x1b1b   :  { %2393 = vrot.lane.b32.xlu1 %v4581_v60, %s3761_s1 }
0x1b71   :  { %v2368_v45 = vpop.permute.xlu0 %2367 }
0x1b72   :  { %3310 = vmatmul.msk.f32.vlgmr.msrb.gmra.mxu2 %vm58_vm0, %v2368_v45 }
0x1b73   :  { %2647 = vmatpush.msrb.mxu2 %v4479_v38 }
0x1b75   :  { %2648 = vmatpush.msrb.mxu2 %v4485_v29 }
0x1b77   :  { %2649 = vmatpush.msrb.mxu2 %v4491_v19 }
0x1b79   :  { %2650 = vmatpush.msrb.mxu2 %v4497_v15 }
0x1b8d   :  { %v2394_v27 = vpop.permute.xlu1 %2393 }
0x1b8e   :  { %3311 = vmatmul.msk.f32.vlgmr.msrb.gmra.mxu3 %vm58_vm0, %v2394_v27 }
0x1b8f   :  { %2673 = vmatpush.msrb.mxu3 %v4504_v16 }
0x1b91   :  { %2674 = vmatpush.msrb.mxu3 %v4510_v59 }
0x1b93   :  { %2675 = vmatpush.msrb.mxu3 %v4551_v35 }
0x1b95   :  { %2676 = vmatpush.msrb.mxu3 %v4557_v33 }
0x1bf5   :  { %v2388_v53 = vpop.f32.mrf.mxu2 }
0x1bf6   :  { %v2391_v26 = vadd.f32 %v2388_v53, %v1410_v62 }
0x1bf8   :  { %3601 = vtanh.f32 %v2391_v26  ;;  %v3312_v40 = vmul.f32 -1.442695, %v2391_v26 }
0x1bfe   :  { %v3602_v23 = vpop.eup %3601 }
0x1bff   :  { %2460 = vrot.lane.b32.xlu2 %v3602_v23, %s3760_s21 }
0x1c11   :  { %v2414_v25 = vpop.f32.mrf.mxu3 }
0x1c12   :  { %v2417_v7 = vadd.f32 %v2414_v25, %v1460_v9 }
0x1c14   :  { %3603 = vtanh.f32 %v2417_v7 }
0x1c15   :  { %3605 = vpow2.f32 %v3312_v40 }
0x1c1a   :  { %v3604_v46 = vpop.eup %3603 }
0x1c1b   :  { %2471 = vrot.lane.b32.xlu0 %v3604_v46, %s3760_s21  ;;  %v3606_v48 = vpop.eup %3605  ;;  %v3313_v46 = vmul.f32 -1.442695, %v2417_v7 }
0x1c1c   :  { %v2421_v50 = vadd.f32 1.0, %v3606_v48 }
0x1c1e   :  { %3607 = vrcp.f32 %v2421_v50  ;;  %v2433_v62 = vand.u32 2147483648, %v2421_v50  ;;  %vm2427_vm1 = vweird.f32 %v2421_v50  ;;  %v2431_v22 = vand.u32 2147483647, %v2421_v50 }
0x1c1f   :  { %3609 = vpow2.f32 %v3313_v46 }
0x1c20   :  { %v2434_v23 = vor.u32 1.1754944e-38, %v2433_v62  ;;  %vm2432_vm3 = vcmp.eq.f32.partialorder %v2431_v22, 8.507059e+37 }
0x1c24   :  { %v3608_v17 = vpop.eup %3607 }
0x1c25   :  { %v2423_v43 = vmul.f32 %v3608_v17, %v2421_v50  ;;  %vm2428_vm15 = vweird.f32 %v3608_v17  ;;  %v3610_v40 = vpop.eup %3609 }
0x1c26   :  { %vm2429_vm2 = vmor %vm2427_vm1, %vm2428_vm15  ;;  %v2440_v48 = vadd.f32 1.0, %v3610_v40 }
0x1c27   :  { %v2424_v45 = vsub.f32 1.0, %v2423_v43 }
0x1c28   :  { %3611 = vrcp.f32 %v2440_v48  ;;  %v2452_v50 = vand.u32 2147483648, %v2440_v48  ;;  %vm2446_vm5 = vweird.f32 %v2440_v48 }
0x1c29   :  { %v2425_v27 = vmul.f32 %v3608_v17, %v2424_v45 }
0x1c2a   :  { %v2453_v62 = vor.u32 1.1754944e-38, %v2452_v50  ;;  %v1412_v50 = vpop.f32.mrf.mxu0 }
0x1c2b   :  { %v2426_v49 = vadd.f32 %v3608_v17, %v2425_v27 }
0x1c2d   :  { %v2430_v53 = vsel %vm2429_vm2, %v3608_v17, %v2426_v49  ;;  %v2450_v17 = vand.u32 2147483647, %v2440_v48 }
0x1c2e   :  { %v2435_v9 = vsel %vm2432_vm3, %v2434_v23, %v2430_v53  ;;  %v3612_v43 = vpop.eup %3611 }
0x1c2f   :  { %v2442_v45 = vmul.f32 %v3612_v43, %v2440_v48  ;;  %vm2447_vm4 = vweird.f32 %v3612_v43  ;;  %vm2451_vm7 = vcmp.eq.f32.partialorder %v2450_v17, 8.507059e+37  ;;  %v2458_v23 = vmul.f32 %v2435_v9, %v4568_v0 }
0x1c30   :  { %vm2448_vm6 = vmor %vm2446_vm5, %vm2447_vm4  ;;  %v1413_v17 = vadd.f32 %v1412_v50, %v3978_v34 }
0x1c31   :  { %v2443_v27 = vsub.f32 1.0, %v2442_v45 }
0x1c33   :  { %v2444_v42 = vmul.f32 %v3612_v43, %v2443_v27 }
0x1c35   :  { %v2445_v4 = vadd.f32 %v3612_v43, %v2444_v42 }
0x1c37   :  { %v2449_v49 = vsel %vm2448_vm6, %v3612_v43, %v2445_v4 }
0x1c38   :  { %v2454_v53 = vsel %vm2451_vm7, %v2453_v62, %v2449_v49 }
0x1c39   :  { %v2469_v46 = vmul.f32 %v2454_v53, %v4573_v13 }
0x1c59   :  { %v2461_v25 = vpop.permute.xlu2 %2460 }
0x1c5a   :  { %v2463_v26 = vmul.f32 %v2461_v25, %v2435_v9 }
0x1c5c   :  { %2465 = vrot.lane.b32.xlu1 %v2463_v26, %s3760_s21 }
0x1c8d   :  { %v2472_v22 = vpop.permute.xlu0 %2471 }
0x1c8e   :  { %v2474_v7 = vmul.f32 %v2472_v22, %v2454_v53 }
0x1c90   :  { %2476 = vrot.lane.b32.xlu2 %v2474_v7, %s3760_s21 }
0x1cce   :  { %v2466_v25 = vpop.permute.xlu1 %2465 }
0x1ccf   :  { %v4603_v26 = vadd.f32 %v2466_v25, %v2458_v23 }
0x1cd1   :  { %3613 = vtanh.f32 %v4603_v26 }
0x1cd7   :  { %v3614_v42 = vpop.eup %3613 }
0x1cd8   :  { %2482 = vrot.lane.b32.xlu0 %v3614_v42, %s3760_s21 }
0x1cea   :  { %v2477_v4 = vpop.permute.xlu2 %2476 }
0x1ceb   :  { %v4608_v40 = vadd.f32 %v2477_v4, %v2469_v46 }
0x1ced   :  { %3615 = vtanh.f32 %v4608_v40 }
0x1cf3   :  { %v3616_v48 = vpop.eup %3615 }
0x1cf4   :  { %2488 = vrot.lane.b32.xlu1 %v3616_v48, %s3760_s21 }
0x1d4a   :  { %v2483_v43 = vpop.permute.xlu0 %2482 }
0x1d4b   :  { %v4612_v0 = vmul.f32 %v2483_v43, %v2435_v9 }
0x1d4d   :  { %2499 = vrot.lane.b32.xlu2 %v4612_v0, %s3761_s1 }
0x1d66   :  { %v2489_v45 = vpop.permute.xlu1 %2488 }
0x1d67   :  { %v4616_v27 = vmul.f32 %v2489_v45, %v2454_v53  ;;  %v1457_v53 = vadd.f32 %v4282_v21, %v4019_v51 }
0x1d69   :  { %2525 = vrot.lane.b32.xlu0 %v4616_v27, %s3761_s1 }
0x1da7   :  { %v2500_v13 = vpop.permute.xlu2 %2499 }
0x1da8   :  { %3314 = vmatmul.msk.f32.vlgmr.msra.gmra.mxu2 %vm58_vm0, %v2500_v13 }
0x1da9   :  { %2779 = vmatpush.msra.mxu2 %v4479_v38 }
0x1dab   :  { %2780 = vmatpush.msra.mxu2 %v4485_v29 }
0x1dad   :  { %2781 = vmatpush.msra.mxu2 %v4491_v19 }
0x1daf   :  { %2782 = vmatpush.msra.mxu2 %v4497_v15 }
0x1ddb   :  { %v2526_v9 = vpop.permute.xlu0 %2525 }
0x1ddc   :  { %3315 = vmatmul.msk.f32.vlgmr.msra.gmra.mxu3 %vm58_vm0, %v2526_v9 }
0x1ddd   :  { %2805 = vmatpush.msra.mxu3 %v4504_v16 }
0x1ddf   :  { %2806 = vmatpush.msra.mxu3 %v4510_v59 }
0x1de1   :  { %2807 = vmatpush.msra.mxu3 %v4551_v35 }
0x1de3   :  { %2808 = vmatpush.msra.mxu3 %v4557_v33 }
0x1e2b   :  { %v2520_v49 = vpop.f32.mrf.mxu2 }
0x1e2c   :  { %v2523_v62 = vadd.f32 %v2520_v49, %v1413_v17 }
0x1e2e   :  { %3617 = vtanh.f32 %v2523_v62  ;;  %v3316_v42 = vmul.f32 -1.442695, %v2523_v62 }
0x1e34   :  { %v3618_v22 = vpop.eup %3617 }
0x1e35   :  { %2592 = vrot.lane.b32.xlu1 %v3618_v22, %s3760_s21 }
0x1e5f   :  { %v2546_v7 = vpop.f32.mrf.mxu3 }
0x1e60   :  { %v2549_v23 = vadd.f32 %v2546_v7, %v1457_v53 }
0x1e62   :  { %3619 = vtanh.f32 %v2549_v23  ;;  %v3317_v45 = vmul.f32 -1.442695, %v2549_v23 }
0x1e63   :  { %3621 = vpow2.f32 %v3316_v42 }
0x1e68   :  { %v3620_v25 = vpop.eup %3619 }
0x1e69   :  { %2603 = vrot.lane.b32.xlu2 %v3620_v25, %s3760_s21  ;;  %v3622_v46 = vpop.eup %3621 }
0x1e6a   :  { %v2553_v4 = vadd.f32 1.0, %v3622_v46 }
0x1e6c   :  { %3623 = vrcp.f32 %v2553_v4  ;;  %v2565_v21 = vand.u32 2147483648, %v2553_v4  ;;  %vm2559_vm9 = vweird.f32 %v2553_v4  ;;  %v2563_v49 = vand.u32 2147483647, %v2553_v4 }
0x1e6d   :  { %3625 = vpow2.f32 %v3317_v45 }
0x1e6e   :  { %v2566_v62 = vor.u32 1.1754944e-38, %v2565_v21  ;;  %vm2564_vm11 = vcmp.eq.f32.partialorder %v2563_v49, 8.507059e+37 }
0x1e72   :  { %v3624_v48 = vpop.eup %3623 }
0x1e73   :  { %v2555_v43 = vmul.f32 %v3624_v48, %v2553_v4  ;;  %v3626_v50 = vpop.eup %3625  ;;  %vm2560_vm8 = vweird.f32 %v3624_v48 }
0x1e74   :  { %v2572_v22 = vadd.f32 1.0, %v3626_v50  ;;  %vm2561_vm10 = vmor %vm2559_vm9, %vm2560_vm8 }
0x1e75   :  { %v2556_v13 = vsub.f32 1.0, %v2555_v43 }
0x1e76   :  { %3627 = vrcp.f32 %v2572_v22  ;;  %vm2578_vm13 = vweird.f32 %v2572_v22  ;;  %v2582_v4 = vand.u32 2147483647, %v2572_v22 }
0x1e77   :  { %v2557_v9 = vmul.f32 %v3624_v48, %v2556_v13 }
0x1e78   :  { %vm2583_vm15 = vcmp.eq.f32.partialorder %v2582_v4, 8.507059e+37  ;;  %v1415_v4 = vpop.f32.mrf.mxu0 }
0x1e79   :  { %v2558_v17 = vadd.f32 %v3624_v48, %v2557_v9  ;;  %v2584_v9 = vand.u32 2147483648, %v2572_v22 }
0x1e7b   :  { %v2562_v53 = vsel %vm2561_vm10, %v3624_v48, %v2558_v17  ;;  %v2585_v48 = vor.u32 1.1754944e-38, %v2584_v9 }
0x1e7c   :  { %v2567_v25 = vsel %vm2564_vm11, %v2566_v62, %v2562_v53  ;;  %v3628_v23 = vpop.eup %3627 }
0x1e7d   :  { %v2574_v46 = vmul.f32 %v3628_v23, %v2572_v22  ;;  %vm2579_vm12 = vweird.f32 %v3628_v23  ;;  %v2590_v53 = vmul.f32 %v2567_v25, %v4603_v26 }
0x1e7e   :  { %vm2580_vm14 = vmor %vm2578_vm13, %vm2579_vm12 }
0x1e7f   :  { %v2575_v43 = vsub.f32 1.0, %v2574_v46 }
0x1e81   :  { %v2576_v45 = vmul.f32 %v3628_v23, %v2575_v43 }
0x1e83   :  { %v2577_v13 = vadd.f32 %v3628_v23, %v2576_v45 }
0x1e85   :  { %v2581_v50 = vsel %vm2580_vm14, %v3628_v23, %v2577_v13 }
0x1e86   :  { %v2586_v17 = vsel %vm2583_vm15, %v2585_v48, %v2581_v50  ;;  %v1416_v50 = vadd.f32 %v1415_v4, %v3978_v34 }
0x1e87   :  { %v2601_v22 = vmul.f32 %v2586_v17, %v4608_v40 }
0x1ea7   :  { %v2593_v7 = vpop.permute.xlu1 %2592 }
0x1ea8   :  { %v2595_v42 = vmul.f32 %v2593_v7, %v2567_v25 }
0x1eaa   :  { %2597 = vrot.lane.b32.xlu0 %v2595_v42, %s3760_s21 }
0x1ec3   :  { %v2604_v21 = vpop.permute.xlu2 %2603 }
0x1ec4   :  { %v2606_v49 = vmul.f32 %v2604_v21, %v2586_v17 }
0x1ec6   :  { %2608 = vrot.lane.b32.xlu1 %v2606_v49, %s3760_s21  ;;  %v1454_v49 = vadd.f32 %v4265_v14, %v4019_v51 }
0x1f1c   :  { %v2598_v62 = vpop.permute.xlu0 %2597 }
0x1f1d   :  { %v4638_v7 = vadd.f32 %v2598_v62, %v2590_v53 }
0x1f1f   :  { %3629 = vtanh.f32 %v4638_v7 }
0x1f25   :  { %v3630_v42 = vpop.eup %3629 }
0x1f26   :  { %2614 = vrot.lane.b32.xlu2 %v3630_v42, %s3760_s21 }
0x1f38   :  { %v2609_v23 = vpop.permute.xlu1 %2608 }
0x1f39   :  { %v4643_v46 = vadd.f32 %v2609_v23, %v2601_v22 }
0x1f3b   :  { %3631 = vtanh.f32 %v4643_v46 }
0x1f41   :  { %v3632_v43 = vpop.eup %3631 }
0x1f42   :  { %2620 = vrot.lane.b32.xlu0 %v3632_v43, %s3760_s21 }
0x1f80   :  { %v2615_v45 = vpop.permute.xlu2 %2614 }
0x1f81   :  { %v4647_v26 = vmul.f32 %v2615_v45, %v2567_v25 }
0x1f83   :  { %2631 = vrot.lane.b32.xlu1 %v4647_v26, %s3761_s1 }
0x1fb4   :  { %v2621_v13 = vpop.permute.xlu0 %2620 }
0x1fb5   :  { %v4651_v9 = vmul.f32 %v2621_v13, %v2586_v17 }
0x1fb7   :  { %2657 = vrot.lane.b32.xlu2 %v4651_v9, %s3761_s1 }
0x1ff5   :  { %v2632_v40 = vpop.permute.xlu1 %2631 }
0x1ff6   :  { %3318 = vmatmul.msk.f32.vlgmr.msrb.gmra.mxu2 %vm58_vm0, %v2632_v40 }
0x1ff7   :  { %2911 = vmatpush.msrb.mxu2 %v4479_v38 }
0x1ff9   :  { %2912 = vmatpush.msrb.mxu2 %v4485_v29 }
0x1ffb   :  { %2913 = vmatpush.msrb.mxu2 %v4491_v19 }
0x1ffd   :  { %2914 = vmatpush.msrb.mxu2 %v4497_v15 }
0x2011   :  { %v2658_v25 = vpop.permute.xlu2 %2657 }
0x2012   :  { %3319 = vmatmul.msk.f32.vlgmr.msrb.gmra.mxu3 %vm58_vm0, %v2658_v25 }
0x2013   :  { %2937 = vmatpush.msrb.mxu3 %v4504_v16 }
0x2015   :  { %2938 = vmatpush.msrb.mxu3 %v4510_v59 }
0x2017   :  { %2939 = vmatpush.msrb.mxu3 %v4551_v35 }
0x2019   :  { %2940 = vmatpush.msrb.mxu3 %v4557_v33 }
0x2079   :  { %v2652_v48 = vpop.f32.mrf.mxu2 }
0x207a   :  { %v2655_v17 = vadd.f32 %v2652_v48, %v1416_v50 }
0x207c   :  { %3633 = vtanh.f32 %v2655_v17  ;;  %v3320_v22 = vmul.f32 -1.442695, %v2655_v17 }
0x2082   :  { %v3634_v21 = vpop.eup %3633 }
0x2083   :  { %2724 = vrot.lane.b32.xlu0 %v3634_v21, %s3760_s21 }
0x2095   :  { %v2678_v53 = vpop.f32.mrf.mxu3 }
0x2096   :  { %v2681_v62 = vadd.f32 %v2678_v53, %v1454_v49 }
0x2098   :  { %3635 = vtanh.f32 %v2681_v62  ;;  %v3321_v40 = vmul.f32 -1.442695, %v2681_v62 }
0x2099   :  { %3637 = vpow2.f32 %v3320_v22 }
0x209e   :  { %v3636_v42 = vpop.eup %3635 }
0x209f   :  { %2735 = vrot.lane.b32.xlu1 %v3636_v42, %s3760_s21  ;;  %v3638_v23 = vpop.eup %3637 }
0x20a0   :  { %v2685_v43 = vadd.f32 1.0, %v3638_v23 }
0x20a2   :  { %3639 = vrcp.f32 %v2685_v43  ;;  %v2697_v14 = vand.u32 2147483648, %v2685_v43  ;;  %vm2691_vm2 = vweird.f32 %v2685_v43  ;;  %v2695_v21 = vand.u32 2147483647, %v2685_v43 }
0x20a3   :  { %3641 = vpow2.f32 %v3321_v40 }
0x20a4   :  { %v2698_v17 = vor.u32 1.1754944e-38, %v2697_v14  ;;  %vm2696_vm4 = vcmp.eq.f32.partialorder %v2695_v21, 8.507059e+37 }
0x20a8   :  { %v3640_v45 = vpop.eup %3639 }
0x20a9   :  { %v2687_v13 = vmul.f32 %v3640_v45, %v2685_v43  ;;  %v3642_v50 = vpop.eup %3641  ;;  %vm2692_vm1 = vweird.f32 %v3640_v45 }
0x20aa   :  { %v2704_v49 = vadd.f32 1.0, %v3642_v50  ;;  %vm2693_vm3 = vmor %vm2691_vm2, %vm2692_vm1 }
0x20ab   :  { %v2688_v25 = vsub.f32 1.0, %v2687_v13 }
0x20ac   :  { %3643 = vrcp.f32 %v2704_v49  ;;  %v2716_v11 = vand.u32 2147483648, %v2704_v49  ;;  %vm2710_vm6 = vweird.f32 %v2704_v49  ;;  %v2714_v43 = vand.u32 2147483647, %v2704_v49 }
0x20ad   :  { %v2689_v4 = vmul.f32 %v3640_v45, %v2688_v25 }
0x20ae   :  { %vm2715_vm8 = vcmp.eq.f32.partialorder %v2714_v43, 8.507059e+37  ;;  %v1418_v43 = vpop.f32.mrf.mxu0 }
0x20af   :  { %v2690_v48 = vadd.f32 %v3640_v45, %v2689_v4 }
0x20b1   :  { %v2694_v53 = vsel %vm2693_vm3, %v3640_v45, %v2690_v48  ;;  %v2717_v45 = vor.u32 1.1754944e-38, %v2716_v11 }
0x20b2   :  { %v2699_v22 = vsel %vm2696_vm4, %v2698_v17, %v2694_v53  ;;  %v3644_v62 = vpop.eup %3643 }
0x20b3   :  { %v2706_v13 = vmul.f32 %v3644_v62, %v2704_v49  ;;  %vm2711_vm5 = vweird.f32 %v3644_v62  ;;  %v2722_v53 = vmul.f32 %v2699_v22, %v4638_v7 }
0x20b4   :  { %vm2712_vm7 = vmor %vm2710_vm6, %vm2711_vm5 }
0x20b5   :  { %v2707_v40 = vsub.f32 1.0, %v2706_v13 }
0x20b7   :  { %v2708_v25 = vmul.f32 %v3644_v62, %v2707_v40 }
0x20b9   :  { %v2709_v4 = vadd.f32 %v3644_v62, %v2708_v25 }
0x20bb   :  { %v2713_v50 = vsel %vm2712_vm7, %v3644_v62, %v2709_v4 }
0x20bc   :  { %v2718_v14 = vsel %vm2715_vm8, %v2717_v45, %v2713_v50 }
0x20bd   :  { %v2733_v49 = vmul.f32 %v2718_v14, %v4643_v46 }
0x20f5   :  { %v2725_v42 = vpop.permute.xlu0 %2724 }
0x20f6   :  { %v2727_v23 = vmul.f32 %v2725_v42, %v2699_v22 }
0x20f8   :  { %2729 = vrot.lane.b32.xlu2 %v2727_v23, %s3760_s21 }
0x2111   :  { %v2736_v48 = vpop.permute.xlu1 %2735 }
0x2112   :  { %v2738_v21 = vmul.f32 %v2736_v48, %v2718_v14 }
0x2114   :  { %2740 = vrot.lane.b32.xlu0 %v2738_v21, %s3760_s21 }
0x2152   :  { %v2730_v17 = vpop.permute.xlu2 %2729 }
0x2153   :  { %v4673_v42 = vadd.f32 %v2730_v17, %v2722_v53 }
0x2155   :  { %3645 = vtanh.f32 %v4673_v42 }
0x215b   :  { %v3646_v23 = vpop.eup %3645 }
0x215c   :  { %2746 = vrot.lane.b32.xlu1 %v3646_v23, %s3760_s21 }
0x2186   :  { %v2741_v62 = vpop.permute.xlu0 %2740 }
0x2187   :  { %v4678_v11 = vadd.f32 %v2741_v62, %v2733_v49 }
0x2189   :  { %3647 = vtanh.f32 %v4678_v11 }
0x218f   :  { %v3648_v13 = vpop.eup %3647 }
0x2190   :  { %2752 = vrot.lane.b32.xlu2 %v3648_v13, %s3760_s21 }
0x21ce   :  { %v2747_v40 = vpop.permute.xlu1 %2746 }
0x21cf   :  { %v4682_v7 = vmul.f32 %v2747_v40, %v2699_v22 }
0x21d1   :  { %2763 = vrot.lane.b32.xlu0 %v4682_v7, %s3761_s1 }
0x21ea   :  { %v2753_v25 = vpop.permute.xlu2 %2752 }
0x21eb   :  { %v4686_v4 = vmul.f32 %v2753_v25, %v2718_v14 }
0x21ed   :  { %2789 = vrot.lane.b32.xlu1 %v4686_v4, %s3761_s1 }
0x2243   :  { %v2764_v46 = vpop.permute.xlu0 %2763 }
0x2244   :  { %3322 = vmatmul.msk.f32.vlgmr.msra.gmra.mxu2 %vm58_vm0, %v2764_v46 }
0x2245   :  { %3043 = vmatpush.msra.mxu2 %v4479_v38  ;;  %v1419_v38 = vadd.f32 %v1418_v43, %v3978_v34 }
0x2247   :  { %3044 = vmatpush.msra.mxu2 %v4485_v29 }
0x2249   :  { %3045 = vmatpush.msra.mxu2 %v4491_v19 }
0x224b   :  { %3046 = vmatpush.msra.mxu2 %v4497_v15  ;;  %v1451_v15 = vadd.f32 %v4263_v44, %v4019_v51 }
0x225f   :  { %v2790_v22 = vpop.permute.xlu1 %2789 }
0x2260   :  { %3323 = vmatmul.msk.f32.vlgmr.msra.gmra.mxu3 %vm58_vm0, %v2790_v22 }
0x2261   :  { %3069 = vmatpush.msra.mxu3 %v4504_v16 }
0x2263   :  { %3070 = vmatpush.msra.mxu3 %v4510_v59 }
0x2265   :  { %3071 = vmatpush.msra.mxu3 %v4551_v35 }
0x2267   :  { %3072 = vmatpush.msra.mxu3 %v4557_v33 }
0x22c7   :  { %v2784_v50 = vpop.f32.mrf.mxu2 }
0x22c8   :  { %v2787_v29 = vadd.f32 %v2784_v50, %v1419_v38 }
0x22ca   :  { %3649 = vtanh.f32 %v2787_v29  ;;  %v3324_v35 = vmul.f32 -1.442695, %v2787_v29 }
0x22d0   :  { %v3650_v19 = vpop.eup %3649 }
0x22d1   :  { %2856 = vrot.lane.b32.xlu2 %v3650_v19, %s3760_s21 }
0x22e3   :  { %v2810_v45 = vpop.f32.mrf.mxu3 }
0x22e4   :  { %v2813_v16 = vadd.f32 %v2810_v45, %v1451_v15 }
0x22e6   :  { %3651 = vtanh.f32 %v2813_v16  ;;  %v3325_v22 = vmul.f32 -1.442695, %v2813_v16 }
0x22e7   :  { %3653 = vpow2.f32 %v3324_v35 }
0x22ec   :  { %v3652_v59 = vpop.eup %3651 }
0x22ed   :  { %2867 = vrot.lane.b32.xlu0 %v3652_v59, %s3760_s21  ;;  %v3654_v33 = vpop.eup %3653 }
0x22ee   :  { %v2817_v48 = vadd.f32 1.0, %v3654_v33 }
0x22f0   :  { %3655 = vrcp.f32 %v2817_v48  ;;  %v2829_v49 = vand.u32 2147483648, %v2817_v48  ;;  %vm2823_vm10 = vweird.f32 %v2817_v48  ;;  %v2827_v44 = vand.u32 2147483647, %v2817_v48 }
0x22f1   :  { %3657 = vpow2.f32 %v3325_v22 }
0x22f2   :  { %v2830_v13 = vor.u32 1.1754944e-38, %v2829_v49  ;;  %vm2828_vm12 = vcmp.eq.f32.partialorder %v2827_v44, 8.507059e+37 }
0x22f6   :  { %v3656_v14 = vpop.eup %3655 }
0x22f7   :  { %v2819_v21 = vmul.f32 %v3656_v14, %v2817_v48  ;;  %vm2824_vm9 = vweird.f32 %v3656_v14  ;;  %v3658_v43 = vpop.eup %3657 }
0x22f8   :  { %vm2825_vm11 = vmor %vm2823_vm10, %vm2824_vm9  ;;  %v2836_v38 = vadd.f32 1.0, %v3658_v43 }
0x22f9   :  { %v2820_v53 = vsub.f32 1.0, %v2819_v21 }
0x22fa   :  { %3659 = vrcp.f32 %v2836_v38  ;;  %v2848_v59 = vand.u32 2147483648, %v2836_v38  ;;  %vm2842_vm14 = vweird.f32 %v2836_v38  ;;  %v2846_v35 = vand.u32 2147483647, %v2836_v38 }
0x22fb   :  { %v2821_v17 = vmul.f32 %v3656_v14, %v2820_v53 }
0x22fc   :  { %v2849_v48 = vor.u32 1.1754944e-38, %v2848_v59  ;;  %vm2847_vm1 = vcmp.eq.f32.partialorder %v2846_v35, 8.507059e+37 }
0x22fd   :  { %v2822_v23 = vadd.f32 %v3656_v14, %v2821_v17 }
0x22ff   :  { %v2826_v62 = vsel %vm2825_vm11, %v3656_v14, %v2822_v23 }
0x2300   :  { %v2831_v40 = vsel %vm2828_vm12, %v2830_v13, %v2826_v62  ;;  %v3660_v50 = vpop.eup %3659 }
0x2301   :  { %v2838_v29 = vmul.f32 %v3660_v50, %v2836_v38  ;;  %vm2843_vm13 = vweird.f32 %v3660_v50  ;;  %v2854_v53 = vmul.f32 %v2831_v40, %v4673_v42 }
0x2302   :  { %vm2844_vm15 = vmor %vm2842_vm14, %vm2843_vm13 }
0x2303   :  { %v2839_v19 = vsub.f32 1.0, %v2838_v29 }
0x2305   :  { %v2840_v15 = vmul.f32 %v3660_v50, %v2839_v19 }
0x2307   :  { %v2841_v45 = vadd.f32 %v3660_v50, %v2840_v15 }
0x2309   :  { %v2845_v33 = vsel %vm2844_vm15, %v3660_v50, %v2841_v45  ;;  %v1421_v50 = vpop.f32.mrf.mxu0  ;;  %v1448_v45 = vadd.f32 %v4261_v10, %v4019_v51 }
0x230a   :  { %v2850_v21 = vsel %vm2847_vm1, %v2849_v48, %v2845_v33  ;;  %v1422_v29 = vadd.f32 %v1421_v50, %v3978_v34 }
0x230b   :  { %v2865_v44 = vmul.f32 %v2850_v21, %v4678_v11 }
0x232b   :  { %v2857_v25 = vpop.permute.xlu2 %2856 }
0x232c   :  { %v2859_v46 = vmul.f32 %v2857_v25, %v2831_v40 }
0x232e   :  { %2861 = vrot.lane.b32.xlu1 %v2859_v46, %s3760_s21 }
0x235f   :  { %v2868_v14 = vpop.permute.xlu0 %2867 }
0x2360   :  { %v2870_v16 = vmul.f32 %v2868_v14, %v2850_v21 }
0x2362   :  { %2872 = vrot.lane.b32.xlu2 %v2870_v16, %s3760_s21 }
0x23a0   :  { %v2862_v17 = vpop.permute.xlu1 %2861 }
0x23a1   :  { %v4708_v23 = vadd.f32 %v2862_v17, %v2854_v53 }
0x23a3   :  { %3661 = vtanh.f32 %v4708_v23 }
0x23a9   :  { %v3662_v49 = vpop.eup %3661 }
0x23aa   :  { %2878 = vrot.lane.b32.xlu0 %v3662_v49, %s3760_s21 }
0x23bc   :  { %v2873_v62 = vpop.permute.xlu2 %2872 }
0x23bd   :  { %v4713_v13 = vadd.f32 %v2873_v62, %v2865_v44 }
0x23bf   :  { %3663 = vtanh.f32 %v4713_v13 }
0x23c5   :  { %v3664_v25 = vpop.eup %3663 }
0x23c6   :  { %2884 = vrot.lane.b32.xlu1 %v3664_v25, %s3760_s21 }
0x241c   :  { %v2879_v46 = vpop.permute.xlu0 %2878 }
0x241d   :  { %v4717_v42 = vmul.f32 %v2879_v46, %v2831_v40 }
0x241f   :  { %2895 = vrot.lane.b32.xlu2 %v4717_v42, %s3761_s1 }
0x2438   :  { %v2885_v22 = vpop.permute.xlu1 %2884 }
0x2439   :  { %v4721_v43 = vmul.f32 %v2885_v22, %v2850_v21 }
0x243b   :  { %2921 = vrot.lane.b32.xlu0 %v4721_v43, %s3761_s1 }
0x2479   :  { %v2896_v11 = vpop.permute.xlu2 %2895 }
0x247a   :  { %3326 = vmatmul.msk.f32.vlgmr.msrb.gmra.mxu2 %vm58_vm0, %v2896_v11 }
0x24ad   :  { %v2922_v38 = vpop.permute.xlu0 %2921 }
0x24ae   :  { %3327 = vmatmul.msk.f32.vlgmr.msrb.gmra.mxu3 %vm58_vm0, %v2922_v38 }
0x24fd   :  { %v2916_v40 = vpop.f32.mrf.mxu2 }
0x24fe   :  { %v2919_v19 = vadd.f32 %v2916_v40, %v1422_v29 }
0x2500   :  { %3665 = vtanh.f32 %v2919_v19  ;;  %v3328_v48 = vmul.f32 -1.442695, %v2919_v19 }
0x2506   :  { %v3666_v15 = vpop.eup %3665 }
0x2507   :  { %2988 = vrot.lane.b32.xlu1 %v3666_v15, %s3760_s21 }
0x2531   :  { %v2942_v59 = vpop.f32.mrf.mxu3 }
0x2532   :  { %v2945_v35 = vadd.f32 %v2942_v59, %v1448_v45 }
0x2534   :  { %3667 = vtanh.f32 %v2945_v35  ;;  %v3329_v17 = vmul.f32 -1.442695, %v2945_v35 }
0x2535   :  { %3669 = vpow2.f32 %v3328_v48 }
0x253a   :  { %v3668_v33 = vpop.eup %3667 }
0x253b   :  { %2999 = vrot.lane.b32.xlu2 %v3668_v33, %s3760_s21  ;;  %v3670_v14 = vpop.eup %3669 }
0x253c   :  { %v2949_v21 = vadd.f32 1.0, %v3670_v14 }
0x253e   :  { %3671 = vrcp.f32 %v2949_v21  ;;  %v2961_v10 = vand.u32 2147483648, %v2949_v21  ;;  %vm2955_vm3 = vweird.f32 %v2949_v21  ;;  %v2959_v46 = vand.u32 2147483647, %v2949_v21 }
0x253f   :  { %3673 = vpow2.f32 %v3329_v17 }
0x2540   :  { %v2962_v38 = vor.u32 1.1754944e-38, %v2961_v10  ;;  %vm2960_vm5 = vcmp.eq.f32.partialorder %v2959_v46, 8.507059e+37 }
0x2544   :  { %v3672_v16 = vpop.eup %3671 }
0x2545   :  { %v2951_v53 = vmul.f32 %v3672_v16, %v2949_v21  ;;  %v3674_v62 = vpop.eup %3673  ;;  %vm2956_vm2 = vweird.f32 %v3672_v16 }
0x2546   :  { %v2968_v22 = vadd.f32 1.0, %v3674_v62  ;;  %vm2957_vm4 = vmor %vm2955_vm3, %vm2956_vm2 }
0x2547   :  { %v2952_v49 = vsub.f32 1.0, %v2951_v53 }
0x2548   :  { %3675 = vrcp.f32 %v2968_v22  ;;  %v2980_v33 = vand.u32 2147483648, %v2968_v22  ;;  %vm2974_vm7 = vweird.f32 %v2968_v22  ;;  %v2978_v48 = vand.u32 2147483647, %v2968_v22 }
0x2549   :  { %v2953_v44 = vmul.f32 %v3672_v16, %v2952_v49 }
0x254a   :  { %v2981_v21 = vor.u32 1.1754944e-38, %v2980_v33  ;;  %vm2979_vm9 = vcmp.eq.f32.partialorder %v2978_v48, 8.507059e+37  ;;  %v3251_v48 = vmul.f32 -1.442695, %v4380_v41 }
0x254b   :  { %v2954_v25 = vadd.f32 %v3672_v16, %v2953_v44 }
0x254d   :  { %v2958_v11 = vsel %vm2957_vm4, %v3672_v16, %v2954_v25 }
0x254e   :  { %v2963_v29 = vsel %vm2960_vm5, %v2962_v38, %v2958_v11  ;;  %v3676_v19 = vpop.eup %3675 }
0x254f   :  { %v2970_v15 = vmul.f32 %v3676_v19, %v2968_v22  ;;  %vm2975_vm6 = vweird.f32 %v3676_v19  ;;  %v2986_v49 = vmul.f32 %v2963_v29, %v4708_v23 }
0x2550   :  { %vm2976_vm8 = vmor %vm2974_vm7, %vm2975_vm6 }
0x2551   :  { %v2971_v45 = vsub.f32 1.0, %v2970_v15 }
0x2553   :  { %v2972_v59 = vmul.f32 %v3676_v19, %v2971_v45  ;;  %v4965_v45 = vmov 0.0  }
0x2555   :  { %v2973_v35 = vadd.f32 %v3676_v19, %v2972_v59 }
0x2557   :  { %v2977_v14 = vsel %vm2976_vm8, %v3676_v19, %v2973_v35 }
0x2558   :  { %v2982_v16 = vsel %vm2979_vm9, %v2981_v21, %v2977_v14 }
0x2559   :  { %v2997_v10 = vmul.f32 %v2982_v16, %v4713_v13  ;;  %v3762_v13 = vmov 0  }
0x255a   :  { %3346 = vset.pattern.permute.xlu2 %v3762_v13  ;;  %3340 = vset.pattern.permute.xlu1 %v3762_v13 }
0x255b   :  { %3362 = vset.pattern.permute.xlu0 %v3762_v13 }
0x2579   :  { %v2989_v50 = vpop.permute.xlu1 %2988 }
0x257a   :  { %v2991_v40 = vmul.f32 %v2989_v50, %v2963_v29 }
0x257c   :  { %2993 = vrot.lane.b32.xlu0 %v2991_v40, %s3760_s21 }
0x2595   :  { %v3000_v53 = vpop.permute.xlu2 %2999 }
0x2596   :  { %v3002_v17 = vmul.f32 %v3000_v53, %v2982_v16 }
0x2598   :  { %3004 = vrot.lane.b32.xlu1 %v3002_v17, %s3760_s21 }
0x25ee   :  { %v2994_v44 = vpop.permute.xlu0 %2993 }
0x25ef   :  { %v4735_v62 = vadd.f32 %v2994_v44, %v2986_v49 }
0x25f1   :  { %3677 = vtanh.f32 %v4735_v62 }
0x25f7   :  { %v3678_v25 = vpop.eup %3677 }
0x25f8   :  { %3010 = vrot.lane.b32.xlu2 %v3678_v25, %s3760_s21 }
0x260a   :  { %v3005_v46 = vpop.permute.xlu1 %3004 }
0x260b   :  { %v4740_v22 = vadd.f32 %v3005_v46, %v2997_v10 }
0x260d   :  { %3679 = vtanh.f32 %v4740_v22 }
0x260e   :  { %3681 = vtanh.f32 %v4374_v32 }
0x260f   :  { %3683 = vtanh.f32 %v4380_v41 }
0x2610   :  { %3685 = vpow2.f32 %v3251_v48 }
0x2613   :  { %v3680_v11 = vpop.eup %3679 }
0x2614   :  { %3016 = vrot.lane.b32.xlu0 %v3680_v11, %s3760_s21  ;;  %v3682_v23 = vpop.eup %3681 }
0x2615   :  { %v3684_v15 = vpop.eup %3683 }
0x2616   :  { %v3686_v21 = vpop.eup %3685 }
0x261c   :  { %1283 = vrot.lane.b32.xlu0 %v3682_v23, %s3760_s21 }
0x2652   :  { %v3011_v38 = vpop.permute.xlu2 %3010 }
0x2653   :  { %v4746_v50 = vmul.f32 %v3011_v38, %v2963_v29  ;;  %v4758_v29 = vld [vmem:[%s4951_s2] sm:$0xff] }
0x2654   :  { %vm471_vm10 = vcmp.gt.s32.totalorder %v4758_v29, 1  ;;  %vm474_vm11 = vcmp.gt.s32.totalorder %v4758_v29, 6  ;;  %v4771_v38 = vld [vmem:[%s4952_s3] sm:$0xff]  ;;  %vm771_vm1 = vcmp.gt.s32.totalorder %v4758_v29, 3  ;;  %vm321_vm7 = vcmp.gt.s32.totalorder %v4758_v29, 0  ;;  %s3763_s3 = smov 96  }
0x2655   :  { %3027 = vrot.lane.b32.xlu1 %v4746_v50, %s3761_s1  ;;  %v3222_v59 = vsel %vm471_vm10, 1.0, %v4965_v45  ;;  %v3223_v35 = vsel %vm474_vm11, 1.0, %v4965_v45  ;;  %vm1601_vm2 = vcmp.gt.s32.totalorder %v4771_v38, 0  ;;  %vm1902_vm3 = vcmp.gt.s32.totalorder %v4771_v38, 9 }
0x2656   :  { %v3347_v33 = vpack.i.bf16 %v3223_v35, %v3222_v59  ;;  %v3234_v59 = vsel %vm771_vm1, 1.0, %v4965_v45  ;;  %v3278_v35 = vsel %vm1601_vm2, 1.0, %v4965_v45  ;;  %vm2048_vm4 = vcmp.gt.s32.totalorder %v4771_v38, 3 }
0x2657   :  { %v3291_v48 = vsel %vm1902_vm3, 1.0, %v4965_v45  ;;  %vm2199_vm5 = vcmp.gt.s32.totalorder %v4771_v38, 7  ;;  %vm2344_vm6 = vcmp.gt.s32.totalorder %v4771_v38, 5  ;;  %vm324_vm8 = vcmp.gt.s32.totalorder %v4758_v29, 7 }
0x2658   :  { %vm621_vm2 = vcmp.gt.s32.totalorder %v4758_v29, 2  ;;  %vm624_vm3 = vcmp.gt.s32.totalorder %v4758_v29, 5 }
0x2686   :  { %v3017_v40 = vpop.permute.xlu0 %3016 }
0x2687   :  { %v4750_v19 = vmul.f32 %v3017_v40, %v2982_v16  ;;  %v1263_v16 = vadd.f32 1.0, %v3686_v21 }
0x2689   :  { %3053 = vrot.lane.b32.xlu2 %v4750_v19, %s3761_s1  ;;  %3687 = vrcp.f32 %v1263_v16  ;;  %v1275_v46 = vand.u32 2147483648, %v1263_v16  ;;  %vm1269_vm13 = vweird.f32 %v1263_v16  ;;  %v1273_v11 = vand.u32 2147483647, %v1263_v16 }
0x268b   :  { %v1276_v23 = vor.u32 1.1754944e-38, %v1275_v46  ;;  %vm1274_vm15 = vcmp.eq.f32.partialorder %v1273_v11, 8.507059e+37 }
0x268f   :  { %v3688_v53 = vpop.eup %3687 }
0x2690   :  { %v1265_v17 = vmul.f32 %v3688_v53, %v1263_v16  ;;  %vm1270_vm12 = vweird.f32 %v3688_v53  ;;  %v3303_v16 = vsel %vm2199_vm5, 1.0, %v4965_v45  ;;  %vm1899_vm5 = vcmp.gt.s32.totalorder %v4771_v38, 2 }
0x2691   :  { %1294 = vrot.lane.b32.xlu2 %v3684_v15, %s3760_s21  ;;  %vm1271_vm14 = vmor %vm1269_vm13, %vm1270_vm12 }
0x2692   :  { %v1266_v49 = vsub.f32 1.0, %v1265_v17 }
0x2694   :  { %v1267_v44 = vmul.f32 %v3688_v53, %v1266_v49  ;;  %v1424_v49 = vpop.f32.mrf.mxu0 }
0x2696   :  { %v1268_v10 = vadd.f32 %v3688_v53, %v1267_v44  ;;  %v1425_v44 = vadd.f32 %v1424_v49, %v3978_v34 }
0x2698   :  { %v1272_v41 = vsel %vm1271_vm14, %v3688_v53, %v1268_v10  ;;  %v3308_v53 = vsel %vm2344_vm6, 1.0, %v4965_v45  ;;  %vm2051_vm6 = vcmp.gt.s32.totalorder %v4771_v38, 8 }
0x2699   :  { %3348 = vperm.xlu2 %3346, %v3347_v33   ;;  %v4773_v13 = vsel %vm1274_vm15, %v1276_v23, %v1272_v41  ;;  %v3357_v33 = vpack.i.bf16 %v3278_v35, %v3234_v59  ;;  %v3383_v17 = vpack.i.bf16 %v3308_v53, %v3303_v16  ;;  %v1445_v35 = vadd.f32 %v4259_v39, %v4019_v51 }
0x26c7   :  { %v3028_v14 = vpop.permute.xlu1 %3027 }
0x26c8   :  { %3330 = vmatmul.msk.f32.vlgmr.msra.gmra.mxu2 %vm58_vm0, %v3028_v14  ;;  %v3296_v14 = vsel %vm2048_vm4, 1.0, %v4965_v45  ;;  %vm1753_vm4 = vcmp.gt.s32.totalorder %v4771_v38, 10 }
0x26c9   :  { %v3373_v21 = vpack.i.bf16 %v3296_v14, %v3291_v48 }
0x26e3   :  { %v3054_v25 = vpop.permute.xlu2 %3053 }
0x26e4   :  { %3331 = vmatmul.msk.f32.vlgmr.msra.gmra.mxu3 %vm58_vm0, %v3054_v25  ;;  %v3250_v25 = vmul.f32 -1.442695, %v4374_v32 }
0x26e6   :  { %3689 = vpow2.f32 %v3250_v25 }
0x26eb   :  { %v1295_v40 = vpop.permute.xlu2 %1294 }
0x26ec   :  { %v1297_v15 = vmul.f32 %v1295_v40, %v4773_v13  ;;  %v3690_v11 = vpop.eup %3689  ;;  %v3216_v40 = vsel %vm321_vm7, 1.0, %v4965_v45  ;;  %vm2196_vm7 = vcmp.gt.s32.totalorder %v4771_v38, 4 }
0x26ed   :  { %v1244_v23 = vadd.f32 1.0, %v3690_v11 }
0x26ee   :  { %1299 = vrot.lane.b32.xlu2 %v1297_v15, %s3760_s21  ;;  %v3217_v15 = vsel %vm324_vm8, 1.0, %v4965_v45 }
0x26ef   :  { %v3341_v34 = vpack.i.bf16 %v3217_v15, %v3216_v40  ;;  %vm1250_vm10 = vweird.f32 %v1244_v23  ;;  %v1254_v49 = vand.u32 2147483647, %v1244_v23 }
0x26f1   :  { %vm1255_vm12 = vcmp.eq.f32.partialorder %v1254_v49, 8.507059e+37 }
0x26f6   :  { %3358 = vperm.xlu2 %3346, %v3357_v33  }
0x26fe   :  { %3374 = vperm.xlu2 %3346, %v3373_v21  }
0x2706   :  { %3384 = vperm.xlu2 %3346, %v3383_v17   ;;  %v1256_v17 = vand.u32 2147483648, %v1244_v23 }
0x2708   :  { %v1257_v25 = vor.u32 1.1754944e-38, %v1256_v17 }
0x274b   :  { %v3048_v10 = vpop.f32.mrf.mxu2 }
0x274c   :  { %v3051_v46 = vadd.f32 %v3048_v10, %v1425_v44  ;;  %v1284_v10 = vpop.permute.xlu0 %1283 }
0x274e   :  { %3691 = vtanh.f32 %v3051_v46  ;;  %v3332_v39 = vmul.f32 -1.442695, %v3051_v46 }
0x274f   :  { %3693 = vrcp.f32 %v1244_v23 }
0x2754   :  { %v3692_v41 = vpop.eup %3691 }
0x2755   :  { %3120 = vrot.lane.b32.xlu1 %v3692_v41, %s3760_s21  ;;  %v3694_v32 = vpop.eup %3693 }
0x2756   :  { %v1246_v59 = vmul.f32 %v3694_v32, %v1244_v23  ;;  %vm1251_vm9 = vweird.f32 %v3694_v32 }
0x2757   :  { %vm1252_vm11 = vmor %vm1250_vm10, %vm1251_vm9 }
0x2758   :  { %v1247_v33 = vsub.f32 1.0, %v1246_v59 }
0x275a   :  { %v1248_v21 = vmul.f32 %v3694_v32, %v1247_v33 }
0x275c   :  { %v1249_v16 = vadd.f32 %v3694_v32, %v1248_v21 }
0x275d   :  { %3342 = vperm.xlu1 %3340, %v3341_v34  }
0x275e   :  { %v1253_v44 = vsel %vm1252_vm11, %v3694_v32, %v1249_v16 }
0x275f   :  { %v4799_v11 = vsel %vm1255_vm12, %v1257_v25, %v1253_v44  ;;  %v3228_v44 = vsel %vm621_vm2, 1.0, %v4965_v45  ;;  %v3229_v25 = vsel %vm624_vm3, 1.0, %v4965_v45  ;;  %vm1604_vm12 = vcmp.gt.s32.totalorder %v4771_v38, 11 }
0x2760   :  { %v1286_v51 = vmul.f32 %v1284_v10, %v4799_v11 }
0x2767   :  { %v3074_v48 = vpop.f32.mrf.mxu3 }
0x2768   :  { %v3077_v14 = vadd.f32 %v3074_v48, %v1445_v35 }
0x276a   :  { %3695 = vtanh.f32 %v3077_v14  ;;  %v3333_v34 = vmul.f32 -1.442695, %v3077_v14 }
0x276b   :  { %3697 = vpow2.f32 %v3332_v39 }
0x2770   :  { %v3696_v53 = vpop.eup %3695 }
0x2771   :  { %3131 = vrot.lane.b32.xlu0 %v3696_v53, %s3760_s21  ;;  %v3698_v41 = vpop.eup %3697 }
0x2772   :  { %v3081_v40 = vadd.f32 1.0, %v3698_v41  ;;  %v3285_v41 = vsel %vm1753_vm4, 1.0, %v4965_v45 }
0x2774   :  { %3699 = vrcp.f32 %v3081_v40  ;;  %v3093_v48 = vand.u32 2147483648, %v3081_v40  ;;  %vm3087_vm14 = vweird.f32 %v3081_v40  ;;  %v3091_v21 = vand.u32 2147483647, %v3081_v40 }
0x2775   :  { %3701 = vpow2.f32 %v3333_v34 }
0x2776   :  { %v3094_v46 = vor.u32 1.1754944e-38, %v3093_v48  ;;  %vm3092_vm1 = vcmp.eq.f32.partialorder %v3091_v21, 8.507059e+37 }
0x2779   :  { %1288 = vrot.lane.b32.xlu0 %v1286_v51, %s3760_s21  ;;  %v3352_v51 = vpack.i.bf16 %v3229_v25, %v3228_v44 }
0x277a   :  { %v3700_v15 = vpop.eup %3699 }
0x277b   :  { %v3083_v23 = vmul.f32 %v3700_v15, %v3081_v40  ;;  %v3702_v35 = vpop.eup %3701  ;;  %vm3088_vm13 = vweird.f32 %v3700_v15  ;;  %v3290_v40 = vsel %vm1899_vm5, 1.0, %v4965_v45 }
0x277c   :  { %v3100_v16 = vadd.f32 1.0, %v3702_v35  ;;  %vm3089_vm15 = vmor %vm3087_vm14, %vm3088_vm13  ;;  %vm1750_vm13 = vcmp.gt.s32.totalorder %v4771_v38, 1  ;;  %vm774_vm14 = vcmp.gt.s32.totalorder %v4758_v29, 4 }
0x277d   :  { %v3084_v59 = vsub.f32 1.0, %v3083_v23  ;;  %v3368_v23 = vpack.i.bf16 %v3290_v40, %v3285_v41  ;;  %v1281_v41 = vmul.f32 %v4799_v11, %v4321_v5 }
0x277e   :  { %3703 = vrcp.f32 %v3100_v16  ;;  %vm3106_vm9 = vweird.f32 %v3100_v16  ;;  %v3110_v21 = vand.u32 2147483647, %v3100_v16 }
0x277f   :  { %v3085_v32 = vmul.f32 %v3700_v15, %v3084_v59  ;;  %v3297_v59 = vsel %vm2051_vm6, 1.0, %v4965_v45 }
0x2780   :  { %vm3111_vm11 = vcmp.eq.f32.partialorder %v3110_v21, 8.507059e+37 }
0x2781   :  { %v3086_v33 = vadd.f32 %v3700_v15, %v3085_v32  ;;  %v3302_v32 = vsel %vm2196_vm7, 1.0, %v4965_v45 }
0x2782   :  { %v3378_v48 = vpack.i.bf16 %v3302_v32, %v3297_v59  ;;  %v3235_v59 = vsel %vm774_vm14, 1.0, %v4965_v45 }
0x2783   :  { %v3090_v53 = vsel %vm3089_vm15, %v3700_v15, %v3086_v33  ;;  %v3112_v33 = vand.u32 2147483648, %v3100_v16  ;;  %vm2347_vm15 = vcmp.gt.s32.totalorder %v4771_v38, 6 }
0x2784   :  { %v4803_v49 = vsel %vm3092_vm1, %v3094_v46, %v3090_v53  ;;  %v3704_v10 = vpop.eup %3703  ;;  %v1505_v53 = vcvt.s32.f32 %v4771_v38  ;;  %v3309_v32 = vsel %vm2347_vm15, 1.0, %v4965_v45 }
0x2785   :  { %v3102_v39 = vmul.f32 %v3704_v10, %v3100_v16  ;;  %vm3107_vm8 = vweird.f32 %v3704_v10  ;;  %v3279_v16 = vsel %vm1604_vm12, 1.0, %v4965_v45  ;;  %v3388_v5 = vpack.i.bf16 %v3235_v59, %v3309_v32 }
0x2786   :  { %vm3108_vm10 = vmor %vm3106_vm9, %vm3107_vm8  ;;  %v1506_v25 = vmax.f32 %v1505_v53, 1.0  ;;  %vm3176_vm9 = vcmask 523520  }
0x2787   :  { %v3103_v15 = vsub.f32 1.0, %v3102_v39  ;;  %v3284_v39 = vsel %vm1750_vm13, 1.0, %v4965_v45 }
0x2788   :  { %3705 = vrcp.f32 %v1506_v25  ;;  %v3363_v40 = vpack.i.bf16 %v3279_v16, %v3284_v39  ;;  %vm1512_vm1 = vweird.f32 %v1506_v25 }
0x2789   :  { %v3104_v34 = vmul.f32 %v3704_v10, %v3103_v15 }
0x278b   :  { %v3105_v35 = vadd.f32 %v3704_v10, %v3104_v34 }
0x278d   :  { %v3109_v46 = vsel %vm3108_vm10, %v3704_v10, %v3105_v35  ;;  %v4828_v10 = vpop.permute.xlu2 %3348 }
0x278e   :  { %v3706_v34 = vpop.eup %3705 }
0x278f   :  { %vm1513_vm2 = vweird.f32 %v3706_v34 }
0x2790   :  { %vm1514_vm3 = vmor %vm1512_vm1, %vm1513_vm2 }
0x2795   :  { %v1300_v35 = vpop.permute.xlu2 %1299 }
0x27c7   :  { %v3121_v17 = vpop.permute.xlu1 %3120 }
0x27c8   :  { %v3123_v14 = vmul.f32 %v3121_v17, %v4803_v49  ;;  %v3113_v17 = vor.u32 1.1754944e-38, %v3112_v33  ;;  %v1508_v33 = vmul.f32 %v3706_v34, %v1506_v25 }
0x27ca   :  { %3125 = vrot.lane.b32.xlu1 %v3123_v14, %s3760_s21  ;;  %v4820_v44 = vsel %vm3111_vm11, %v3113_v17, %v3109_v46  ;;  %v1509_v46 = vsub.f32 1.0, %v1508_v33  ;;  %v1518_v17 = vand.u32 2147483648, %v1506_v25 }
0x27cc   :  { %v1510_v38 = vmul.f32 %v3706_v34, %v1509_v46  ;;  %v1519_v16 = vor.u32 1.1754944e-38, %v1518_v17 }
0x27d2   :  { %3353 = vperm.xlu1 %3340, %v3352_v51  }
0x27da   :  { %3369 = vperm.xlu1 %3340, %v3368_v23  }
0x27e2   :  { %3379 = vperm.xlu1 %3340, %v3378_v48   ;;  %v1292_v48 = vmul.f32 %v4773_v13, %v4335_v18 }
0x27e3   :  { %v3132_v14 = vpop.permute.xlu0 %3131 }
0x27e4   :  { %v3134_v51 = vmul.f32 %v3132_v14, %v4820_v44  ;;  %v1302_v21 = vadd.f32 %v1300_v35, %v1292_v48  ;;  %v1511_v14 = vadd.f32 %v3706_v34, %v1510_v38 }
0x27e6   :  { %3136 = vrot.lane.b32.xlu0 %v3134_v51, %s3760_s21  ;;  %v1516_v51 = vand.u32 2147483647, %v1506_v25  ;;  %v1515_v18 = vsel %vm1514_vm3, %v3706_v34, %v1511_v14  ;;  %v3118_v25 = vmul.f32 %v4803_v49, %v4735_v62  ;;  %v4848_v62 = vpop.permute.xlu2 %3358 }
0x27e8   :  { %vm1517_vm4 = vcmp.eq.f32.partialorder %v1516_v51, 8.507059e+37  ;;  %v3129_v51 = vmul.f32 %v4820_v44, %v4740_v22 }
0x27e9   :  { %v1520_v39 = vsel %vm1517_vm4, %v1519_v16, %v1515_v18 }
0x27eb   :  { %v1289_v15 = vpop.permute.xlu0 %1288 }
0x27ec   :  { %v1291_v23 = vadd.f32 %v1289_v15, %v1281_v41  ;;  %v182_v41 = vcvt.s32.f32 %v4758_v29  ;;  %v4841_v15 = vpop.permute.xlu1 %3342 }
0x27ee   :  { %3707 = vtanh.f32 %v1291_v23  ;;  %3364 = vperm.xlu0 %3362, %v3363_v40   ;;  %v183_v40 = vmax.f32 %v182_v41, 1.0 }
0x27ef   :  { %3709 = vtanh.f32 %v1302_v21 }
0x27f0   :  { %3711 = vrcp.f32 %v183_v40  ;;  %vm189_vm5 = vweird.f32 %v183_v40  ;;  %v195_v34 = vand.u32 2147483648, %v183_v40  ;;  %v193_v21 = vand.u32 2147483647, %v183_v40 }
0x27f2   :  { %vm194_vm8 = vcmp.eq.f32.partialorder %v193_v21, 8.507059e+37 }
0x27f4   :  { %v3708_v53 = vpop.eup %3707 }
0x27f5   :  { %1305 = vrot.lane.b32.xlu1 %v3708_v53, %s3760_s21  ;;  %v3710_v45 = vpop.eup %3709  ;;  %v196_v53 = vor.u32 1.1754944e-38, %v195_v34 }
0x27f6   :  { %3389 = vperm.xlu0 %3362, %v3388_v5   ;;  %v3712_v23 = vpop.eup %3711 }
0x27f7   :  { %v185_v59 = vmul.f32 %v3712_v23, %v183_v40  ;;  %vm190_vm6 = vweird.f32 %v3712_v23 }
0x27f8   :  { %vm191_vm7 = vmor %vm189_vm5, %vm190_vm6 }
0x27f9   :  { %v186_v35 = vsub.f32 1.0, %v185_v59 }
0x27fb   :  { %v187_v48 = vmul.f32 %v3712_v23, %v186_v35 }
0x27fd   :  { %v188_v5 = vadd.f32 %v3712_v23, %v187_v48 }
0x27fe   :  { %1311 = vrot.lane.b32.xlu0 %v3710_v45, %s3760_s21  ;;  %v4854_v45 = vpop.permute.xlu2 %3374 }
0x27ff   :  { %v192_v46 = vsel %vm191_vm7, %v3712_v23, %v188_v5  ;;  %v3376_v59 = vunpack.i.l.bf16 %v4854_v45 }
0x2800   :  { %v197_v38 = vsel %vm194_vm8, %v196_v53, %v192_v46 }
0x2801   :  { %v1917_v48 = vmul.f32 %v3376_v59, %v4436_v12  ;;  %v3377_v12 = vunpack.i.h.bf16 %v4854_v45  ;;  %v3345_v45 = vunpack.i.h.bf16 %v4841_v15 }
0x2806   :  { %3158 = vperm.xlu0 %3362, %v1520_v39  }
0x283c   :  { %v3126_v32 = vpop.permute.xlu1 %3125 }
0x283d   :  { %v3128_v33 = vadd.f32 %v3126_v32, %v3118_v25  ;;  %v3385_v32 = vpop.permute.xlu2 %3384 }
0x283e   :  { %v3386_v34 = vunpack.i.l.bf16 %v3385_v32 }
0x283f   :  { %3713 = vtanh.f32 %v3128_v33 }
0x2840   :  { %v2214_v46 = vmul.f32 %v3386_v34, %v4536_v61  ;;  %v2758_v61 = vmul.f32 %v3377_v12, %v4686_v4 }
0x2844   :  { %v4846_v17 = vpop.permute.xlu1 %3353 }
0x2845   :  { %v3714_v29 = vpop.eup %3713 }
0x2846   :  { %3142 = vrot.lane.b32.xlu2 %v3714_v29, %s3760_s21 }
0x284c   :  { %v4850_v14 = vpop.permute.xlu1 %3369 }
0x284d   :  { %v3371_v39 = vunpack.i.l.bf16 %v4850_v14 }
0x284e   :  { %1321 = vperm.xlu2 %3346, %v197_v38  }
0x284f   :  { %v1768_v22 = vmul.f32 %v3371_v39, %v4401_v28 }
0x2854   :  { %v4857_v41 = vpop.permute.xlu1 %3379 }
0x2855   :  { %v3381_v35 = vunpack.i.l.bf16 %v4857_v41 }
0x2857   :  { %v2066_v21 = vmul.f32 %v3381_v35, %v4471_v58  ;;  %v3372_v58 = vunpack.i.h.bf16 %v4850_v14 }
0x2858   :  { %v3137_v16 = vpop.permute.xlu0 %3136 }
0x2859   :  { %v3139_v18 = vadd.f32 %v3137_v16, %v3129_v51  ;;  %v3387_v51 = vunpack.i.h.bf16 %v3385_v32 }
0x285b   :  { %3715 = vtanh.f32 %v3139_v18 }
0x2860   :  { %v4859_v40 = vpop.permute.xlu0 %3364 }
0x2861   :  { %v3716_v23 = vpop.eup %3715  ;;  %v3367_v25 = vunpack.i.h.bf16 %v4859_v40 }
0x2862   :  { %3148 = vrot.lane.b32.xlu1 %v3716_v23, %s3760_s21  ;;  %v2494_v23 = vmul.f32 %v3387_v51, %v4616_v27  ;;  %v3361_v27 = vunpack.i.h.bf16 %v4848_v62  ;;  %s3764_s21 = smov [#allocation3]  }
0x2863   :  { %v1619_v33 = vmul.f32 %v3367_v25, %v4344_v2  ;;  %v3382_v2 = vunpack.i.h.bf16 %v4857_v41 }
0x2865   :  { %v1769_v5 = vadd.f32 %v1768_v22, %v1619_v33  ;;  %v2626_v33 = vmul.f32 %v3382_v2, %v4651_v9  ;;  %v1612_v9 = vmul.f32 %v3361_v27, %v4330_v56 }
0x2867   :  { %v1918_v29 = vadd.f32 %v1917_v48, %v1769_v5  ;;  %v3366_v5 = vunpack.i.l.bf16 %v4859_v40 }
0x2868   :  { %v4875_v53 = vpop.permute.xlu0 %3389 }
0x2869   :  { %v3391_v28 = vunpack.i.l.bf16 %v4875_v53  ;;  %v2067_v38 = vadd.f32 %v2066_v21, %v1918_v29  ;;  %v2890_v21 = vmul.f32 %v3372_v58, %v4721_v43  ;;  %v2059_v43 = vmul.f32 %v3377_v12, %v4467_v8 }
0x286b   :  { %v2215_v16 = vadd.f32 %v2214_v46, %v2067_v38  ;;  %v2362_v18 = vmul.f32 %v3391_v28, %v4581_v60  ;;  %v3022_v60 = vmul.f32 %v3366_v5, %v4750_v19  ;;  %v1761_v38 = vmul.f32 %v3366_v5, %v4397_v63 }
0x286c   :  { %v2207_v19 = vmul.f32 %v3382_v2, %v4532_v3  ;;  %v2355_v63 = vmul.f32 %v3387_v51, %v4577_v52  ;;  %v2492_v3 = vmul.f32 %v3391_v28, %v4612_v0  ;;  %v3360_v2 = vunpack.i.l.bf16 %v4848_v62 }
0x286d   :  { %v2363_v22 = vadd.f32 %v2362_v18, %v2215_v16  ;;  %v1762_v4 = vadd.f32 %v1761_v38, %v1612_v9  ;;  %v1910_v16 = vmul.f32 %v3372_v58, %v4432_v37  ;;  %v3392_v5 = vunpack.i.h.bf16 %v4875_v53 }
0x286e   :  { %v2624_v52 = vmul.f32 %v3386_v34, %v4647_v26  ;;  %v2888_v53 = vmul.f32 %v3376_v59, %v4717_v42  ;;  %v1306_v34 = vpop.permute.xlu1 %1305 }
0x286f   :  { %v2495_v48 = vadd.f32 %v2494_v23, %v2363_v22  ;;  %v1911_v18 = vadd.f32 %v1910_v16, %v1762_v4  ;;  %v3344_v22 = vunpack.i.l.bf16 %v4841_v15 }
0x2871   :  { %v2627_v32 = vadd.f32 %v2626_v33, %v2495_v48  ;;  %v2060_v23 = vadd.f32 %v2059_v43, %v1911_v18  ;;  %v3350_v48 = vunpack.i.l.bf16 %v4828_v10  ;;  %v332_v56 = vmul.f32 %v3344_v22, %v4036_v47 }
0x2872   :  { %v919_v47 = vmul.f32 %v3392_v5, %v4176_v24 }
0x2873   :  { %v2759_v41 = vadd.f32 %v2758_v61, %v2627_v32  ;;  %v2208_v33 = vadd.f32 %v2207_v19, %v2060_v23  ;;  %v3355_v61 = vunpack.i.l.bf16 %v4846_v17  ;;  %v482_v58 = vmul.f32 %v3350_v48, %v4071_v36 }
0x2874   :  { %v3356_v36 = vunpack.i.h.bf16 %v4846_v17 }
0x2875   :  { %v2891_v29 = vadd.f32 %v2890_v21, %v2759_v41  ;;  %v2356_v37 = vadd.f32 %v2355_v63, %v2208_v33  ;;  %v632_v8 = vmul.f32 %v3355_v61, %v4106_v57  ;;  %v483_v12 = vadd.f32 %v482_v58, %v332_v56  ;;  %v4966_v56 = vld [vmem:[#allocation6_spill] sm:$0xff] }
0x2876   :  { %v782_v21 = vmul.f32 %v3360_v2, %v4141_v6  ;;  %v2756_v57 = vmul.f32 %v3381_v35, %v4682_v7  ;;  %v1051_v26 = vmul.f32 %v3356_v36, %v4241_v30  ;;  %v1312_v6 = vpop.permute.xlu0 %1311  ;;  %v3020_v7 = vmul.f32 %v3371_v39, %v4746_v50 }
0x2877   :  { %v4889_v46 = vadd.f32 %v3022_v60, %v2891_v29  ;;  %v2493_v32 = vadd.f32 %v2492_v3, %v2356_v37  ;;  %v633_v51 = vadd.f32 %v632_v8, %v483_v12  ;;  %v3351_v29 = vunpack.i.h.bf16 %v4828_v10  ;;  %v4967_v8 = vld [vmem:[#allocation7_spill] sm:$0xff] }
0x2878   :  { %v1308_v35 = vmul.f32 %v1306_v34, %v4799_v11  ;;  %v339_v11 = vmul.f32 %v3345_v45, %v4040_v54  ;;  %v639_v39 = vmul.f32 %v3356_v36, %v4110_v20  ;;  %v921_v37 = vmul.f32 %v3360_v2, %v4966_v56 }
0x2879   :  { %v2625_v41 = vadd.f32 %v2624_v52, %v2493_v32  ;;  %v783_v60 = vadd.f32 %v782_v21, %v633_v51  ;;  %v1183_v17 = vmul.f32 %v3351_v29, %v4340_v55  ;;  %v1053_v3 = vmul.f32 %v3355_v61, %v4967_v8  ;;  %v4968_v52 = vld [vmem:[#allocation8_spill] sm:$0xff] }
0x287a   :  { %v1315_v4 = vmul.f32 %v3345_v45, %v1308_v35  ;;  %v1314_v12 = vmul.f32 %v1312_v6, %v4773_v13  ;;  %v1185_v51 = vmul.f32 %v3350_v48, %v4968_v52 }
0x287b   :  { %v920_v0 = vadd.f32 %v919_v47, %v783_v60  ;;  %v2757_v28 = vadd.f32 %v2756_v57, %v2625_v41 }
0x287d   :  { %v2889_v38 = vadd.f32 %v2888_v53, %v2757_v28  ;;  %v1052_v24 = vadd.f32 %v1051_v26, %v920_v0 }
0x287e   :  { %v3159_v18 = vpop.permute.xlu0 %3158 }
0x287f   :  { %v3021_v42 = vadd.f32 %v3020_v7, %v2889_v38  ;;  %v1184_v59 = vadd.f32 %v1183_v17, %v1052_v24 }
0x2881   :  { %v1316_v43 = vadd.f32 %v1315_v4, %v1184_v59 }
0x28a0   :  { %v3143_v9 = vpop.permute.xlu2 %3142 }
0x28a1   :  { %v3145_v10 = vmul.f32 %v3143_v9, %v4803_v49  ;;  %v489_v49 = vmul.f32 %v3351_v29, %v4075_v1  ;;  %v1317_v1 = vmul.f32 %v3344_v22, %v1314_v12 }
0x28a3   :  { %v3152_v30 = vmul.f32 %v3367_v25, %v3145_v10  ;;  %v490_v40 = vadd.f32 %v489_v49, %v339_v11  ;;  %v789_v25 = vmul.f32 %v3392_v5, %v4145_v31 }
0x28a5   :  { %v3153_v16 = vadd.f32 %v3152_v30, %v3021_v42  ;;  %v640_v33 = vadd.f32 %v639_v39, %v490_v40 }
0x28a7   :  { %v3161_v23 = vmul.f32 %v3159_v18, %v3153_v16  ;;  %v790_v63 = vadd.f32 %v789_v25, %v640_v33 }
0x28a8   :  { %v1322_v55 = vpop.permute.xlu2 %1321 }
0x28a9   :  { %v1324_v19 = vmul.f32 %v1322_v55, %v1316_v43  ;;  %v922_v58 = vadd.f32 %v921_v37, %v790_v63 }
0x28ab   :  { %v3163_v14 = vadd.f32 %v3161_v23, %v1324_v19  ;;  %v1054_v32 = vadd.f32 %v1053_v3, %v922_v58 }
0x28ad   :  { %v3164_v50 = vmul.f32 0.5, %v3163_v14  ;;  %v1186_v20 = vadd.f32 %v1185_v51, %v1054_v32 }
0x28af   :  { %3166 = vrot.lane.b32.xlu1 %v3164_v50, %s3761_s1  ;;  %v1318_v5 = vadd.f32 %v1317_v1, %v1186_v20  ;;  %s3183_s1 = sshll.u32 %s3764_s21, 4  ;;  %s3184_s1 = int_to_ptr.vmem [resolvable:$true] %s3183_s1 }
0x28b1   :  { %v1325_v47 = vmul.f32 %v1322_v55, %v1318_v5 }
0x28d4   :  { %v3149_v54 = vpop.permute.xlu1 %3148 }
0x28d5   :  { %v3151_v21 = vmul.f32 %v3149_v54, %v4820_v44 }
0x28d7   :  { %v3154_v31 = vmul.f32 %v3361_v27, %v3151_v21 }
0x28d9   :  { %v3155_v2 = vadd.f32 %v3154_v31, %v4889_v46 }
0x28db   :  { %v3162_v61 = vmul.f32 %v3159_v18, %v3155_v2 }
0x28dd   :  { %v3170_v41 = vadd.f32 %v3162_v61, %v1325_v47 }
0x28df   :  { %v3171_v13 = vmul.f32 0.5, %v3170_v41 }
0x28e1   :  { %3173 = vrot.lane.b32.xlu2 %v3171_v13, %s3763_s3 }
0x2921   :  { %v3167_v48 = vpop.permute.xlu1 %3166 }
0x2922   :  { %3169 = vst.msk [vmem:[#allocation3] sm:$0xff] %vm58_vm0, %v3167_v48 }
0x293b   :  { %v3174_v44 = vpop.permute.xlu2 %3173 }
0x293c   :  { %3177 = vst.msk [vmem:[#allocation3] sm:$0xff] %vm3176_vm9, %v3174_v44 }
0x293d   :  { %3188 = dma.vmem_to_hbm [thread:$0]  %s3184_s1, 128, %s3186_s12, [#allocation4]  }
0x293e   :  { %3757 = dma.done.wait [#allocation4], 128  }
0x293f   :  { %3758 = vsyncadd [#allocation4], 4294967168 }
0x2940   :  { %3193 = vsyncpa [#allocation4], 1 }

</bundles_post_ra>
